<compile_context>
chip_gen: v7x
topology: tpu7x:2x2x1
jax: 0.10.0
libtpu: 0.0.40
codegen_flags: <defaults>
</compile_context>

<pallas_src>
import math

import jax
import jax.numpy as jnp
from jax.experimental import pallas as pl
from jax.experimental.pallas import tpu as pltpu

# ----------------------------- model dims -----------------------------------
B = 2                      # batch
IMG = 64                   # input spatial size
CIN = 3                    # image channels (NCHW input, like PyTorch)
PATCH = 4                  # patch-embed size (res3 scale = IMG/4)
GRID3 = IMG // PATCH       # 16   res3 spatial
GRID4 = GRID3 // 2         # 8    res4 spatial
S3 = GRID3 * GRID3         # 256  res3 tokens
S4 = GRID4 * GRID4         # 64   res4 tokens
PDIM = PATCH * PATCH * CIN  # 48  patch-embed input features
DIM = 64                   # CONVS_DIM == DIM_PROJ (hidden dim everywhere)
LANG_DIM = 96              # cfg.MODEL.LANGUAGE_BACKBONE.LANG_DIM
L_TXT = 8                  # offline early_semantic_hidden tokens
N_CLS = 16                 # offline extra class embeddings
N_CLS_PAD = 128            # lane-dense padding for the class-logit output
N_Q = 16                   # object queries
MASK_DIM = 32              # mask-feature / mask-embed channels
FFN_DIM = 128
LOGIT_SCALE = 1.0 / 0.07
ATTN_SCALE = 1.0 / math.sqrt(DIM)


# ----------------- in-kernel helpers (traced inside pallas) ------------------
def _attend(x, x_bf, kv_bf, kv_t_bf, bias=None):
    """x:[S,D] attends to kv:[L,D]; returns x + softmax(x kv^T * s + bias) kv.
    Casts / transposes are hoisted by the caller; MXU operands bf16, softmax
    and accumulation f32, reciprocal on the EUP."""
    f32, bf16 = jnp.float32, jnp.bfloat16
    s = jnp.dot(x_bf, kv_t_bf, preferred_element_type=f32) * ATTN_SCALE
    if bias is not None:
        s = s + bias
    s = s - jnp.max(s, axis=-1, keepdims=True)
    p = jnp.exp(s)
    p = p * pl.reciprocal(jnp.sum(p, axis=-1, keepdims=True), approx=True)
    return x + jnp.dot(p.astype(bf16), kv_bf, preferred_element_type=f32)


def _l2norm(x, eps=1e-6):
    return x / (jnp.sqrt(jnp.sum(x * x, axis=-1, keepdims=True)) + eps)


# -------------------------- the fused forward kernel -------------------------
def _evap_kernel(patch_ref, hid_ref, msk_ref,
                 w_pe_ref, b_pe_ref, w_s1_ref, b_s1_ref, w_pm_ref, b_pm_ref,
                 lang_w_ref, mf_w_ref, mf_b_ref, query_ref,
                 w1_ref, b1_ref, w2_ref, b2_ref, me_w_ref, me_b_ref, ce_t_ref,
                 logits_ref, masks_ref):
    bf16, f32 = jnp.bfloat16, jnp.float32

    # ---------------- backbone stem (Swin-style, stays in VMEM) --------------
    # patch embed (4x4/s4 conv == linear on space-to-depth tokens)
    f1 = jnp.maximum(
        jnp.dot(patch_ref[0], w_pe_ref[...], preferred_element_type=f32)
        + b_pe_ref[...], 0.0)                                    # [S3, DIM]
    # channel-mixing stage at the res3 scale
    res3 = jnp.maximum(
        jnp.dot(f1.astype(bf16), w_s1_ref[...], preferred_element_type=f32)
        + b_s1_ref[...], 0.0)                                    # [S3, DIM]
    res3_bf = res3.astype(bf16)

    # 2x2 patch merging + linear: tokens are (p,q,a,b)-ordered, so every 2x2
    # quadrant is a contiguous 64-row block -> sum of 4 block matmuls, no
    # strided gather and no reshape inside the kernel.
    w_pm = w_pm_ref[...]                                         # [4*DIM, DIM]
    pm = b_pm_ref[...]
    for kq in range(4):
        pm = pm + jnp.dot(res3_bf[kq * S4:(kq + 1) * S4, :],
                          w_pm[kq * DIM:(kq + 1) * DIM, :],
                          preferred_element_type=f32)
    res4 = jnp.maximum(pm, 0.0)                                  # [S4, DIM]

    # -------- pixel decoder: language projection + text early fusion ---------
    txt = jnp.dot(hid_ref[0], lang_w_ref[...],
                  preferred_element_type=f32)                    # [L, DIM]
    txt_bf = txt.astype(bf16)
    txt_t_bf = txt.T.astype(bf16)                                # hoisted once
    kbias = jnp.where(msk_ref[0] > 0.5, 0.0, -1e9)               # [1, L]

    res3 = _attend(res3, res3_bf, txt_bf, txt_t_bf, kbias)
    res4 = _attend(res4, res4.astype(bf16), txt_bf, txt_t_bf, kbias)
    # post-fusion casts / transposes, hoisted and reused below
    res3_bf = res3.astype(bf16)
    res3_t_bf = res3.T.astype(bf16)
    res4_bf = res4.astype(bf16)
    res4_t_bf = res4.T.astype(bf16)

    # -------------------- pixel decoder: mask-feature head -------------------
    mask_feat = (jnp.dot(res3_bf, mf_w_ref[...], preferred_element_type=f32)
                 + mf_b_ref[...])                                # [S3, MASK_DIM]
    mask_feat_t_bf = mask_feat.T.astype(bf16)                    # [MASK_DIM, S3]

    # --------------------------- transformer predictor -----------------------
    q = query_ref[...]                                           # [N_Q, DIM]
    q = _attend(q, q.astype(bf16), res4_bf, res4_t_bf)
    q = _attend(q, q.astype(bf16), res3_bf, res3_t_bf)

    # FFN with residual
    h = jnp.maximum(
        jnp.dot(q.astype(bf16), w1_ref[...], preferred_element_type=f32)
        + b1_ref[...], 0.0)
    q = (q + jnp.dot(h.astype(bf16), w2_ref[...], preferred_element_type=f32)
         + b2_ref[...])
    q_bf = q.astype(bf16)

    # CLIP-style cosine class logits vs. offline class embeddings (f32 path;
    # embeddings arrive pre-normalized, pre-transposed, lane-padded to 128)
    logits = (jnp.dot(_l2norm(q), ce_t_ref[...], preferred_element_type=f32)
              * LOGIT_SCALE)
    logits_ref[0] = logits.astype(logits_ref.dtype)

    # per-query mask prediction: einsum('qc,nc->qn'), lane-dense (256 lanes)
    me = (jnp.dot(q_bf, me_w_ref[...], preferred_element_type=f32)
          + me_b_ref[...])                                       # [N_Q, MASK_DIM]
    masks_ref[0] = jnp.dot(me.astype(bf16), mask_feat_t_bf,
                           preferred_element_type=f32).astype(masks_ref.dtype)


def evap_fused(patches, hid, msk, params, ce_t):
    """Single launch: grid=(B,) 'parallel' (2 steps feed both v7x TCs)."""
    Bi = patches.shape[0]
    per_b = lambda b: (b, 0, 0)
    shared = lambda b: (0, 0)

    return pl.pallas_call(
        _evap_kernel,
        out_shape=(jax.ShapeDtypeStruct((Bi, N_Q, N_CLS_PAD), jnp.float32),
                   jax.ShapeDtypeStruct((Bi, N_Q, S3), jnp.float32)),
        grid=(Bi,),
        in_specs=[
            pl.BlockSpec((1, S3, PDIM), per_b),          # patch tokens (bf16)
            pl.BlockSpec((1, L_TXT, LANG_DIM), per_b),   # text hidden (bf16)
            pl.BlockSpec((1, 1, L_TXT), per_b),          # text mask (f32)
            pl.BlockSpec((PDIM, DIM), shared),           # patch_embed_w
            pl.BlockSpec((1, DIM), shared),              # patch_embed_b
            pl.BlockSpec((DIM, DIM), shared),            # stage_w
            pl.BlockSpec((1, DIM), shared),              # stage_b
            pl.BlockSpec((4 * DIM, DIM), shared),        # patch_merge_w
            pl.BlockSpec((1, DIM), shared),              # patch_merge_b
            pl.BlockSpec((LANG_DIM, DIM), shared),       # lang_projection
            pl.BlockSpec((DIM, MASK_DIM), shared),       # mask_feat_w
            pl.BlockSpec((1, MASK_DIM), shared),         # mask_feat_b
            pl.BlockSpec((N_Q, DIM), shared),            # query_embed (f32)
            pl.BlockSpec((DIM, FFN_DIM), shared),        # ffn_w1
            pl.BlockSpec((1, FFN_DIM), shared),          # ffn_b1
            pl.BlockSpec((FFN_DIM, DIM), shared),        # ffn_w2
            pl.BlockSpec((1, DIM), shared),              # ffn_b2
            pl.BlockSpec((DIM, MASK_DIM), shared),       # mask_embed_w
            pl.BlockSpec((1, MASK_DIM), shared),         # mask_embed_b
            pl.BlockSpec((DIM, N_CLS_PAD), shared),      # class embeds (f32)
        ],
        out_specs=(pl.BlockSpec((1, N_Q, N_CLS_PAD), per_b),
                   pl.BlockSpec((1, N_Q, S3), per_b)),
        compiler_params=pltpu.CompilerParams(
            dimension_semantics=("parallel",)),
    )(patches, hid, msk,
      params["patch_embed_w"], params["patch_embed_b"],
      params["stage_w"], params["stage_b"],
      params["patch_merge_w"], params["patch_merge_b"],
      params["lang_projection"],
      params["mask_feat_w"], params["mask_feat_b"],
      params["query_embed"],
      params["ffn_w1"], params["ffn_b1"], params["ffn_w2"], params["ffn_b2"],
      params["mask_embed_w"], params["mask_embed_b"],
      ce_t)


# --------------------------- layout glue (input only) ------------------------
def image_to_patches(images_nchw):
    """[B,3,H,W] -> bf16 patch tokens [B, S3, PDIM] ordered (p, q, a, b),
    where the 16x16 patch-grid position is (2a+p, 2b+q).  With this ordering
    the in-kernel 2x2 patch-merging quadrants are contiguous row blocks, so no
    strided gather / im2col tensor is ever needed."""
    x = jnp.transpose(images_nchw, (0, 2, 3, 1))                   # NHWC
    Bi, H, W, C = x.shape
    g = H // PATCH
    x = x.reshape(Bi, g, PATCH, g, PATCH, C)
    x = x.transpose(0, 1, 3, 2, 4, 5).reshape(Bi, g, g, PATCH * PATCH * C)
    x = x.reshape(Bi, g // 2, 2, g // 2, 2, PATCH * PATCH * C)     # (a,p,b,q)
    x = x.transpose(0, 2, 4, 1, 3, 5)                              # (p,q,a,b)
    return x.reshape(Bi, S3, PDIM).astype(jnp.bfloat16)


def masks_to_spatial(masks_flat):
    """[B, Q, S3] in (p,q,a,b) token order -> [B, Q, 16, 16] in (h, w)."""
    Bi, Q, _ = masks_flat.shape
    m = masks_flat.reshape(Bi, Q, 2, 2, GRID4, GRID4)              # (p,q,a,b)
    m = m.transpose(0, 1, 4, 2, 5, 3)                              # (a,p,b,q)
    return m.reshape(Bi, Q, GRID3, GRID3)


# ------------------------------- parameters ----------------------------------
def init_params(key):
    ks = jax.random.split(key, 16)

    def w(k, shape, fan_in):
        # weights pre-cast to bf16 (review item); biases stay f32
        return (jax.random.normal(k, shape, jnp.float32)
                / math.sqrt(fan_in)).astype(jnp.bfloat16)

    p = {
        # TODO(synk): Swin/ResNet backbone stand-in (patch-embed -> stage ->
        #             patch-merging; res3 16x16, res4 8x8), synthetic weights.
        "patch_embed_w": w(ks[0], (PDIM, DIM), PDIM),
        "patch_embed_b": jnp.zeros((1, DIM), jnp.float32),
        "stage_w": w(ks[1], (DIM, DIM), DIM),
        "stage_b": jnp.zeros((1, DIM), jnp.float32),
        "patch_merge_w": w(ks[2], (4 * DIM, DIM), 4 * DIM),
        "patch_merge_b": jnp.zeros((1, DIM), jnp.float32),
        # self.lang_projection = nn.Parameter(torch.rand(LANG_DIM, DIM_PROJ))
        "lang_projection": jax.random.uniform(
            ks[3], (LANG_DIM, DIM), jnp.float32).astype(jnp.bfloat16),
        # pixel decoder mask-feature head
        "mask_feat_w": w(ks[4], (DIM, MASK_DIM), DIM),
        "mask_feat_b": jnp.zeros((1, MASK_DIM), jnp.float32),
        # transformer predictor
        "query_embed": (jax.random.normal(ks[5], (N_Q, DIM), jnp.float32)
                        / math.sqrt(DIM)),
        "ffn_w1": w(ks[6], (DIM, FFN_DIM), DIM),
        "ffn_b1": jnp.zeros((1, FFN_DIM), jnp.float32),
        "ffn_w2": w(ks[7], (FFN_DIM, DIM), FFN_DIM),
        "ffn_b2": jnp.zeros((1, DIM), jnp.float32),
        "mask_embed_w": w(ks[8], (DIM, MASK_DIM), DIM),
        "mask_embed_b": jnp.zeros((1, MASK_DIM), jnp.float32),
    }
    # offline (use_offline_cls_embed=True) CLIP-derived buffers
    offline = {
        "extra_class_embeddings": jax.random.normal(ks[9], (N_CLS, DIM),
                                                    jnp.float32),
        "early_semantic_hidden": jax.random.normal(ks[10], (B, L_TXT, LANG_DIM),
                                                   jnp.float32),
        "early_semantic_masks": jnp.concatenate(
            [jnp.ones((B, L_TXT - 2), jnp.float32),
             jnp.array([[1.0, 1.0], [0.0, 0.0]], jnp.float32)], axis=1),
    }
    return p, offline


# ------------------------------- forward -------------------------------------
def evap_forward(images, params, offline):
    """images: [B, 3, H, W] float32 (PyTorch NCHW convention)."""
    Bi = images.shape[0]
    patches = image_to_patches(images)                           # [B, S3, 48] bf16
    hid = offline["early_semantic_hidden"].astype(jnp.bfloat16)
    msk = offline["early_semantic_masks"].reshape(Bi, 1, L_TXT)

    # offline class embeddings: normalize, transpose, lane-pad to 128 (once)
    ce = offline["extra_class_embeddings"]
    ce = ce / (jnp.linalg.norm(ce, axis=-1, keepdims=True) + 1e-6)
    ce_t = jnp.zeros((DIM, N_CLS_PAD), jnp.float32).at[:, :N_CLS].set(ce.T)

    logits_pad, masks_flat = evap_fused(patches, hid, msk, params, ce_t)

    # outputs[0] of the predictor
    return {"pred_logits": logits_pad[:, :, :N_CLS],
            "pred_masks": masks_to_spatial(masks_flat)}


# --------------------------------- main ---------------------------------------
if __name__ == "__main__":
    key = jax.random.PRNGKey(0)
    k_param, k_img = jax.random.split(key)
    params, offline = init_params(k_param)
    images = jax.random.normal(k_img, (B, CIN, IMG, IMG), jnp.float32)

    out = jax.jit(evap_forward)(images, params, offline)
    out = jax.block_until_ready(out)

    assert out["pred_logits"].shape == (B, N_Q, N_CLS)
    assert out["pred_masks"].shape == (B, N_Q, GRID3, GRID3)
    assert jnp.all(jnp.isfinite(out["pred_logits"]))
    assert jnp.all(jnp.isfinite(out["pred_masks"]))
    print("KERNEL_OK")
</pallas_src>

<mosaic_0001>
module attributes {stable_mosaic.version = 11 : i64} {
  func.func @_evap_kernel(%arg0: i32, %arg1: memref<1x256x48xbf16, #tpu.memory_space<vmem>>, %arg2: memref<1x8x96xbf16, #tpu.memory_space<vmem>>, %arg3: memref<1x1x8xf32, #tpu.memory_space<vmem>>, %arg4: memref<48x64xbf16, #tpu.memory_space<vmem>>, %arg5: memref<1x64xf32, #tpu.memory_space<vmem>>, %arg6: memref<64x64xbf16, #tpu.memory_space<vmem>>, %arg7: memref<1x64xf32, #tpu.memory_space<vmem>>, %arg8: memref<256x64xbf16, #tpu.memory_space<vmem>>, %arg9: memref<1x64xf32, #tpu.memory_space<vmem>>, %arg10: memref<96x64xbf16, #tpu.memory_space<vmem>>, %arg11: memref<64x32xbf16, #tpu.memory_space<vmem>>, %arg12: memref<1x32xf32, #tpu.memory_space<vmem>>, %arg13: memref<16x64xf32, #tpu.memory_space<vmem>>, %arg14: memref<64x128xbf16, #tpu.memory_space<vmem>>, %arg15: memref<1x128xf32, #tpu.memory_space<vmem>>, %arg16: memref<128x64xbf16, #tpu.memory_space<vmem>>, %arg17: memref<1x64xf32, #tpu.memory_space<vmem>>, %arg18: memref<64x32xbf16, #tpu.memory_space<vmem>>, %arg19: memref<1x32xf32, #tpu.memory_space<vmem>>, %arg20: memref<64x128xf32, #tpu.memory_space<vmem>>, %arg21: memref<1x16x128xf32, #tpu.memory_space<vmem>>, %arg22: memref<1x16x256xf32, #tpu.memory_space<vmem>>) attributes {dimension_semantics = [#tpu.dimension_semantics<parallel>], iteration_bounds = array<i64: 2>, scalar_prefetch = 0 : i64, scratch_operands = 0 : i64, tpu.core_type = #tpu.core_type<tc>, window_params = [{transform_indices = @transform_0, window_bounds = array<i64: 1, 256, 48>}, {transform_indices = @transform_1, window_bounds = array<i64: 1, 8, 96>}, {transform_indices = @transform_2, window_bounds = array<i64: 1, 1, 8>}, {pipeline_mode = #tpu.pipeline_mode<synchronous>, transform_indices = @transform_3, window_bounds = array<i64: 48, 64>}, {pipeline_mode = #tpu.pipeline_mode<synchronous>, transform_indices = @transform_4, window_bounds = array<i64: 1, 64>}, {pipeline_mode = #tpu.pipeline_mode<synchronous>, transform_indices = @transform_5, window_bounds = array<i64: 64, 64>}, {pipeline_mode = #tpu.pipeline_mode<synchronous>, transform_indices = @transform_6, window_bounds = array<i64: 1, 64>}, {pipeline_mode = #tpu.pipeline_mode<synchronous>, transform_indices = @transform_7, window_bounds = array<i64: 256, 64>}, {pipeline_mode = #tpu.pipeline_mode<synchronous>, transform_indices = @transform_8, window_bounds = array<i64: 1, 64>}, {pipeline_mode = #tpu.pipeline_mode<synchronous>, transform_indices = @transform_9, window_bounds = array<i64: 96, 64>}, {pipeline_mode = #tpu.pipeline_mode<synchronous>, transform_indices = @transform_10, window_bounds = array<i64: 64, 32>}, {pipeline_mode = #tpu.pipeline_mode<synchronous>, transform_indices = @transform_11, window_bounds = array<i64: 1, 32>}, {pipeline_mode = #tpu.pipeline_mode<synchronous>, transform_indices = @transform_12, window_bounds = array<i64: 16, 64>}, {pipeline_mode = #tpu.pipeline_mode<synchronous>, transform_indices = @transform_13, window_bounds = array<i64: 64, 128>}, {pipeline_mode = #tpu.pipeline_mode<synchronous>, transform_indices = @transform_14, window_bounds = array<i64: 1, 128>}, {pipeline_mode = #tpu.pipeline_mode<synchronous>, transform_indices = @transform_15, window_bounds = array<i64: 128, 64>}, {pipeline_mode = #tpu.pipeline_mode<synchronous>, transform_indices = @transform_16, window_bounds = array<i64: 1, 64>}, {pipeline_mode = #tpu.pipeline_mode<synchronous>, transform_indices = @transform_17, window_bounds = array<i64: 64, 32>}, {pipeline_mode = #tpu.pipeline_mode<synchronous>, transform_indices = @transform_18, window_bounds = array<i64: 1, 32>}, {pipeline_mode = #tpu.pipeline_mode<synchronous>, transform_indices = @transform_19, window_bounds = array<i64: 64, 128>}, {transform_indices = @transform_20, window_bounds = array<i64: 1, 16, 128>}, {transform_indices = @transform_21, window_bounds = array<i64: 1, 16, 256>}]} {
    %c0 = arith.constant 0 : index
    %c0_0 = arith.constant 0 : index
    %c0_1 = arith.constant 0 : index
    %0 = vector.load %arg1[%c0, %c0_0, %c0_1] : memref<1x256x48xbf16, #tpu.memory_space<vmem>>, vector<1x256x48xbf16>
    %1 = vector.shape_cast %0 : vector<1x256x48xbf16> to vector<256x48xbf16>
    %c0_2 = arith.constant 0 : index
    %c0_3 = arith.constant 0 : index
    %2 = vector.load %arg4[%c0_2, %c0_3] : memref<48x64xbf16, #tpu.memory_space<vmem>>, vector<48x64xbf16>
    %cst = arith.constant dense<0.000000e+00> : vector<256x64xf32>
    %3 = tpu.matmul %1, %2, %cst {dimension_numbers = #tpu.dot_dimension_numbers<[1], [0], [0], [1], [0, 0, 1, 1], [], []>} : vector<256x48xbf16>, vector<48x64xbf16>, vector<256x64xf32> -> vector<256x64xf32>
    %c0_4 = arith.constant 0 : index
    %c0_5 = arith.constant 0 : index
    %4 = vector.load %arg5[%c0_4, %c0_5] : memref<1x64xf32, #tpu.memory_space<vmem>>, vector<1x64xf32>
    %5 = vector.broadcast %4 : vector<1x64xf32> to vector<256x64xf32>
    %6 = arith.addf %3, %5 : vector<256x64xf32>
    %cst_6 = arith.constant 0.000000e+00 : f32
    %7 = vector.broadcast %cst_6 : f32 to vector<256x64xf32>
    %8 = arith.maximumf %6, %7 : vector<256x64xf32>
    %9 = arith.truncf %8 : vector<256x64xf32> to vector<256x64xbf16>
    %c0_7 = arith.constant 0 : index
    %c0_8 = arith.constant 0 : index
    %10 = vector.load %arg6[%c0_7, %c0_8] : memref<64x64xbf16, #tpu.memory_space<vmem>>, vector<64x64xbf16>
    %cst_9 = arith.constant dense<0.000000e+00> : vector<256x64xf32>
    %11 = tpu.matmul %9, %10, %cst_9 {dimension_numbers = #tpu.dot_dimension_numbers<[1], [0], [0], [1], [0, 0, 1, 1], [], []>} : vector<256x64xbf16>, vector<64x64xbf16>, vector<256x64xf32> -> vector<256x64xf32>
    %c0_10 = arith.constant 0 : index
    %c0_11 = arith.constant 0 : index
    %12 = vector.load %arg7[%c0_10, %c0_11] : memref<1x64xf32, #tpu.memory_space<vmem>>, vector<1x64xf32>
    %13 = vector.broadcast %12 : vector<1x64xf32> to vector<256x64xf32>
    %14 = arith.addf %11, %13 : vector<256x64xf32>
    %cst_12 = arith.constant 0.000000e+00 : f32
    %15 = vector.broadcast %cst_12 : f32 to vector<256x64xf32>
    %16 = arith.maximumf %14, %15 : vector<256x64xf32>
    %17 = arith.truncf %16 : vector<256x64xf32> to vector<256x64xbf16>
    %c0_13 = arith.constant 0 : index
    %c0_14 = arith.constant 0 : index
    %18 = vector.load %arg8[%c0_13, %c0_14] : memref<256x64xbf16, #tpu.memory_space<vmem>>, vector<256x64xbf16>
    %c0_15 = arith.constant 0 : index
    %c0_16 = arith.constant 0 : index
    %19 = vector.load %arg9[%c0_15, %c0_16] : memref<1x64xf32, #tpu.memory_space<vmem>>, vector<1x64xf32>
    %20 = vector.extract_strided_slice %17 {offsets = [0, 0], sizes = [64, 64], strides = [1, 1]} : vector<256x64xbf16> to vector<64x64xbf16>
    %21 = vector.extract_strided_slice %18 {offsets = [0, 0], sizes = [64, 64], strides = [1, 1]} : vector<256x64xbf16> to vector<64x64xbf16>
    %cst_17 = arith.constant dense<0.000000e+00> : vector<64x64xf32>
    %22 = tpu.matmul %20, %21, %cst_17 {dimension_numbers = #tpu.dot_dimension_numbers<[1], [0], [0], [1], [0, 0, 1, 1], [], []>} : vector<64x64xbf16>, vector<64x64xbf16>, vector<64x64xf32> -> vector<64x64xf32>
    %23 = vector.broadcast %19 : vector<1x64xf32> to vector<64x64xf32>
    %24 = arith.addf %23, %22 : vector<64x64xf32>
    %25 = vector.extract_strided_slice %17 {offsets = [64, 0], sizes = [64, 64], strides = [1, 1]} : vector<256x64xbf16> to vector<64x64xbf16>
    %26 = vector.extract_strided_slice %18 {offsets = [64, 0], sizes = [64, 64], strides = [1, 1]} : vector<256x64xbf16> to vector<64x64xbf16>
    %cst_18 = arith.constant dense<0.000000e+00> : vector<64x64xf32>
    %27 = tpu.matmul %25, %26, %cst_18 {dimension_numbers = #tpu.dot_dimension_numbers<[1], [0], [0], [1], [0, 0, 1, 1], [], []>} : vector<64x64xbf16>, vector<64x64xbf16>, vector<64x64xf32> -> vector<64x64xf32>
    %28 = arith.addf %24, %27 : vector<64x64xf32>
    %29 = vector.extract_strided_slice %17 {offsets = [128, 0], sizes = [64, 64], strides = [1, 1]} : vector<256x64xbf16> to vector<64x64xbf16>
    %30 = vector.extract_strided_slice %18 {offsets = [128, 0], sizes = [64, 64], strides = [1, 1]} : vector<256x64xbf16> to vector<64x64xbf16>
    %cst_19 = arith.constant dense<0.000000e+00> : vector<64x64xf32>
    %31 = tpu.matmul %29, %30, %cst_19 {dimension_numbers = #tpu.dot_dimension_numbers<[1], [0], [0], [1], [0, 0, 1, 1], [], []>} : vector<64x64xbf16>, vector<64x64xbf16>, vector<64x64xf32> -> vector<64x64xf32>
    %32 = arith.addf %28, %31 : vector<64x64xf32>
    %33 = vector.extract_strided_slice %17 {offsets = [192, 0], sizes = [64, 64], strides = [1, 1]} : vector<256x64xbf16> to vector<64x64xbf16>
    %34 = vector.extract_strided_slice %18 {offsets = [192, 0], sizes = [64, 64], strides = [1, 1]} : vector<256x64xbf16> to vector<64x64xbf16>
    %cst_20 = arith.constant dense<0.000000e+00> : vector<64x64xf32>
    %35 = tpu.matmul %33, %34, %cst_20 {dimension_numbers = #tpu.dot_dimension_numbers<[1], [0], [0], [1], [0, 0, 1, 1], [], []>} : vector<64x64xbf16>, vector<64x64xbf16>, vector<64x64xf32> -> vector<64x64xf32>
    %36 = arith.addf %32, %35 : vector<64x64xf32>
    %cst_21 = arith.constant 0.000000e+00 : f32
    %37 = vector.broadcast %cst_21 : f32 to vector<64x64xf32>
    %38 = arith.maximumf %36, %37 : vector<64x64xf32>
    %c0_22 = arith.constant 0 : index
    %c0_23 = arith.constant 0 : index
    %c0_24 = arith.constant 0 : index
    %39 = vector.load %arg2[%c0_22, %c0_23, %c0_24] : memref<1x8x96xbf16, #tpu.memory_space<vmem>>, vector<1x8x96xbf16>
    %40 = vector.shape_cast %39 : vector<1x8x96xbf16> to vector<8x96xbf16>
    %c0_25 = arith.constant 0 : index
    %c0_26 = arith.constant 0 : index
    %41 = vector.load %arg10[%c0_25, %c0_26] : memref<96x64xbf16, #tpu.memory_space<vmem>>, vector<96x64xbf16>
    %cst_27 = arith.constant dense<0.000000e+00> : vector<8x64xf32>
    %42 = tpu.matmul %40, %41, %cst_27 {dimension_numbers = #tpu.dot_dimension_numbers<[1], [0], [0], [1], [0, 0, 1, 1], [], []>} : vector<8x96xbf16>, vector<96x64xbf16>, vector<8x64xf32> -> vector<8x64xf32>
    %43 = arith.truncf %42 : vector<8x64xf32> to vector<8x64xbf16>
    %44 = tpu.transpose %42, [1, 0] : vector<8x64xf32> -> vector<64x8xf32>
    %45 = arith.truncf %44 : vector<64x8xf32> to vector<64x8xbf16>
    %c0_28 = arith.constant 0 : index
    %c0_29 = arith.constant 0 : index
    %c0_30 = arith.constant 0 : index
    %46 = vector.load %arg3[%c0_28, %c0_29, %c0_30] : memref<1x1x8xf32, #tpu.memory_space<vmem>>, vector<1x1x8xf32>
    %47 = vector.shape_cast %46 : vector<1x1x8xf32> to vector<1x8xf32>
    %cst_31 = arith.constant 5.000000e-01 : f32
    %48 = vector.broadcast %cst_31 : f32 to vector<1x8xf32>
    %49 = arith.cmpf ogt, %47, %48 : vector<1x8xf32>
    %cst_32 = arith.constant 0.000000e+00 : f32
    %cst_33 = arith.constant -1.000000e+09 : f32
    %50 = vector.broadcast %cst_32 : f32 to vector<1x8xf32>
    %51 = vector.broadcast %cst_33 : f32 to vector<1x8xf32>
    %52 = arith.select %49, %50, %51 : vector<1x8xi1>, vector<1x8xf32>
    %cst_34 = arith.constant dense<0.000000e+00> : vector<256x8xf32>
    %53 = tpu.matmul %17, %45, %cst_34 {dimension_numbers = #tpu.dot_dimension_numbers<[1], [0], [0], [1], [0, 0, 1, 1], [], []>} : vector<256x64xbf16>, vector<64x8xbf16>, vector<256x8xf32> -> vector<256x8xf32>
    %cst_35 = arith.constant 1.250000e-01 : f32
    %54 = vector.broadcast %cst_35 : f32 to vector<256x8xf32>
    %55 = arith.mulf %53, %54 : vector<256x8xf32>
    %56 = vector.broadcast %52 : vector<1x8xf32> to vector<256x8xf32>
    %57 = arith.addf %55, %56 : vector<256x8xf32>
    %cst_36 = arith.constant dense<0xFF800000> : vector<256xf32>
    %58 = vector.multi_reduction <maximumf>, %57, %cst_36 [1] : vector<256x8xf32> to vector<256xf32>
    %59 = vector.shape_cast %58 : vector<256xf32> to vector<256x1xf32>
    %60 = vector.broadcast %59 : vector<256x1xf32> to vector<256x8xf32>
    %61 = arith.subf %57, %60 : vector<256x8xf32>
    %62 = math.exp %61 : vector<256x8xf32>
    %cst_37 = arith.constant dense<0.000000e+00> : vector<256xf32>
    %63 = vector.multi_reduction <add>, %62, %cst_37 [1] : vector<256x8xf32> to vector<256xf32>
    %64 = vector.shape_cast %63 : vector<256xf32> to vector<256x1xf32>
    %65 = tpu.reciprocal %64 {approx = true} : vector<256x1xf32> -> vector<256x1xf32>
    %66 = vector.broadcast %65 : vector<256x1xf32> to vector<256x8xf32>
    %67 = arith.mulf %62, %66 : vector<256x8xf32>
    %68 = arith.truncf %67 : vector<256x8xf32> to vector<256x8xbf16>
    %cst_38 = arith.constant dense<0.000000e+00> : vector<256x64xf32>
    %69 = tpu.matmul %68, %43, %cst_38 {dimension_numbers = #tpu.dot_dimension_numbers<[1], [0], [0], [1], [0, 0, 1, 1], [], []>} : vector<256x8xbf16>, vector<8x64xbf16>, vector<256x64xf32> -> vector<256x64xf32>
    %70 = arith.addf %16, %69 : vector<256x64xf32>
    %71 = arith.truncf %38 : vector<64x64xf32> to vector<64x64xbf16>
    %cst_39 = arith.constant dense<0.000000e+00> : vector<64x8xf32>
    %72 = tpu.matmul %71, %45, %cst_39 {dimension_numbers = #tpu.dot_dimension_numbers<[1], [0], [0], [1], [0, 0, 1, 1], [], []>} : vector<64x64xbf16>, vector<64x8xbf16>, vector<64x8xf32> -> vector<64x8xf32>
    %cst_40 = arith.constant 1.250000e-01 : f32
    %73 = vector.broadcast %cst_40 : f32 to vector<64x8xf32>
    %74 = arith.mulf %72, %73 : vector<64x8xf32>
    %75 = vector.broadcast %52 : vector<1x8xf32> to vector<64x8xf32>
    %76 = arith.addf %74, %75 : vector<64x8xf32>
    %cst_41 = arith.constant dense<0xFF800000> : vector<64xf32>
    %77 = vector.multi_reduction <maximumf>, %76, %cst_41 [1] : vector<64x8xf32> to vector<64xf32>
    %78 = vector.shape_cast %77 : vector<64xf32> to vector<64x1xf32>
    %79 = vector.broadcast %78 : vector<64x1xf32> to vector<64x8xf32>
    %80 = arith.subf %76, %79 : vector<64x8xf32>
    %81 = math.exp %80 : vector<64x8xf32>
    %cst_42 = arith.constant dense<0.000000e+00> : vector<64xf32>
    %82 = vector.multi_reduction <add>, %81, %cst_42 [1] : vector<64x8xf32> to vector<64xf32>
    %83 = vector.shape_cast %82 : vector<64xf32> to vector<64x1xf32>
    %84 = tpu.reciprocal %83 {approx = true} : vector<64x1xf32> -> vector<64x1xf32>
    %85 = vector.broadcast %84 : vector<64x1xf32> to vector<64x8xf32>
    %86 = arith.mulf %81, %85 : vector<64x8xf32>
    %87 = arith.truncf %86 : vector<64x8xf32> to vector<64x8xbf16>
    %cst_43 = arith.constant dense<0.000000e+00> : vector<64x64xf32>
    %88 = tpu.matmul %87, %43, %cst_43 {dimension_numbers = #tpu.dot_dimension_numbers<[1], [0], [0], [1], [0, 0, 1, 1], [], []>} : vector<64x8xbf16>, vector<8x64xbf16>, vector<64x64xf32> -> vector<64x64xf32>
    %89 = arith.addf %38, %88 : vector<64x64xf32>
    %90 = arith.truncf %70 : vector<256x64xf32> to vector<256x64xbf16>
    %91 = tpu.transpose %70, [1, 0] : vector<256x64xf32> -> vector<64x256xf32>
    %92 = arith.truncf %91 : vector<64x256xf32> to vector<64x256xbf16>
    %93 = arith.truncf %89 : vector<64x64xf32> to vector<64x64xbf16>
    %94 = tpu.transpose %89, [1, 0] : vector<64x64xf32> -> vector<64x64xf32>
    %95 = arith.truncf %94 : vector<64x64xf32> to vector<64x64xbf16>
    %c0_44 = arith.constant 0 : index
    %c0_45 = arith.constant 0 : index
    %96 = vector.load %arg11[%c0_44, %c0_45] : memref<64x32xbf16, #tpu.memory_space<vmem>>, vector<64x32xbf16>
    %cst_46 = arith.constant dense<0.000000e+00> : vector<256x32xf32>
    %97 = tpu.matmul %90, %96, %cst_46 {dimension_numbers = #tpu.dot_dimension_numbers<[1], [0], [0], [1], [0, 0, 1, 1], [], []>} : vector<256x64xbf16>, vector<64x32xbf16>, vector<256x32xf32> -> vector<256x32xf32>
    %c0_47 = arith.constant 0 : index
    %c0_48 = arith.constant 0 : index
    %98 = vector.load %arg12[%c0_47, %c0_48] : memref<1x32xf32, #tpu.memory_space<vmem>>, vector<1x32xf32>
    %99 = vector.broadcast %98 : vector<1x32xf32> to vector<256x32xf32>
    %100 = arith.addf %97, %99 : vector<256x32xf32>
    %101 = tpu.transpose %100, [1, 0] : vector<256x32xf32> -> vector<32x256xf32>
    %102 = arith.truncf %101 : vector<32x256xf32> to vector<32x256xbf16>
    %c0_49 = arith.constant 0 : index
    %c0_50 = arith.constant 0 : index
    %103 = vector.load %arg13[%c0_49, %c0_50] : memref<16x64xf32, #tpu.memory_space<vmem>>, vector<16x64xf32>
    %104 = arith.truncf %103 : vector<16x64xf32> to vector<16x64xbf16>
    %cst_51 = arith.constant dense<0.000000e+00> : vector<16x64xf32>
    %105 = tpu.matmul %104, %95, %cst_51 {dimension_numbers = #tpu.dot_dimension_numbers<[1], [0], [0], [1], [0, 0, 1, 1], [], []>} : vector<16x64xbf16>, vector<64x64xbf16>, vector<16x64xf32> -> vector<16x64xf32>
    %cst_52 = arith.constant 1.250000e-01 : f32
    %106 = vector.broadcast %cst_52 : f32 to vector<16x64xf32>
    %107 = arith.mulf %105, %106 : vector<16x64xf32>
    %cst_53 = arith.constant dense<0xFF800000> : vector<16xf32>
    %108 = vector.multi_reduction <maximumf>, %107, %cst_53 [1] : vector<16x64xf32> to vector<16xf32>
    %109 = vector.shape_cast %108 : vector<16xf32> to vector<16x1xf32>
    %110 = vector.broadcast %109 : vector<16x1xf32> to vector<16x64xf32>
    %111 = arith.subf %107, %110 : vector<16x64xf32>
    %112 = math.exp %111 : vector<16x64xf32>
    %cst_54 = arith.constant dense<0.000000e+00> : vector<16xf32>
    %113 = vector.multi_reduction <add>, %112, %cst_54 [1] : vector<16x64xf32> to vector<16xf32>
    %114 = vector.shape_cast %113 : vector<16xf32> to vector<16x1xf32>
    %115 = tpu.reciprocal %114 {approx = true} : vector<16x1xf32> -> vector<16x1xf32>
    %116 = vector.broadcast %115 : vector<16x1xf32> to vector<16x64xf32>
    %117 = arith.mulf %112, %116 : vector<16x64xf32>
    %118 = arith.truncf %117 : vector<16x64xf32> to vector<16x64xbf16>
    %cst_55 = arith.constant dense<0.000000e+00> : vector<16x64xf32>
    %119 = tpu.matmul %118, %93, %cst_55 {dimension_numbers = #tpu.dot_dimension_numbers<[1], [0], [0], [1], [0, 0, 1, 1], [], []>} : vector<16x64xbf16>, vector<64x64xbf16>, vector<16x64xf32> -> vector<16x64xf32>
    %120 = arith.addf %103, %119 : vector<16x64xf32>
    %121 = arith.truncf %120 : vector<16x64xf32> to vector<16x64xbf16>
    %cst_56 = arith.constant dense<0.000000e+00> : vector<16x256xf32>
    %122 = tpu.matmul %121, %92, %cst_56 {dimension_numbers = #tpu.dot_dimension_numbers<[1], [0], [0], [1], [0, 0, 1, 1], [], []>} : vector<16x64xbf16>, vector<64x256xbf16>, vector<16x256xf32> -> vector<16x256xf32>
    %cst_57 = arith.constant 1.250000e-01 : f32
    %123 = vector.broadcast %cst_57 : f32 to vector<16x256xf32>
    %124 = arith.mulf %122, %123 : vector<16x256xf32>
    %cst_58 = arith.constant dense<0xFF800000> : vector<16xf32>
    %125 = vector.multi_reduction <maximumf>, %124, %cst_58 [1] : vector<16x256xf32> to vector<16xf32>
    %126 = vector.shape_cast %125 : vector<16xf32> to vector<16x1xf32>
    %127 = vector.broadcast %126 : vector<16x1xf32> to vector<16x256xf32>
    %128 = arith.subf %124, %127 : vector<16x256xf32>
    %129 = math.exp %128 : vector<16x256xf32>
    %cst_59 = arith.constant dense<0.000000e+00> : vector<16xf32>
    %130 = vector.multi_reduction <add>, %129, %cst_59 [1] : vector<16x256xf32> to vector<16xf32>
    %131 = vector.shape_cast %130 : vector<16xf32> to vector<16x1xf32>
    %132 = tpu.reciprocal %131 {approx = true} : vector<16x1xf32> -> vector<16x1xf32>
    %133 = vector.broadcast %132 : vector<16x1xf32> to vector<16x256xf32>
    %134 = arith.mulf %129, %133 : vector<16x256xf32>
    %135 = arith.truncf %134 : vector<16x256xf32> to vector<16x256xbf16>
    %cst_60 = arith.constant dense<0.000000e+00> : vector<16x64xf32>
    %136 = tpu.matmul %135, %90, %cst_60 {dimension_numbers = #tpu.dot_dimension_numbers<[1], [0], [0], [1], [0, 0, 1, 1], [], []>} : vector<16x256xbf16>, vector<256x64xbf16>, vector<16x64xf32> -> vector<16x64xf32>
    %137 = arith.addf %120, %136 : vector<16x64xf32>
    %138 = arith.truncf %137 : vector<16x64xf32> to vector<16x64xbf16>
    %c0_61 = arith.constant 0 : index
    %c0_62 = arith.constant 0 : index
    %139 = vector.load %arg14[%c0_61, %c0_62] : memref<64x128xbf16, #tpu.memory_space<vmem>>, vector<64x128xbf16>
    %cst_63 = arith.constant dense<0.000000e+00> : vector<16x128xf32>
    %140 = tpu.matmul %138, %139, %cst_63 {dimension_numbers = #tpu.dot_dimension_numbers<[1], [0], [0], [1], [0, 0, 1, 1], [], []>} : vector<16x64xbf16>, vector<64x128xbf16>, vector<16x128xf32> -> vector<16x128xf32>
    %c0_64 = arith.constant 0 : index
    %c0_65 = arith.constant 0 : index
    %141 = vector.load %arg15[%c0_64, %c0_65] : memref<1x128xf32, #tpu.memory_space<vmem>>, vector<1x128xf32>
    %142 = vector.broadcast %141 : vector<1x128xf32> to vector<16x128xf32>
    %143 = arith.addf %140, %142 : vector<16x128xf32>
    %cst_66 = arith.constant 0.000000e+00 : f32
    %144 = vector.broadcast %cst_66 : f32 to vector<16x128xf32>
    %145 = arith.maximumf %143, %144 : vector<16x128xf32>
    %146 = arith.truncf %145 : vector<16x128xf32> to vector<16x128xbf16>
    %c0_67 = arith.constant 0 : index
    %c0_68 = arith.constant 0 : index
    %147 = vector.load %arg16[%c0_67, %c0_68] : memref<128x64xbf16, #tpu.memory_space<vmem>>, vector<128x64xbf16>
    %cst_69 = arith.constant dense<0.000000e+00> : vector<16x64xf32>
    %148 = tpu.matmul %146, %147, %cst_69 {dimension_numbers = #tpu.dot_dimension_numbers<[1], [0], [0], [1], [0, 0, 1, 1], [], []>} : vector<16x128xbf16>, vector<128x64xbf16>, vector<16x64xf32> -> vector<16x64xf32>
    %149 = arith.addf %137, %148 : vector<16x64xf32>
    %c0_70 = arith.constant 0 : index
    %c0_71 = arith.constant 0 : index
    %150 = vector.load %arg17[%c0_70, %c0_71] : memref<1x64xf32, #tpu.memory_space<vmem>>, vector<1x64xf32>
    %151 = vector.broadcast %150 : vector<1x64xf32> to vector<16x64xf32>
    %152 = arith.addf %149, %151 : vector<16x64xf32>
    %153 = arith.truncf %152 : vector<16x64xf32> to vector<16x64xbf16>
    %154 = arith.mulf %152, %152 : vector<16x64xf32>
    %cst_72 = arith.constant dense<0.000000e+00> : vector<16xf32>
    %155 = vector.multi_reduction <add>, %154, %cst_72 [1] : vector<16x64xf32> to vector<16xf32>
    %156 = vector.shape_cast %155 : vector<16xf32> to vector<16x1xf32>
    %157 = math.sqrt %156 : vector<16x1xf32>
    %cst_73 = arith.constant 9.99999997E-7 : f32
    %158 = vector.broadcast %cst_73 : f32 to vector<16x1xf32>
    %159 = arith.addf %157, %158 : vector<16x1xf32>
    %160 = vector.broadcast %159 : vector<16x1xf32> to vector<16x64xf32>
    %161 = arith.divf %152, %160 : vector<16x64xf32>
    %c0_74 = arith.constant 0 : index
    %c0_75 = arith.constant 0 : index
    %162 = vector.load %arg20[%c0_74, %c0_75] : memref<64x128xf32, #tpu.memory_space<vmem>>, vector<64x128xf32>
    %cst_76 = arith.constant dense<0.000000e+00> : vector<16x128xf32>
    %163 = tpu.matmul %161, %162, %cst_76 {dimension_numbers = #tpu.dot_dimension_numbers<[1], [0], [0], [1], [0, 0, 1, 1], [], []>} : vector<16x64xf32>, vector<64x128xf32>, vector<16x128xf32> -> vector<16x128xf32>
    %cst_77 = arith.constant 14.2857141 : f32
    %164 = vector.broadcast %cst_77 : f32 to vector<16x128xf32>
    %165 = arith.mulf %163, %164 : vector<16x128xf32>
    %c0_78 = arith.constant 0 : index
    %c0_79 = arith.constant 0 : index
    %c0_80 = arith.constant 0 : index
    %166 = vector.load %arg21[%c0_78, %c0_79, %c0_80] : memref<1x16x128xf32, #tpu.memory_space<vmem>>, vector<1x16x128xf32>
    %167 = vector.shape_cast %166 : vector<1x16x128xf32> to vector<16x128xf32>
    %168 = vector.shape_cast %165 : vector<16x128xf32> to vector<1x16x128xf32>
    tpu.vector_store %arg21[%c0_78, %c0_79, %c0_80], %168 {strides = array<i32>} : memref<1x16x128xf32, #tpu.memory_space<vmem>>, vector<1x16x128xf32>,
    %c0_81 = arith.constant 0 : index
    %c0_82 = arith.constant 0 : index
    %169 = vector.load %arg18[%c0_81, %c0_82] : memref<64x32xbf16, #tpu.memory_space<vmem>>, vector<64x32xbf16>
    %cst_83 = arith.constant dense<0.000000e+00> : vector<16x32xf32>
    %170 = tpu.matmul %153, %169, %cst_83 {dimension_numbers = #tpu.dot_dimension_numbers<[1], [0], [0], [1], [0, 0, 1, 1], [], []>} : vector<16x64xbf16>, vector<64x32xbf16>, vector<16x32xf32> -> vector<16x32xf32>
    %c0_84 = arith.constant 0 : index
    %c0_85 = arith.constant 0 : index
    %171 = vector.load %arg19[%c0_84, %c0_85] : memref<1x32xf32, #tpu.memory_space<vmem>>, vector<1x32xf32>
    %172 = vector.broadcast %171 : vector<1x32xf32> to vector<16x32xf32>
    %173 = arith.addf %170, %172 : vector<16x32xf32>
    %174 = arith.truncf %173 : vector<16x32xf32> to vector<16x32xbf16>
    %cst_86 = arith.constant dense<0.000000e+00> : vector<16x256xf32>
    %175 = tpu.matmul %174, %102, %cst_86 {dimension_numbers = #tpu.dot_dimension_numbers<[1], [0], [0], [1], [0, 0, 1, 1], [], []>} : vector<16x32xbf16>, vector<32x256xbf16>, vector<16x256xf32> -> vector<16x256xf32>
    %c0_87 = arith.constant 0 : index
    %c0_88 = arith.constant 0 : index
    %c0_89 = arith.constant 0 : index
    %176 = vector.load %arg22[%c0_87, %c0_88, %c0_89] : memref<1x16x256xf32, #tpu.memory_space<vmem>>, vector<1x16x256xf32>
    %177 = vector.shape_cast %176 : vector<1x16x256xf32> to vector<16x256xf32>
    %178 = vector.shape_cast %175 : vector<16x256xf32> to vector<1x16x256xf32>
    tpu.vector_store %arg22[%c0_87, %c0_88, %c0_89], %178 {strides = array<i32>} : memref<1x16x256xf32, #tpu.memory_space<vmem>>, vector<1x16x256xf32>,
    return
  }
  func.func @transform_0(%arg0: i32) -> (i32, i32, i32) {
    %c0_i32 = arith.constant 0 : i32
    %c0_i32_0 = arith.constant 0 : i32
    %c0_i32_1 = arith.constant 0 : i32
    return %arg0, %c0_i32, %c0_i32_0 : i32, i32, i32
  }
  func.func @transform_1(%arg0: i32) -> (i32, i32, i32) {
    %c0_i32 = arith.constant 0 : i32
    %c0_i32_0 = arith.constant 0 : i32
    %c0_i32_1 = arith.constant 0 : i32
    return %arg0, %c0_i32, %c0_i32_0 : i32, i32, i32
  }
  func.func @transform_2(%arg0: i32) -> (i32, i32, i32) {
    %c0_i32 = arith.constant 0 : i32
    %c0_i32_0 = arith.constant 0 : i32
    %c0_i32_1 = arith.constant 0 : i32
    return %arg0, %c0_i32, %c0_i32_0 : i32, i32, i32
  }
  func.func @transform_3(%arg0: i32) -> (i32, i32) {
    %c0_i32 = arith.constant 0 : i32
    %c0_i32_0 = arith.constant 0 : i32
    %c0_i32_1 = arith.constant 0 : i32
    return %c0_i32, %c0_i32_0 : i32, i32
  }
  func.func @transform_4(%arg0: i32) -> (i32, i32) {
    %c0_i32 = arith.constant 0 : i32
    %c0_i32_0 = arith.constant 0 : i32
    %c0_i32_1 = arith.constant 0 : i32
    return %c0_i32, %c0_i32_0 : i32, i32
  }
  func.func @transform_5(%arg0: i32) -> (i32, i32) {
    %c0_i32 = arith.constant 0 : i32
    %c0_i32_0 = arith.constant 0 : i32
    %c0_i32_1 = arith.constant 0 : i32
    return %c0_i32, %c0_i32_0 : i32, i32
  }
  func.func @transform_6(%arg0: i32) -> (i32, i32) {
    %c0_i32 = arith.constant 0 : i32
    %c0_i32_0 = arith.constant 0 : i32
    %c0_i32_1 = arith.constant 0 : i32
    return %c0_i32, %c0_i32_0 : i32, i32
  }
  func.func @transform_7(%arg0: i32) -> (i32, i32) {
    %c0_i32 = arith.constant 0 : i32
    %c0_i32_0 = arith.constant 0 : i32
    %c0_i32_1 = arith.constant 0 : i32
    return %c0_i32, %c0_i32_0 : i32, i32
  }
  func.func @transform_8(%arg0: i32) -> (i32, i32) {
    %c0_i32 = arith.constant 0 : i32
    %c0_i32_0 = arith.constant 0 : i32
    %c0_i32_1 = arith.constant 0 : i32
    return %c0_i32, %c0_i32_0 : i32, i32
  }
  func.func @transform_9(%arg0: i32) -> (i32, i32) {
    %c0_i32 = arith.constant 0 : i32
    %c0_i32_0 = arith.constant 0 : i32
    %c0_i32_1 = arith.constant 0 : i32
    return %c0_i32, %c0_i32_0 : i32, i32
  }
  func.func @transform_10(%arg0: i32) -> (i32, i32) {
    %c0_i32 = arith.constant 0 : i32
    %c0_i32_0 = arith.constant 0 : i32
    %c0_i32_1 = arith.constant 0 : i32
    return %c0_i32, %c0_i32_0 : i32, i32
  }
  func.func @transform_11(%arg0: i32) -> (i32, i32) {
    %c0_i32 = arith.constant 0 : i32
    %c0_i32_0 = arith.constant 0 : i32
    %c0_i32_1 = arith.constant 0 : i32
    return %c0_i32, %c0_i32_0 : i32, i32
  }
  func.func @transform_12(%arg0: i32) -> (i32, i32) {
    %c0_i32 = arith.constant 0 : i32
    %c0_i32_0 = arith.constant 0 : i32
    %c0_i32_1 = arith.constant 0 : i32
    return %c0_i32, %c0_i32_0 : i32, i32
  }
  func.func @transform_13(%arg0: i32) -> (i32, i32) {
    %c0_i32 = arith.constant 0 : i32
    %c0_i32_0 = arith.constant 0 : i32
    %c0_i32_1 = arith.constant 0 : i32
    return %c0_i32, %c0_i32_0 : i32, i32
  }
  func.func @transform_14(%arg0: i32) -> (i32, i32) {
    %c0_i32 = arith.constant 0 : i32
    %c0_i32_0 = arith.constant 0 : i32
    %c0_i32_1 = arith.constant 0 : i32
    return %c0_i32, %c0_i32_0 : i32, i32
  }
  func.func @transform_15(%arg0: i32) -> (i32, i32) {
    %c0_i32 = arith.constant 0 : i32
    %c0_i32_0 = arith.constant 0 : i32
    %c0_i32_1 = arith.constant 0 : i32
    return %c0_i32, %c0_i32_0 : i32, i32
  }
  func.func @transform_16(%arg0: i32) -> (i32, i32) {
    %c0_i32 = arith.constant 0 : i32
    %c0_i32_0 = arith.constant 0 : i32
    %c0_i32_1 = arith.constant 0 : i32
    return %c0_i32, %c0_i32_0 : i32, i32
  }
  func.func @transform_17(%arg0: i32) -> (i32, i32) {
    %c0_i32 = arith.constant 0 : i32
    %c0_i32_0 = arith.constant 0 : i32
    %c0_i32_1 = arith.constant 0 : i32
    return %c0_i32, %c0_i32_0 : i32, i32
  }
  func.func @transform_18(%arg0: i32) -> (i32, i32) {
    %c0_i32 = arith.constant 0 : i32
    %c0_i32_0 = arith.constant 0 : i32
    %c0_i32_1 = arith.constant 0 : i32
    return %c0_i32, %c0_i32_0 : i32, i32
  }
  func.func @transform_19(%arg0: i32) -> (i32, i32) {
    %c0_i32 = arith.constant 0 : i32
    %c0_i32_0 = arith.constant 0 : i32
    %c0_i32_1 = arith.constant 0 : i32
    return %c0_i32, %c0_i32_0 : i32, i32
  }
  func.func @transform_20(%arg0: i32) -> (i32, i32, i32) {
    %c0_i32 = arith.constant 0 : i32
    %c0_i32_0 = arith.constant 0 : i32
    %c0_i32_1 = arith.constant 0 : i32
    return %arg0, %c0_i32, %c0_i32_0 : i32, i32, i32
  }
  func.func @transform_21(%arg0: i32) -> (i32, i32, i32) {
    %c0_i32 = arith.constant 0 : i32
    %c0_i32_0 = arith.constant 0 : i32
    %c0_i32_1 = arith.constant 0 : i32
    return %arg0, %c0_i32, %c0_i32_0 : i32, i32, i32
  }
}

</mosaic_0001>

<bundles_post_ra>
// kernel: evap_forward.1
= control target key start
LH: loop header
LB: loop body
LE: loop exit
PB: predicated region body
PF: predicated region fallthrough
CT: control target
= control target key end

     0   :  { %s7740_s0 = inlined_call_operand.vmem [shape: bf16[2,256,48], index: 0, kind: input, shape index: {}]   ;;  %s7741_s1 = inlined_call_operand.vmem [shape: bf16[2,8,96], index: 1, kind: input, shape index: {}]   ;;  %s7742_s2 = inlined_call_operand.vmem [shape: f32[2,1,8], index: 2, kind: input, shape index: {}]   ;;  %s7743_s3 = inlined_call_operand.vmem [shape: bf16[48,64], index: 3, kind: input, shape index: {}]   ;;  %s7744_s4 = inlined_call_operand.vmem [shape: f32[1,64], index: 4, kind: input, shape index: {}]   ;;  %s7745_s5 = inlined_call_operand.vmem [shape: bf16[64,64], index: 5, kind: input, shape index: {}]   ;;  %s7746_s6 = inlined_call_operand.vmem [shape: f32[1,64], index: 6, kind: input, shape index: {}]   ;;  %s7747_s7 = inlined_call_operand.vmem [shape: bf16[256,64], index: 7, kind: input, shape index: {}]   ;;  %s7748_s8 = inlined_call_operand.vmem [shape: f32[1,64], index: 8, kind: input, shape index: {}]   ;;  %s7749_s9 = inlined_call_operand.vmem [shape: bf16[96,64], index: 9, kind: input, shape index: {}]   ;;  %s7750_s10 = inlined_call_operand.vmem [shape: bf16[64,32], index: 10, kind: input, shape index: {}]   ;;  %s7751_s11 = inlined_call_operand.vmem [shape: f32[1,32], index: 11, kind: input, shape index: {}]   ;;  %s7752_s12 = inlined_call_operand.vmem [shape: f32[16,64], index: 12, kind: input, shape index: {}]   ;;  %s7753_s13 = inlined_call_operand.vmem [shape: bf16[64,128], index: 13, kind: input, shape index: {}]   ;;  %s7754_s14 = inlined_call_operand.vmem [shape: f32[1,128], index: 14, kind: input, shape index: {}]   ;;  %s7755_s15 = inlined_call_operand.vmem [shape: bf16[128,64], index: 15, kind: input, shape index: {}]   ;;  %s7756_s16 = inlined_call_operand.vmem [shape: f32[1,64], index: 16, kind: input, shape index: {}]   ;;  %s7757_s17 = inlined_call_operand.vmem [shape: bf16[64,32], index: 17, kind: input, shape index: {}]   ;;  %s7758_s18 = inlined_call_operand.vmem [shape: f32[1,32], index: 18, kind: input, shape index: {}]   ;;  %s7759_s19 = inlined_call_operand.vmem [shape: f32[64,128], index: 19, kind: input, shape index: {}]   ;;  %s7760_s20 = inlined_call_operand.hbm [shape: f32[2,16,128], index: 20, kind: output, shape index: {0}]   ;;  %s7761_s21 = inlined_call_operand.vmem [shape: f32[2,16,256], index: 21, kind: output, shape index: {1}]  }
   0x1   :  { %7863 = sst [smem:[#allocation45_spill]] %s7740_s0 }
   0x2   :  { %7864 = sst [smem:[#allocation46_spill]] %s7741_s1 }
   0x3   :  { %7865 = sst [smem:[#allocation47_spill]] %s7742_s2 }
   0x4   :  { %7866 = sst [smem:[#allocation48_spill]] %s7743_s3 }
   0x5   :  { %7867 = sst [smem:[#allocation49_spill]] %s7744_s4 }
   0x6   :  { %7868 = sst [smem:[#allocation50_spill]] %s7745_s5 }
   0x7   :  { %7869 = sst [smem:[#allocation51_spill]] %s7746_s6 }
   0x8   :  { %7870 = sst [smem:[#allocation52_spill]] %s7747_s7 }
   0x9   :  { %7871 = sst [smem:[#allocation53_spill]] %s7760_s20 }
   0xa   :  { %7872 = sst [smem:[#allocation54_spill]] %s7761_s21 }
   0xb   :  { %27 = vsyncpa [#allocation3], 0 }
   0xc   :  { %29 = vsyncpa [#allocation3 + $0x1], 0  ;;  %s5861_s2 = smov 0   ;;  %s5863_s25 = smov 0  }
   0xd   :  { %s5865_s26 = smov 0   ;;  %s5867_s27 = smov 0  }
   0xe LB: > { %7873 = sst [smem:[#allocation5_spill]] %s5730_s2  ;;  %s5882_s3 = sadd.s32 4294967295, %s5742_s27   ;;  %s5742_s27 = sphi %s5867_s27, %s8065_s27   ;;  %s5738_s26 = sphi %s5865_s26, %s8067_s26   ;;  %s5734_s25 = sphi %s5863_s25, %s8069_s25   ;;  %s5730_s2 = sphi %s5861_s2, %s8068_s2  }
   0xf   : > { %7874 = sst [smem:[#allocation6_spill]] %s5738_s26  ;;  %s4411_s28 = sadd.s32 4294967294, %s5742_s27  }
  0x10   : > { %7875 = sst [smem:[#allocation7_spill]] %s5742_s27  ;;  %s5886_s29 = sadd.s32 1, %s5742_s27  }
  0x11   : > { %7876 = sst [smem:[#allocation8_spill]] %s5886_s29  ;;  %s477_s0 = sadd.s32 1, %s5738_s26 }
  0x12   : > { %s474_s4 = ssub.s32 %s5742_s27, %s5886_s29  ;;  %p487_p0 = scmp.ne.s32.totalorder %s5738_s26, %s5734_s25 }
  0x13   : > { %p475_p1 = scmp.eq.s32.totalorder %s474_s4, 0  ;;  %p488_p2 = scmp.eq.s32.totalorder %s5882_s3, 1 }
  0x14   : > { %p493_p3 = scmp.ne.s32.totalorder %s5734_s25, %s5730_s2  ;;  %p494_p4 = scmp.eq.s32.totalorder %s4411_s28, 1 }
  0x15   : > { %s5897_s30 = scalar_select %p475_p1, %s5738_s26, %s477_s0  }
  0x16   : > { %p5899_p5 = por %p488_p2, %p487_p0  ;;  %p5903_p6 = por %p494_p4, %p493_p3 }
  0x17   : > { %7877 = sst [smem:[#allocation9_spill]] %s5897_s30  ;;  %p4414_p7 = scmp.ge.s32.totalorder %s5742_s27, 1 }
  0x18   : > { %s7879_s22 = scalar_select %p5903_p6, 1, 0 }
  0x19   : > { %p610_p8 = scmp.lt.s32.totalorder %s5742_s27, 3 }
  0x1a   : > { %7880 = sst [smem:[#allocation10_spill]] %s7879_s22 }
  0x1b   : > { %p611_p9 = pnand %p4414_p7, %p610_p8 }
  0x1d   : > { %614 = sbr.rel (%p611_p9) target bundleno = 4279 (0x10b7), region = 100 }
  0x24   : > { %s7881_s24 = sld [smem:[#allocation48_spill]]  ;;  %p682_p10 = scmp.lt.s32.totalorder %s5882_s3, 1  ;;  %vm843_vm0 = vcmask 392192   ;;  %v7803_v23 = vmov 0.0   ;;  %vm1140_vm1 = vcmask 523264   ;;  %v5450_v42 = vld [vmem:[%s7749_s9] sm:$0xff]  }
  0x25   : > { %s7882_s23 = sld [smem:[#allocation50_spill]]  ;;  %s7883_s21 = sld [smem:[#allocation45_spill]]  ;;  %v5451_v50 = vld [vmem:[%s7749_s9 + $0x8] sm:$0xff]   ;;  %v5452_v58 = vld [vmem:[%s7749_s9 + $0x10] sm:$0xff]   ;;  %vm5745_vm2 = vmmov 0   ;;  %vm1930_vm3 = vcmask 785408  }
  0x26   : > { %s5917_s4 = scalar_select %p682_p10, %s5882_s3, 1  ;;  %vm2662_vm4 = vcmask 1043456   ;;  %vm2245_vm6 = vcmask 64512   ;;  %vm4230_vm11 = vcmask 261120  }
  0x27   : > { %s7884_s7 = sld [smem:[#allocation52_spill]]  ;;  %s7885_s0 = sld [smem:[#allocation49_spill]] }
  0x28   : > { %s4611_s1 = sshll.u32 %s5917_s4, 7  ;;  %s4418_s2 = sshll.u32 %s5917_s4, 2 }
  0x29   : > { %s7886_s29 = sld [smem:[#allocation46_spill]]  ;;  %s7887_s6 = sld [smem:[#allocation51_spill]] }
  0x2a   : > { %v5427_v0 = vld [vmem:[%s7881_s24] sm:$0xff]   ;;  %v5428_v1 = vld [vmem:[%s7881_s24 + $0x8] sm:$0xff]   ;;  %v5429_v2 = vld [vmem:[%s7881_s24 + $0x10] sm:$0xff]   ;;  %s7921_s22 = sld [smem:[#allocation47_spill]]  ;;  %s672_s28 = sand.u32 1, %s5734_s25  }
  0x2b   : > { %4823 = vmatprep.subr.bf16.mxu0 %v5427_v0  ;;  %v5446_v3 = vld [vmem:[%s7882_s23] sm:$0xff]   ;;  %v5447_v4 = vld [vmem:[%s7882_s23 + $0x8] sm:$0xff]   ;;  %s5932_s20 = scalar_lea.vmem %s7883_s21, %s4611_s1  ;;  %v5448_v21 = vld [vmem:[%s7882_s23 + $0x10] sm:$0xff]   ;;  %s5748_s26 = smov [#allocation2]  }
  0x2c   : > { %4824 = vmatpush3.bf16.msra.mxu0 %v5427_v0  ;;  %4861 = vmatprep.subr.bf16.mxu1 %v5446_v3  ;;  %v5430_v5 = vld [vmem:[%s5932_s20] sm:$0xff]   ;;  %v5431_v6 = vld [vmem:[%s5932_s20 + $0x8] sm:$0xff]   ;;  %v5432_v7 = vld [vmem:[%s5932_s20 + $0x10] sm:$0xff]  }
  0x2d   : > { %4825 = vmatprep.subr.bf16.mxu0 %v5428_v1  ;;  %4862 = vmatpush3.bf16.msra.mxu1 %v5446_v3  ;;  %v5433_v8 = vld [vmem:[%s5932_s20 + $0x18] sm:$0xff]   ;;  %v5434_v9 = vld [vmem:[%s5932_s20 + $0x20] sm:$0xff]   ;;  %v5435_v10 = vld [vmem:[%s5932_s20 + $0x28] sm:$0xff]  }
  0x2e   : > { %4863 = vmatprep.subr.bf16.mxu1 %v5447_v4  ;;  %4829 = vmatprep.mubr.msk.bf16.mxu0 %vm843_vm0, %v5430_v5  ;;  %v5436_v11 = vld [vmem:[%s5932_s20 + $0x30] sm:$0xff]   ;;  %v5437_v12 = vld [vmem:[%s5932_s20 + $0x38] sm:$0xff]   ;;  %v5438_v13 = vld [vmem:[%s5932_s20 + $0x40] sm:$0xff]  }
  0x2f   : > { %v5439_v14 = vld [vmem:[%s5932_s20 + $0x48] sm:$0xff]   ;;  %v5440_v15 = vld [vmem:[%s5932_s20 + $0x50] sm:$0xff]   ;;  %v5441_v16 = vld [vmem:[%s5932_s20 + $0x58] sm:$0xff]   ;;  %s690_s30 = scalar_lea.vmem %s7886_s29, %s4418_s2  ;;  %s4613_s29 = sshll.u32 %s5882_s3, 8 }
  0x30   : > { %4826 = vmatpush3.bf16.msra.mxu0 %v5428_v1  ;;  %v5442_v17 = vld [vmem:[%s5932_s20 + $0x60] sm:$0xff]   ;;  %v5443_v18 = vld [vmem:[%s5932_s20 + $0x68] sm:$0xff]   ;;  %v5444_v19 = vld [vmem:[%s5932_s20 + $0x70] sm:$0xff]   ;;  %s693_s1 = scalar_lea.vmem %s7921_s22, %s5917_s4  ;;  %s8060_s22 = sld [smem:[#allocation53_spill]] }
  0x31   : > { %4827 = vmatprep.subr.bf16.mxu0 %v5429_v2  ;;  %4864 = vmatpush3.bf16.msra.mxu1 %v5447_v4  ;;  %v5445_v20 = vld [vmem:[%s5932_s20 + $0x78] sm:$0xff]   ;;  %v5456_v24 = vld [vmem:[%s7884_s7] sm:$0xff]   ;;  %v5457_v25 = vld [vmem:[%s7884_s7 + $0x8] sm:$0xff]  }
  0x32   : > { %4865 = vmatprep.subr.bf16.mxu1 %v5448_v21  ;;  %v5449_v22 = vld [vmem:[%s7882_s23 + $0x18] sm:$0xff]   ;;  %v5982_v26 = vld [vmem:[%s7885_s0] ss:$0 sm:$0xff]  ;;  %s4415_s0 = sshll.u32 %s672_s28, 4 }
  0x33   : > { %s674_s21 = scalar_lea.vmem [#allocation2], %s4415_s0  ;;  %s7695_s0 = scalar_lea.sflag [#allocation3], %s672_s28 }
  0x34   : > { %4828 = vmatpush3.bf16.msra.mxu0 %v5429_v2  ;;  %v5453_v2 = vld [vmem:[%s7749_s9 + $0x18] sm:$0xff]   ;;  %s4300_s27 = sshll.u32 %s674_s21, 4  ;;  %s7687_s27 = int_to_ptr.vmem [resolvable:$true] %s4300_s27 }
  0x35   : > { %4866 = vmatpush3.bf16.msra.mxu1 %v5448_v21  ;;  %4901 = vmatprep.subr.bf16.mxu0 %v5456_v24  ;;  %s5680_s2 = scalar_lea.vmem %s7687_s27, 256 }
  0x36   : > { %4867 = vmatprep.subr.bf16.mxu1 %v5449_v22  ;;  %p5681_p11 = scmp.ne.s32.totalorder %s7687_s27, %s5680_s2 }
  0x37   : > { %4830 = vmatmul.mubr.msk.bf16.vlgmr.msra.gmra.mrb[0].mxu0 %vm843_vm0, %v5431_v6 }
  0x38   : > { %4833 = vmatprep.mubr.msk.bf16.mxu0 %vm843_vm0, %v5432_v7  ;;  %4902 = vmatpush3.bf16.msra.mxu0 %v5456_v24  ;;  %p5682_p12 = pnand %p5681_p11, %p5899_p5 }
  0x39   : > { %4868 = vmatpush3.bf16.msra.mxu1 %v5449_v22  ;;  %4903 = vmatprep.subr.bf16.mxu0 %v5457_v25 }
  0x3a   : > { %4965 = vmatprep.subr.bf16.mxu1 %v7803_v23  ;;  %p5683_p13 = pneg %p5682_p12 }
  0x3c   : > { %4904 = vmatpush3.bf16.msra.mxu0 %v5457_v25 }
  0x3f   : > { %4834 = vmatmul.mubr.msk.bf16.gmra.mrb[4].mxu0 %vm843_vm0, %v5433_v8 }
  0x40   : > { %4837 = vmatprep.mubr.msk.bf16.mxu0 %vm843_vm0, %v5434_v9 }
  0x47   : > { %4838 = vmatmul.mubr.msk.bf16.gmra.mrb[8].mxu0 %vm843_vm0, %v5435_v10  ;;  %v5454_v10 = vld [vmem:[%s7749_s9 + $0x20] sm:$0xff]  }
  0x48   : > { %4841 = vmatprep.mubr.msk.bf16.mxu0 %vm843_vm0, %v5436_v11 }
  0x4f   : > { %4842 = vmatmul.mubr.msk.bf16.gmra.mrb[12].mxu0 %vm843_vm0, %v5437_v12 }
  0x50   : > { %4845 = vmatprep.mubr.msk.bf16.mxu0 %vm843_vm0, %v5438_v13 }
  0x57   : > { %4846 = vmatmul.mubr.msk.bf16.gmra.mrb[16].mxu0 %vm843_vm0, %v5439_v14 }
  0x58   : > { %4849 = vmatprep.mubr.msk.bf16.mxu0 %vm843_vm0, %v5440_v15 }
  0x5f   : > { %4850 = vmatmul.mubr.msk.bf16.gmra.mrb[20].mxu0 %vm843_vm0, %v5441_v16 }
  0x60   : > { %4853 = vmatprep.mubr.msk.bf16.mxu0 %vm843_vm0, %v5442_v17 }
  0x67   : > { %4854 = vmatmul.mubr.msk.bf16.gmra.mrb[24].mxu0 %vm843_vm0, %v5443_v18  ;;  %v5455_v18 = vld [vmem:[%s7749_s9 + $0x28] sm:$0xff]  }
  0x68   : > { %4857 = vmatprep.mubr.msk.bf16.mxu0 %vm843_vm0, %v5444_v19 }
  0x6f   : > { %4858 = vmatmul.mubr.msk.bf16.gmra.mrb[28].mxu0 %vm843_vm0, %v5445_v20 }
 0x10a   : > { %v4831_v27 = vpop.f32.mrb[0].mxu0 }
 0x10b   : > { %v935_v28 = vadd.f32 %v4831_v27, %v5982_v26  ;;  %v926_v29 = vpop.f32.mrb[1].mxu0 }
 0x10c   : > { %v927_v30 = vadd.f32 %v5982_v26, %v926_v29  ;;  %v4832_v31 = vpop.f32.mrb[2].mxu0 }
 0x10d   : > { %v938_v32 = vadd.f32 %v4832_v31, %v5982_v26  ;;  %v929_v33 = vpop.f32.mrb[3].mxu0  ;;  %v1055_v35 = vmax.f32 %v935_v28, 0.0 }
 0x10e   : > { %v930_v34 = vadd.f32 %v5982_v26, %v929_v33  ;;  %v1053_v37 = vmax.f32 %v927_v30, 0.0 }
 0x10f   : > { %v1056_v36 = vmax.f32 %v938_v32, 0.0 }
 0x110   : > { %v1054_v38 = vmax.f32 %v930_v34, 0.0 }
 0x111   : > { %v1086_v39 = vpack.c.bf16 %v1056_v36, %v1055_v35 }
 0x112   : > { %v4835_v40 = vpop.f32.mrb[4].mxu0  ;;  %v1085_v41 = vpack.c.bf16 %v1054_v38, %v1053_v37 }
 0x113   : > { %v951_v43 = vadd.f32 %v4835_v40, %v5982_v26  ;;  %v942_v44 = vpop.f32.mrb[5].mxu0 }
 0x114   : > { %v943_v45 = vadd.f32 %v5982_v26, %v942_v44  ;;  %v4836_v46 = vpop.f32.mrb[6].mxu0  ;;  %4869 = vmatprep.mubr.msk.bf16.mxu1 %vm1140_vm1, %v1085_v41 }
 0x115   : > { %v954_v47 = vadd.f32 %v4836_v46, %v5982_v26  ;;  %v945_v48 = vpop.f32.mrb[7].mxu0  ;;  %4870 = vmatmul.mubr.msk.bf16.vlgmr.msra.gmra.mrb[0].mxu1 %vm1140_vm1, %v1086_v39  ;;  %v1059_v51 = vmax.f32 %v951_v43, 0.0 }
 0x116   : > { %v946_v49 = vadd.f32 %v5982_v26, %v945_v48  ;;  %4966 = vmatpush3.bf16.msra.mxu1 %v5450_v42  ;;  %v1057_v53 = vmax.f32 %v943_v45, 0.0 }
 0x117   : > { %v1060_v52 = vmax.f32 %v954_v47, 0.0  ;;  %4967 = vmatprep.subr.bf16.mxu1 %v7803_v23 }
 0x118   : > { %v1058_v54 = vmax.f32 %v946_v49, 0.0 }
 0x119   : > { %v1088_v55 = vpack.c.bf16 %v1060_v52, %v1059_v51 }
 0x11a   : > { %v1087_v56 = vpack.c.bf16 %v1058_v54, %v1057_v53  ;;  %v4839_v57 = vpop.f32.mrb[8].mxu0  ;;  %4968 = vmatpush3.bf16.msra.mxu1 %v5451_v50 }
 0x11b   : > { %v967_v59 = vadd.f32 %v4839_v57, %v5982_v26  ;;  %v958_v60 = vpop.f32.mrb[9].mxu0  ;;  %4969 = vmatprep.subr.bf16.mxu1 %v7803_v23 }
 0x11c   : > { %v959_v61 = vadd.f32 %v5982_v26, %v958_v60  ;;  %v4840_v62 = vpop.f32.mrb[10].mxu0  ;;  %4873 = vmatprep.mubr.msk.bf16.mxu1 %vm1140_vm1, %v1087_v56 }
 0x11d   : > { %v970_v63 = vadd.f32 %v4840_v62, %v5982_v26  ;;  %v961_v0 = vpop.f32.mrb[11].mxu0  ;;  %4874 = vmatmul.mubr.msk.bf16.gmra.mrb[4].mxu1 %vm1140_vm1, %v1088_v55  ;;  %v1063_v3 = vmax.f32 %v967_v59, 0.0 }
 0x11e   : > { %v962_v1 = vadd.f32 %v5982_v26, %v961_v0  ;;  %4970 = vmatpush3.bf16.msra.mxu1 %v5452_v58  ;;  %v1061_v5 = vmax.f32 %v959_v61, 0.0 }
 0x11f   : > { %v1064_v4 = vmax.f32 %v970_v63, 0.0  ;;  %4971 = vmatprep.subr.bf16.mxu1 %v7803_v23 }
 0x120   : > { %v1062_v6 = vmax.f32 %v962_v1, 0.0 }
 0x121   : > { %v1090_v7 = vpack.c.bf16 %v1064_v4, %v1063_v3 }
 0x122   : > { %v1089_v8 = vpack.c.bf16 %v1062_v6, %v1061_v5  ;;  %v4843_v9 = vpop.f32.mrb[12].mxu0  ;;  %4972 = vmatpush3.bf16.msra.mxu1 %v5453_v2 }
 0x123   : > { %v983_v11 = vadd.f32 %v4843_v9, %v5982_v26  ;;  %v974_v12 = vpop.f32.mrb[13].mxu0  ;;  %4973 = vmatprep.subr.bf16.mxu1 %v7803_v23 }
 0x124   : > { %v975_v13 = vadd.f32 %v5982_v26, %v974_v12  ;;  %v4844_v14 = vpop.f32.mrb[14].mxu0  ;;  %4877 = vmatprep.mubr.msk.bf16.mxu1 %vm1140_vm1, %v1089_v8 }
 0x125   : > { %v986_v15 = vadd.f32 %v4844_v14, %v5982_v26  ;;  %v977_v16 = vpop.f32.mrb[15].mxu0  ;;  %4878 = vmatmul.mubr.msk.bf16.gmra.mrb[8].mxu1 %vm1140_vm1, %v1090_v7  ;;  %v1067_v19 = vmax.f32 %v983_v11, 0.0 }
 0x126   : > { %v978_v17 = vadd.f32 %v5982_v26, %v977_v16  ;;  %4974 = vmatpush3.bf16.msra.mxu1 %v5454_v10  ;;  %v1065_v21 = vmax.f32 %v975_v13, 0.0 }
 0x127   : > { %v1068_v20 = vmax.f32 %v986_v15, 0.0  ;;  %4975 = vmatprep.subr.bf16.mxu1 %v7803_v23 }
 0x128   : > { %v1066_v22 = vmax.f32 %v978_v17, 0.0 }
 0x129   : > { %v1092_v24 = vpack.c.bf16 %v1068_v20, %v1067_v19  ;;  %v5458_v19 = vld [vmem:[%s7884_s7 + $0x10] sm:$0xff]   ;;  %v5459_v20 = vld [vmem:[%s7884_s7 + $0x18] sm:$0xff]  }
 0x12a   : > { %v1091_v25 = vpack.c.bf16 %v1066_v22, %v1065_v21  ;;  %v4847_v27 = vpop.f32.mrb[16].mxu0  ;;  %4976 = vmatpush3.bf16.msra.mxu1 %v5455_v18  ;;  %4905 = vmatprep.subr.bf16.mxu0 %v5458_v19  ;;  %v5460_v21 = vld [vmem:[%s7884_s7 + $0x20] sm:$0xff]  }
 0x12b   : > { %v999_v28 = vadd.f32 %v4847_v27, %v5982_v26  ;;  %v990_v29 = vpop.f32.mrb[17].mxu0  ;;  %4906 = vmatpush3.bf16.msra.mxu0 %v5458_v19  ;;  %v6073_v22 = vld [vmem:[%s7887_s6] ss:$0 sm:$0xff] }
 0x12c   : > { %v991_v30 = vadd.f32 %v5982_v26, %v990_v29  ;;  %v4848_v31 = vpop.f32.mrb[18].mxu0  ;;  %4881 = vmatprep.mubr.msk.bf16.mxu1 %vm1140_vm1, %v1091_v25  ;;  %4907 = vmatprep.subr.bf16.mxu0 %v5459_v20 }
 0x12d   : > { %v1002_v32 = vadd.f32 %v4848_v31, %v5982_v26  ;;  %v993_v33 = vpop.f32.mrb[19].mxu0  ;;  %4882 = vmatmul.mubr.msk.bf16.gmra.mrb[12].mxu1 %vm1140_vm1, %v1092_v24  ;;  %v1071_v35 = vmax.f32 %v999_v28, 0.0 }
 0x12e   : > { %v994_v34 = vadd.f32 %v5982_v26, %v993_v33  ;;  %v1069_v37 = vmax.f32 %v991_v30, 0.0 }
 0x12f   : > { %v1072_v36 = vmax.f32 %v1002_v32, 0.0  ;;  %4908 = vmatpush3.bf16.msra.mxu0 %v5459_v20 }
 0x130   : > { %v1070_v38 = vmax.f32 %v994_v34, 0.0  ;;  %4917 = vmatprep.subr.bf16.mxu0 %v5460_v21 }
 0x131   : > { %v1094_v39 = vpack.c.bf16 %v1072_v36, %v1071_v35 }
 0x132   : > { %v1093_v40 = vpack.c.bf16 %v1070_v38, %v1069_v37  ;;  %v4851_v41 = vpop.f32.mrb[20].mxu0 }
 0x133   : > { %v1015_v42 = vadd.f32 %v4851_v41, %v5982_v26  ;;  %v1006_v43 = vpop.f32.mrb[21].mxu0  ;;  %v5461_v41 = vld [vmem:[%s7884_s7 + $0x28] sm:$0xff]  }
 0x134   : > { %v1007_v44 = vadd.f32 %v5982_v26, %v1006_v43  ;;  %v4852_v45 = vpop.f32.mrb[22].mxu0  ;;  %4885 = vmatprep.mubr.msk.bf16.mxu1 %vm1140_vm1, %v1093_v40 }
 0x135   : > { %v1018_v46 = vadd.f32 %v4852_v45, %v5982_v26  ;;  %v1009_v47 = vpop.f32.mrb[23].mxu0  ;;  %4886 = vmatmul.mubr.msk.bf16.gmra.mrb[16].mxu1 %vm1140_vm1, %v1094_v39  ;;  %v1075_v49 = vmax.f32 %v1015_v42, 0.0 }
 0x136   : > { %v1010_v48 = vadd.f32 %v5982_v26, %v1009_v47  ;;  %v1073_v51 = vmax.f32 %v1007_v44, 0.0 }
 0x137   : > { %v1076_v50 = vmax.f32 %v1018_v46, 0.0 }
 0x138   : > { %v1074_v52 = vmax.f32 %v1010_v48, 0.0 }
 0x139   : > { %v1096_v53 = vpack.c.bf16 %v1076_v50, %v1075_v49  ;;  %v5462_v49 = vld [vmem:[%s7884_s7 + $0x30] sm:$0xff]  }
 0x13a   : > { %v1095_v54 = vpack.c.bf16 %v1074_v52, %v1073_v51  ;;  %v4855_v55 = vpop.f32.mrb[24].mxu0 }
 0x13b   : > { %v1031_v56 = vadd.f32 %v4855_v55, %v5982_v26  ;;  %v1022_v57 = vpop.f32.mrb[25].mxu0 }
 0x13c   : > { %v1023_v58 = vadd.f32 %v5982_v26, %v1022_v57  ;;  %v4856_v59 = vpop.f32.mrb[26].mxu0  ;;  %4889 = vmatprep.mubr.msk.bf16.mxu1 %vm1140_vm1, %v1095_v54  ;;  %v5463_v57 = vld [vmem:[%s7884_s7 + $0x38] sm:$0xff]  }
 0x13d   : > { %v1034_v60 = vadd.f32 %v4856_v59, %v5982_v26  ;;  %v1025_v61 = vpop.f32.mrb[27].mxu0  ;;  %4890 = vmatmul.mubr.msk.bf16.gmra.mrb[20].mxu1 %vm1140_vm1, %v1096_v53  ;;  %v1079_v63 = vmax.f32 %v1031_v56, 0.0 }
 0x13e   : > { %v1026_v62 = vadd.f32 %v5982_v26, %v1025_v61  ;;  %v1077_v1 = vmax.f32 %v1023_v58, 0.0 }
 0x13f   : > { %v1080_v0 = vmax.f32 %v1034_v60, 0.0 }
 0x140   : > { %v1078_v2 = vmax.f32 %v1026_v62, 0.0 }
 0x141   : > { %v1098_v3 = vpack.c.bf16 %v1080_v0, %v1079_v63 }
 0x142   : > { %v1097_v4 = vpack.c.bf16 %v1078_v2, %v1077_v1  ;;  %v4859_v5 = vpop.f32.mrb[28].mxu0  ;;  %v5464_v1 = vld [vmem:[%s7884_s7 + $0x40] sm:$0xff]  }
 0x143   : > { %v1047_v6 = vadd.f32 %v4859_v5, %v5982_v26  ;;  %v1038_v7 = vpop.f32.mrb[29].mxu0 }
 0x144   : > { %v1039_v8 = vadd.f32 %v5982_v26, %v1038_v7  ;;  %v4860_v9 = vpop.f32.mrb[30].mxu0  ;;  %4893 = vmatprep.mubr.msk.bf16.mxu1 %vm1140_vm1, %v1097_v4 }
 0x145   : > { %v1050_v10 = vadd.f32 %v4860_v9, %v5982_v26  ;;  %v1041_v11 = vpop.f32.mrb[31].mxu0  ;;  %4894 = vmatmul.mubr.msk.bf16.gmra.mrb[24].mxu1 %vm1140_vm1, %v1098_v3  ;;  %v1083_v13 = vmax.f32 %v1047_v6, 0.0  ;;  %v5465_v9 = vld [vmem:[%s7884_s7 + $0x48] sm:$0xff]  }
 0x146   : > { %v1042_v12 = vadd.f32 %v5982_v26, %v1041_v11  ;;  %v1081_v15 = vmax.f32 %v1039_v8, 0.0  ;;  %v1881_v26 = vld [vmem:[%s690_s30] sm:$0xf] }
 0x147   : > { %v1084_v14 = vmax.f32 %v1050_v10, 0.0 }
 0x148   : > { %v1082_v16 = vmax.f32 %v1042_v12, 0.0 }
 0x149   : > { %v1100_v17 = vpack.c.bf16 %v1084_v14, %v1083_v13 }
 0x14a   : > { %v1099_v18 = vpack.c.bf16 %v1082_v16, %v1081_v15 }
 0x14c   : > { %4897 = vmatprep.mubr.msk.bf16.mxu1 %vm1140_vm1, %v1099_v18 }
 0x14d   : > { %4898 = vmatmul.mubr.msk.bf16.gmra.mrb[28].mxu1 %vm1140_vm1, %v1100_v17  ;;  %v5466_v17 = vld [vmem:[%s7884_s7 + $0x50] sm:$0xff]  }
 0x14e   : > { %4977 = vmatprep.mubr.msk.bf16.mxu1 %vm5745_vm2, %v7803_v23 }
 0x155   : > { %4978 = vmatmul.mubr.msk.bf16.vlgmr.msra.gmra.mrb[32].mxu1 %vm1930_vm3, %v1881_v26 }
 0x1e8   : > { %v4871_v24 = vpop.f32.mrb[0].mxu1 }
 0x1e9   : > { %v1223_v25 = vpop.f32.mrb[1].mxu1  ;;  %v6079_v29 = vadd.f32 %v4871_v24, %v6073_v22 }
 0x1ea   : > { %v6076_v27 = vadd.f32 %v6073_v22, %v1223_v25  ;;  %v4872_v28 = vpop.f32.mrb[2].mxu1 }
 0x1eb   : > { %7889 = vst [vmem:[#allocation12_spill] sm:$0xff] %v6079_v29  ;;  %v6082_v30 = vadd.f32 %v4872_v28, %v6073_v22  ;;  %v1226_v31 = vpop.f32.mrb[3].mxu1  ;;  %v7802_v36 = vmax.f32 %v6079_v29, 0.0  ;;  %v5467_v28 = vld [vmem:[%s7884_s7 + $0x58] sm:$0xff]  }
 0x1ec   : > { %7888 = vst [vmem:[#allocation11_spill] sm:$0xff] %v6076_v27  ;;  %v6085_v32 = vadd.f32 %v6073_v22, %v1226_v31  ;;  %v7800_v34 = vmax.f32 %v6076_v27, 0.0 }
 0x1ed   : > { %7890 = vst [vmem:[#allocation13_spill] sm:$0xff] %v6082_v30  ;;  %v7801_v33 = vmax.f32 %v6082_v30, 0.0 }
 0x1ee   : > { %7891 = vst [vmem:[#allocation14_spill] sm:$0xff] %v6085_v32  ;;  %v7799_v35 = vmax.f32 %v6085_v32, 0.0 }
 0x1ef   : > { %v6099_v39 = vpack.c.bf16 %v7801_v33, %v7802_v36 }
 0x1f0   : > { %v1382_v37 = vpack.c.bf16 %v7799_v35, %v7800_v34  ;;  %v4875_v38 = vpop.f32.mrb[4].mxu1 }
 0x1f1   : > { %v1239_v40 = vpop.f32.mrb[5].mxu1  ;;  %v6110_v44 = vadd.f32 %v4875_v38, %v6073_v22 }
 0x1f2   : > { %v6105_v42 = vadd.f32 %v6073_v22, %v1239_v40  ;;  %v4876_v43 = vpop.f32.mrb[6].mxu1  ;;  %4909 = vmatprep.mubr.msk.bf16.mxu0 %vm1140_vm1, %v1382_v37  ;;  %4989 = vmatprep.mubr.msk.bf16.mxu1 %vm1140_vm1, %v1382_v37 }
 0x1f3   : > { %7893 = vst [vmem:[#allocation16_spill] sm:$0xff] %v6110_v44  ;;  %v6113_v45 = vadd.f32 %v4876_v43, %v6073_v22  ;;  %v1242_v46 = vpop.f32.mrb[7].mxu1  ;;  %4910 = vmatmul.mubr.msk.bf16.vlgmr.msra.gmra.mrb[32].mxu0 %vm1140_vm1, %v6099_v39  ;;  %v7798_v52 = vmax.f32 %v6110_v44, 0.0 }
 0x1f4   : > { %7892 = vst [vmem:[#allocation15_spill] sm:$0xff] %v6105_v42  ;;  %v6118_v47 = vadd.f32 %v6073_v22, %v1242_v46  ;;  %4918 = vmatpush3.bf16.msra.mxu0 %v5460_v21  ;;  %v7796_v50 = vmax.f32 %v6105_v42, 0.0 }
 0x1f5   : > { %7894 = vst [vmem:[#allocation17_spill] sm:$0xff] %v6113_v45  ;;  %v7797_v48 = vmax.f32 %v6113_v45, 0.0  ;;  %4919 = vmatprep.subr.bf16.mxu0 %v5461_v41 }
 0x1f6   : > { %7895 = vst [vmem:[#allocation18_spill] sm:$0xff] %v6118_v47  ;;  %v7795_v51 = vmax.f32 %v6118_v47, 0.0 }
 0x1f7   : > { %v6137_v55 = vpack.c.bf16 %v7797_v48, %v7798_v52 }
 0x1f8   : > { %v6131_v53 = vpack.c.bf16 %v7795_v51, %v7796_v50  ;;  %v4879_v54 = vpop.f32.mrb[8].mxu1  ;;  %4920 = vmatpush3.bf16.msra.mxu0 %v5461_v41 }
 0x1f9   : > { %v1255_v56 = vpop.f32.mrb[9].mxu1  ;;  %4921 = vmatprep.subr.bf16.mxu0 %v5462_v49  ;;  %v6148_v60 = vadd.f32 %v4879_v54, %v6073_v22 }
 0x1fa   : > { %v6143_v58 = vadd.f32 %v6073_v22, %v1255_v56  ;;  %v4880_v59 = vpop.f32.mrb[10].mxu1  ;;  %4913 = vmatprep.mubr.msk.bf16.mxu0 %vm1140_vm1, %v6131_v53 }
 0x1fb   : > { %7897 = vst [vmem:[#allocation20_spill] sm:$0xff] %v6148_v60  ;;  %v6151_v61 = vadd.f32 %v4880_v59, %v6073_v22  ;;  %v1258_v62 = vpop.f32.mrb[11].mxu1  ;;  %4914 = vmatmul.mubr.msk.bf16.gmra.mrb[36].mxu0 %vm1140_vm1, %v6137_v55  ;;  %v7790_v4 = vmax.f32 %v6148_v60, 0.0 }
 0x1fc   : > { %7896 = vst [vmem:[#allocation19_spill] sm:$0xff] %v6143_v58  ;;  %v6156_v63 = vadd.f32 %v6073_v22, %v1258_v62  ;;  %4922 = vmatpush3.bf16.msra.mxu0 %v5462_v49  ;;  %v7788_v2 = vmax.f32 %v6143_v58, 0.0  ;;  %v5468_v49 = vld [vmem:[%s7884_s7 + $0x60] sm:$0xff]  }
 0x1fd   : > { %7898 = vst [vmem:[#allocation21_spill] sm:$0xff] %v6151_v61  ;;  %v7789_v0 = vmax.f32 %v6151_v61, 0.0  ;;  %4923 = vmatprep.subr.bf16.mxu0 %v5463_v57 }
 0x1fe   : > { %7899 = vst [vmem:[#allocation22_spill] sm:$0xff] %v6156_v63  ;;  %v7783_v3 = vmax.f32 %v6156_v63, 0.0 }
 0x1ff   : > { %v6175_v7 = vpack.c.bf16 %v7789_v0, %v7790_v4 }
 0x200   : > { %v6169_v5 = vpack.c.bf16 %v7783_v3, %v7788_v2  ;;  %v4883_v6 = vpop.f32.mrb[12].mxu1  ;;  %4924 = vmatpush3.bf16.msra.mxu0 %v5463_v57 }
 0x201   : > { %v1271_v8 = vpop.f32.mrb[13].mxu1  ;;  %4933 = vmatprep.subr.bf16.mxu0 %v5464_v1  ;;  %v6186_v12 = vadd.f32 %v4883_v6, %v6073_v22 }
 0x202   : > { %v6181_v10 = vadd.f32 %v6073_v22, %v1271_v8  ;;  %v4884_v11 = vpop.f32.mrb[14].mxu1  ;;  %4925 = vmatprep.mubr.msk.bf16.mxu0 %vm1140_vm1, %v6169_v5  ;;  %v5469_v8 = vld [vmem:[%s7884_s7 + $0x68] sm:$0xff]  }
 0x203   : > { %7901 = vst [vmem:[#allocation24_spill] sm:$0xff] %v6186_v12  ;;  %v6189_v13 = vadd.f32 %v4884_v11, %v6073_v22  ;;  %v1274_v14 = vpop.f32.mrb[15].mxu1  ;;  %4926 = vmatmul.mubr.msk.bf16.vlgmr.msra.gmra.mrb[32].mxu0 %vm1140_vm1, %v6175_v7  ;;  %v7782_v19 = vmax.f32 %v6186_v12, 0.0 }
 0x204   : > { %7900 = vst [vmem:[#allocation23_spill] sm:$0xff] %v6181_v10  ;;  %v6194_v15 = vadd.f32 %v6073_v22, %v1274_v14  ;;  %4934 = vmatpush3.bf16.msra.mxu0 %v5464_v1  ;;  %v7780_v18 = vmax.f32 %v6181_v10, 0.0 }
 0x205   : > { %7902 = vst [vmem:[#allocation25_spill] sm:$0xff] %v6189_v13  ;;  %v7781_v16 = vmax.f32 %v6189_v13, 0.0  ;;  %4935 = vmatprep.subr.bf16.mxu0 %v5465_v9 }
 0x206   : > { %7903 = vst [vmem:[#allocation26_spill] sm:$0xff] %v6194_v15  ;;  %v7779_v26 = vmax.f32 %v6194_v15, 0.0 }
 0x207   : > { %v6213_v24 = vpack.c.bf16 %v7781_v16, %v7782_v19 }
 0x208   : > { %v6207_v20 = vpack.c.bf16 %v7779_v26, %v7780_v18  ;;  %v4887_v21 = vpop.f32.mrb[16].mxu1  ;;  %4936 = vmatpush3.bf16.msra.mxu0 %v5465_v9 }
 0x209   : > { %v1287_v25 = vpop.f32.mrb[17].mxu1  ;;  %4937 = vmatprep.subr.bf16.mxu0 %v5466_v17  ;;  %v6224_v38 = vadd.f32 %v4887_v21, %v6073_v22 }
 0x20a   : > { %v6219_v31 = vadd.f32 %v6073_v22, %v1287_v25  ;;  %v4888_v37 = vpop.f32.mrb[18].mxu1  ;;  %4929 = vmatprep.mubr.msk.bf16.mxu0 %vm1140_vm1, %v6207_v20 }
 0x20b   : > { %7905 = vst [vmem:[#allocation28_spill] sm:$0xff] %v6224_v38  ;;  %v6227_v40 = vadd.f32 %v4888_v37, %v6073_v22  ;;  %v1290_v41 = vpop.f32.mrb[19].mxu1  ;;  %4930 = vmatmul.mubr.msk.bf16.gmra.mrb[36].mxu0 %vm1140_vm1, %v6213_v24  ;;  %v7774_v57 = vmax.f32 %v6224_v38, 0.0  ;;  %v5470_v37 = vld [vmem:[%s7884_s7 + $0x70] sm:$0xff]  }
 0x20c   : > { %7904 = vst [vmem:[#allocation27_spill] sm:$0xff] %v6219_v31  ;;  %v6232_v43 = vadd.f32 %v6073_v22, %v1290_v41  ;;  %4938 = vmatpush3.bf16.msra.mxu0 %v5466_v17  ;;  %v7773_v54 = vmax.f32 %v6219_v31, 0.0 }
 0x20d   : > { %7906 = vst [vmem:[#allocation29_spill] sm:$0xff] %v6227_v40  ;;  %v7772_v46 = vmax.f32 %v6227_v40, 0.0  ;;  %4939 = vmatprep.subr.bf16.mxu0 %v5467_v28 }
 0x20e   : > { %7907 = vst [vmem:[#allocation30_spill] sm:$0xff] %v6232_v43  ;;  %v7771_v56 = vmax.f32 %v6232_v43, 0.0  ;;  %v5746_v43 = vmov -1e+09  }
 0x20f   : > { %v6251_v1 = vpack.c.bf16 %v7772_v46, %v7774_v57  ;;  %v5471_v46 = vld [vmem:[%s7884_s7 + $0x78] sm:$0xff]  }
 0x210   : > { %v6245_v59 = vpack.c.bf16 %v7771_v56, %v7773_v54  ;;  %v4891_v62 = vpop.f32.mrb[20].mxu1  ;;  %4940 = vmatpush3.bf16.msra.mxu0 %v5467_v28 }
 0x211   : > { %v1303_v6 = vpop.f32.mrb[21].mxu1  ;;  %4949 = vmatprep.subr.bf16.mxu0 %v5468_v49  ;;  %v6262_v14 = vadd.f32 %v4891_v62, %v6073_v22 }
 0x212   : > { %v6257_v9 = vadd.f32 %v6073_v22, %v1303_v6  ;;  %v4892_v11 = vpop.f32.mrb[22].mxu1  ;;  %4941 = vmatprep.mubr.msk.bf16.mxu0 %vm1140_vm1, %v6245_v59 }
 0x213   : > { %7909 = vst [vmem:[#allocation32_spill] sm:$0xff] %v6262_v14  ;;  %v6265_v17 = vadd.f32 %v4892_v11, %v6073_v22  ;;  %v1306_v21 = vpop.f32.mrb[23].mxu1  ;;  %4942 = vmatmul.mubr.msk.bf16.vlgmr.msra.gmra.mrb[32].mxu0 %vm1140_vm1, %v6251_v1  ;;  %v7778_v6 = vmax.f32 %v6262_v14, 0.0 }
 0x214   : > { %7908 = vst [vmem:[#allocation31_spill] sm:$0xff] %v6257_v9  ;;  %v6270_v25 = vadd.f32 %v6073_v22, %v1306_v21  ;;  %4950 = vmatpush3.bf16.msra.mxu0 %v5468_v49  ;;  %v7777_v41 = vmax.f32 %v6257_v9, 0.0 }
 0x215   : > { %7910 = vst [vmem:[#allocation33_spill] sm:$0xff] %v6265_v17  ;;  %v7776_v28 = vmax.f32 %v6265_v17, 0.0  ;;  %4951 = vmatprep.subr.bf16.mxu0 %v5469_v8 }
 0x216   : > { %7911 = vst [vmem:[#allocation34_spill] sm:$0xff] %v6270_v25  ;;  %v7775_v62 = vmax.f32 %v6270_v25, 0.0 }
 0x217   : > { %v6289_v21 = vpack.c.bf16 %v7776_v28, %v7778_v6 }
 0x218   : > { %v6283_v11 = vpack.c.bf16 %v7775_v62, %v7777_v41  ;;  %v4895_v49 = vpop.f32.mrb[24].mxu1  ;;  %4952 = vmatpush3.bf16.msra.mxu0 %v5469_v8 }
 0x219   : > { %v1319_v56 = vpop.f32.mrb[25].mxu1  ;;  %4953 = vmatprep.subr.bf16.mxu0 %v5470_v37  ;;  %v6300_v8 = vadd.f32 %v4895_v49, %v6073_v22 }
 0x21a   : > { %v6295_v54 = vadd.f32 %v6073_v22, %v1319_v56  ;;  %v4896_v57 = vpop.f32.mrb[26].mxu1  ;;  %4945 = vmatprep.mubr.msk.bf16.mxu0 %vm1140_vm1, %v6283_v11 }
 0x21b   : > { %7913 = vst [vmem:[#allocation36_spill] sm:$0xff] %v6300_v8  ;;  %v6303_v62 = vadd.f32 %v4896_v57, %v6073_v22  ;;  %v1322_v28 = vpop.f32.mrb[27].mxu1  ;;  %4946 = vmatmul.mubr.msk.bf16.gmra.mrb[36].mxu0 %vm1140_vm1, %v6289_v21  ;;  %v7787_v49 = vmax.f32 %v6300_v8, 0.0 }
 0x21c   : > { %7912 = vst [vmem:[#allocation35_spill] sm:$0xff] %v6295_v54  ;;  %v6308_v41 = vadd.f32 %v6073_v22, %v1322_v28  ;;  %4954 = vmatpush3.bf16.msra.mxu0 %v5470_v37  ;;  %v7786_v6 = vmax.f32 %v6295_v54, 0.0 }
 0x21d   : > { %7914 = vst [vmem:[#allocation37_spill] sm:$0xff] %v6303_v62  ;;  %v7785_v56 = vmax.f32 %v6303_v62, 0.0  ;;  %4955 = vmatprep.subr.bf16.mxu0 %v5471_v46  ;;  %v2011_v62 = vld [vmem:[%s693_s1] sm:$0x1]  ;;  %s7693_s1 = scalar_lea.hbm %s8060_s22, %s4613_s29 }
 0x21e   : > { %7915 = vst [vmem:[#allocation38_spill] sm:$0xff] %v6308_v41  ;;  %v7784_v26 = vmax.f32 %v6308_v41, 0.0  ;;  %v2208_v41 = vlaneseq  ;;  %vm2012_vm5 = vcmp.gt.f32.partialorder %v2011_v62, 0.5 }
 0x21f   : > { %v6324_v28 = vpack.c.bf16 %v7785_v56, %v7787_v49  ;;  %v2013_v40 = vsel %vm2012_vm5, 0.0, %v5746_v43 }
 0x220   : > { %v6318_v57 = vpack.c.bf16 %v7784_v26, %v7786_v6  ;;  %v4899_v18 = vpop.f32.mrb[28].mxu1  ;;  %4956 = vmatpush3.bf16.msra.mxu0 %v5471_v46  ;;  %v2209_v8 = vshrl.u32 %v2208_v41, 7 }
 0x221   : > { %v1335_v37 = vpop.f32.mrb[29].mxu1  ;;  %v6332_v3 = vadd.f32 %v4899_v18, %v6073_v22 }
 0x222   : > { %v6327_v16 = vadd.f32 %v6073_v22, %v1335_v37  ;;  %v4900_v19 = vpop.f32.mrb[30].mxu1  ;;  %4957 = vmatprep.mubr.msk.bf16.mxu0 %vm1140_vm1, %v6318_v57  ;;  %v2210_v14 = vsub.s32 0, %v2209_v8 }
 0x223   : > { %7917 = vst [vmem:[#allocation40_spill] sm:$0xff] %v6332_v3  ;;  %v6335_v26 = vadd.f32 %v4900_v19, %v6073_v22  ;;  %v1338_v46 = vpop.f32.mrb[31].mxu1  ;;  %4958 = vmatmul.mubr.msk.bf16.vlgmr.msra.gmra.mrb[32].mxu0 %vm1140_vm1, %v6324_v28  ;;  %v7794_v2 = vmax.f32 %v6332_v3, 0.0 }
 0x224   : > { %7916 = vst [vmem:[#allocation39_spill] sm:$0xff] %v6327_v16  ;;  %v6340_v56 = vadd.f32 %v6073_v22, %v1338_v46  ;;  %v7792_v6 = vmax.f32 %v6327_v16, 0.0  ;;  %v6509_v38 = vrot.slane %v2013_v40, %v2210_v14 }
 0x225   : > { %7918 = vst [vmem:[#allocation41_spill] sm:$0xff] %v6335_v26  ;;  %v7793_v37 = vmax.f32 %v6335_v26, 0.0 }
 0x226   : > { %7919 = vst [vmem:[#allocation42_spill] sm:$0xff] %v6340_v56  ;;  %v7791_v49 = vmax.f32 %v6340_v56, 0.0 }
 0x227   : > { %v6356_v22 = vpack.c.bf16 %v7793_v37, %v7794_v2 }
 0x228   : > { %v6350_v18 = vpack.c.bf16 %v7791_v49, %v7792_v6  ;;  %v1968_v19 = vpop.f32.mrb[32].mxu1 }
 0x229   : > { %v1974_v46 = vpack.c.bf16 %v1968_v19, %v1968_v19  ;;  %1975 = vxpose.xlu0.b32.start.end [1/1] (short) (narrow) %v1968_v19, 64  ;;  %v4979_v0 = vpop.f32.mrb[33].mxu1 }
 0x22a   : > { %4961 = vmatprep.mubr.msk.bf16.mxu0 %vm1140_vm1, %v6350_v18  ;;  %v1971_v4 = vpop.f32.mrb[34].mxu1 }
 0x22b   : > { %4962 = vmatmul.mubr.msk.bf16.gmra.mrb[36].mxu0 %vm1140_vm1, %v6356_v22  ;;  %v4980_v49 = vpop.f32.mrb[35].mxu1  ;;  %5256 = vmatprep.subr.msk.bf16.mxu0 %vm2662_vm4, %v1974_v46  ;;  %v6364_v6 = vsel %vm2662_vm4, %v1974_v46, 0 }
 0x22c   : > { %5022 = vmatpush3.bf16.msra.mxu0 %v6364_v6 }
 0x22d   : > { %5121 = vmatprep.subr.bf16.mxu0 %v7803_v23 }
 0x2a9   : > { %v1991_v37 = vpop.trf.xlu0 }
 0x2ad   : > { %v1992_v19 = vpop.trf.xlu0 }
 0x2ae   : > { %v2007_v0 = vpack.c.bf16 %v1992_v19, %v1991_v37 }
 0x2b0   : > { %4981 = vmatprep.subr.bf16.mxu1 %v2007_v0 }
 0x2b1   : > { %4982 = vmatpush3.bf16.msra.mxu1 %v2007_v0  ;;  %v1993_v2 = vpop.trf.xlu0 }
 0x2b5   : > { %v1994_v4 = vpop.trf.xlu0 }
 0x2b6   : > { %v2008_v51 = vpack.c.bf16 %v1994_v4, %v1993_v2 }
 0x2b8   : > { %4983 = vmatprep.subr.bf16.mxu1 %v2008_v51 }
 0x2b9   : > { %4984 = vmatpush3.bf16.msra.mxu1 %v2008_v51  ;;  %v1995_v49 = vpop.trf.xlu0 }
 0x2bd   : > { %v1996_v50 = vpop.trf.xlu0 }
 0x2be   : > { %v2009_v48 = vpack.c.bf16 %v1996_v50, %v1995_v49  ;;  %v4486_v50 = vld [vmem:[%s7748_s8] ss:$0 sm:$0xff] }
 0x2c0   : > { %4985 = vmatprep.subr.bf16.mxu1 %v2009_v48 }
 0x2c1   : > { %4986 = vmatpush3.bf16.msra.mxu1 %v2009_v48  ;;  %v1997_v52 = vpop.trf.xlu0 }
 0x2c5   : > { %v1998_v35 = vpop.trf.xlu0 }
 0x2c6   : > { %v2010_v34 = vpack.c.bf16 %v1998_v35, %v1997_v52 }
 0x2c8   : > { %4987 = vmatprep.subr.bf16.mxu1 %v2010_v34 }
 0x2c9   : > { %4988 = vmatpush3.bf16.msra.mxu1 %v2010_v34 }
 0x2ca   : > { %5055 = vmatprep.subr.bf16.mxu1 %v2007_v0 }
 0x2cc   : > { %4990 = vmatmul.mubr.msk.bf16.vlgmr.msra.gmra.mrb[36].mxu1 %vm1140_vm1, %v6099_v39 }
 0x2cd   : > { %4993 = vmatprep.mubr.msk.bf16.mxu1 %vm1140_vm1, %v6131_v53  ;;  %5056 = vmatpush3.bf16.msra.mxu1 %v2007_v0 }
 0x2ce   : > { %5057 = vmatprep.subr.bf16.mxu1 %v2008_v51 }
 0x2d1   : > { %5058 = vmatpush3.bf16.msra.mxu1 %v2008_v51 }
 0x2d2   : > { %5059 = vmatprep.subr.bf16.mxu1 %v2009_v48 }
 0x2d4   : > { %4994 = vmatmul.mubr.msk.bf16.gmra.mrb[40].mxu1 %vm1140_vm1, %v6137_v55 }
 0x2d5   : > { %4997 = vmatprep.mubr.msk.bf16.mxu1 %vm1140_vm1, %v6169_v5  ;;  %5060 = vmatpush3.bf16.msra.mxu1 %v2009_v48 }
 0x2d6   : > { %5061 = vmatprep.subr.bf16.mxu1 %v2010_v34 }
 0x2d9   : > { %5062 = vmatpush3.bf16.msra.mxu1 %v2010_v34 }
 0x2da   : > { %5257 = vmatprep.subr.msk.bf16.mxu1 %vm2662_vm4, %v1974_v46 }
 0x2dc   : > { %4998 = vmatmul.mubr.msk.bf16.gmra.mrb[44].mxu1 %vm1140_vm1, %v6175_v7 }
 0x2dd   : > { %5001 = vmatprep.mubr.msk.bf16.mxu1 %vm1140_vm1, %v6207_v20 }
 0x2e4   : > { %5002 = vmatmul.mubr.msk.bf16.gmra.mrb[48].mxu1 %vm1140_vm1, %v6213_v24 }
 0x2e5   : > { %5005 = vmatprep.mubr.msk.bf16.mxu1 %vm1140_vm1, %v6245_v59 }
 0x2ec   : > { %5006 = vmatmul.mubr.msk.bf16.gmra.mrb[52].mxu1 %vm1140_vm1, %v6251_v1 }
 0x2ed   : > { %5009 = vmatprep.mubr.msk.bf16.mxu1 %vm1140_vm1, %v6283_v11 }
 0x2f4   : > { %5010 = vmatmul.mubr.msk.bf16.gmra.mrb[56].mxu1 %vm1140_vm1, %v6289_v21 }
 0x2f5   : > { %5013 = vmatprep.mubr.msk.bf16.mxu1 %vm1140_vm1, %v6318_v57 }
 0x2f6   : > { %v4959_v34 = vpop.f32.mrb[32].mxu0 }
 0x2f7   : > { %v1834_v35 = vpop.f32.mrb[33].mxu0  ;;  %v6414_v11 = vadd.f32 %v4959_v34, %v4486_v50 }
 0x2f8   : > { %v4960_v39 = vpop.f32.mrb[34].mxu0  ;;  %v6400_v52 = vadd.f32 %v4486_v50, %v1834_v35 }
 0x2f9   : > { %v1837_v48 = vpop.f32.mrb[35].mxu0  ;;  %v6406_v24 = vadd.f32 %v4960_v39, %v4486_v50  ;;  %v7811_v37 = vmax.f32 %v6414_v11, 0.0 }
 0x2fa   : > { %v6396_v51 = vadd.f32 %v4486_v50, %v1837_v48  ;;  %v7812_v7 = vmax.f32 %v6400_v52, 0.0 }
 0x2fb   : > { %v7810_v57 = vmax.f32 %v6406_v24, 0.0 }
 0x2fc   : > { %5014 = vmatmul.mubr.msk.bf16.gmra.mrb[60].mxu1 %vm1140_vm1, %v6324_v28  ;;  %v7809_v55 = vmax.f32 %v6396_v51, 0.0 }
 0x2fd   : > { %5017 = vmatprep.mubr.msk.bf16.mxu1 %vm1140_vm1, %v6350_v18  ;;  %v2860_v46 = vpack.c.bf16 %v7810_v57, %v7811_v37 }
 0x2fe   : > { %v4963_v53 = vpop.f32.mrb[36].mxu0  ;;  %v2859_v59 = vpack.c.bf16 %v7809_v55, %v7812_v7 }
 0x2ff   : > { %v1850_v2 = vpop.f32.mrb[37].mxu0  ;;  %v6435_v0 = vadd.f32 %v4963_v53, %v4486_v50 }
 0x300   : > { %v4964_v5 = vpop.f32.mrb[38].mxu0  ;;  %v6418_v21 = vadd.f32 %v4486_v50, %v1850_v2 }
 0x301   : > { %v1853_v20 = vpop.f32.mrb[39].mxu0  ;;  %v6429_v19 = vadd.f32 %v4964_v5, %v4486_v50  ;;  %v7807_v49 = vmax.f32 %v6435_v0, 0.0 }
 0x302   : > { %v6412_v1 = vadd.f32 %v4486_v50, %v1853_v20  ;;  %v7808_v18 = vmax.f32 %v6418_v21, 0.0 }
 0x303   : > { %v7806_v4 = vmax.f32 %v6429_v19, 0.0 }
 0x304   : > { %7920 = vst [vmem:[#allocation43_spill] sm:$0xff] %v6412_v1  ;;  %5018 = vmatmul.mubr.msk.bf16.gmra.mrb[64].mxu1 %vm1140_vm1, %v6356_v22  ;;  %v7805_v28 = vmax.f32 %v6412_v1, 0.0 }
 0x305   : > { %5063 = vmatprep.mubr.msk.bf16.mxu1 %vm1140_vm1, %v2859_v59  ;;  %v2862_v34 = vpack.c.bf16 %v7806_v4, %v7807_v49 }
 0x306   : > { %v2861_v22 = vpack.c.bf16 %v7805_v28, %v7808_v18 }
 0x30c   : > { %5064 = vmatmul.mubr.msk.bf16.vlgmr.msra.gmra.mrb[68].mxu1 %vm1140_vm1, %v2860_v46 }
 0x30d   : > { %5072 = vmatpush3.bf16.msra.mxu1 %v6364_v6  ;;  %5067 = vmatprep.mubr.msk.bf16.mxu1 %vm1140_vm1, %v2861_v22 }
 0x314   : > { %5068 = vmatmul.mubr.msk.bf16.gmra.mrb[72].mxu1 %vm1140_vm1, %v2862_v34 }
 0x39f   : > { %v6447_v35 = vpop.f32.mrb[36].mxu1 }
 0x3a0   : > { %v6449_v39 = vpop.f32.mrb[37].mxu1 }
 0x3a1   : > { %v6451_v48 = vpop.f32.mrb[38].mxu1 }
 0x3a2   : > { %v6453_v6 = vpop.f32.mrb[39].mxu1 }
 0x3a7   : > { %v6455_v50 = vpop.f32.mrb[40].mxu1 }
 0x3a8   : > { %v6457_v53 = vpop.f32.mrb[41].mxu1 }
 0x3a9   : > { %v4996_v2 = vpop.f32.mrb[42].mxu1 }
 0x3aa   : > { %v2067_v5 = vpop.f32.mrb[43].mxu1 }
 0x3ab   : > { %v2180_v13 = vmul.f32 0.125, %v2067_v5 }
 0x3af   : > { %v6459_v20 = vpop.f32.mrb[44].mxu1 }
 0x3b0   : > { %v6461_v59 = vpop.f32.mrb[45].mxu1 }
 0x3b1   : > { %v6463_v46 = vpop.f32.mrb[46].mxu1 }
 0x3b2   : > { %v2083_v22 = vpop.f32.mrb[47].mxu1 }
 0x3b7   : > { %v6465_v34 = vpop.f32.mrb[48].mxu1 }
 0x3b8   : > { %v6467_v33 = vpop.f32.mrb[49].mxu1 }
 0x3b9   : > { %v6469_v36 = vpop.f32.mrb[50].mxu1 }
 0x3ba   : > { %v6471_v23 = vpop.f32.mrb[51].mxu1 }
 0x3bf   : > { %v6473_v28 = vpop.f32.mrb[52].mxu1 }
 0x3c0   : > { %v6475_v4 = vpop.f32.mrb[53].mxu1 }
 0x3c1   : > { %v6477_v49 = vpop.f32.mrb[54].mxu1 }
 0x3c2   : > { %v6479_v18 = vpop.f32.mrb[55].mxu1 }
 0x3c7   : > { %v6481_v55 = vpop.f32.mrb[56].mxu1 }
 0x3c8   : > { %v6483_v57 = vpop.f32.mrb[57].mxu1 }
 0x3c9   : > { %v6485_v37 = vpop.f32.mrb[58].mxu1 }
 0x3ca   : > { %v6487_v7 = vpop.f32.mrb[59].mxu1 }
 0x3cf   : > { %v6489_v56 = vpop.f32.mrb[60].mxu1 }
 0x3d0   : > { %v6491_v26 = vpop.f32.mrb[61].mxu1 }
 0x3d1   : > { %v6493_v16 = vpop.f32.mrb[62].mxu1 }
 0x3d2   : > { %v6495_v3 = vpop.f32.mrb[63].mxu1 }
 0x3d7   : > { %v6501_v54 = vpop.f32.mrb[64].mxu1 }
 0x3d8   : > { %v6503_v25 = vpop.f32.mrb[65].mxu1 }
 0x3d9   : > { %v6505_v17 = vpop.f32.mrb[66].mxu1 }
 0x3da   : > { %v6507_v9 = vpop.f32.mrb[67].mxu1 }
 0x3df   : > { %v5065_v31 = vpop.f32.mrb[68].mxu1 }
 0x3e0   : > { %v2942_v15 = vmul.f32 0.125, %v5065_v31  ;;  %v2909_v10 = vpop.f32.mrb[69].mxu1  ;;  %v2182_v31 = vmul.f32 0.125, %v4996_v2 }
 0x3e1   : > { %v2940_v12 = vmul.f32 0.125, %v2909_v10  ;;  %v5066_v63 = vpop.f32.mrb[70].mxu1  ;;  %v6525_v10 = vadd.f32 %v6509_v38, %v2180_v13 }
 0x3e2   : > { %v2943_v58 = vmul.f32 0.125, %v5066_v63  ;;  %v2912_v41 = vpop.f32.mrb[71].mxu1  ;;  %v6512_v61 = vadd.f32 %v2942_v15, %v6509_v38  ;;  %v6535_v60 = vadd.f32 %v6509_v38, %v2182_v31 }
 0x3e3   : > { %v6515_v62 = vadd.f32 %v2940_v12, %v6509_v38  ;;  %v2941_v8 = vmul.f32 0.125, %v2912_v41 }
 0x3e4   : > { %v2962_v43 = vsel %vm2245_vm6, %v6512_v61, -inf  ;;  %v6520_v40 = vadd.f32 %v2943_v58, %v6509_v38  ;;  %v2184_v58 = vmul.f32 0.125, %v2083_v22  ;;  %v2267_v22 = vsel %vm2245_vm6, %v6535_v60, -inf }
 0x3e5   : > { %2963 = vmax.xlane.f32.xlu1 %v2962_v43  ;;  %v2956_v63 = vsel %vm2245_vm6, %v6515_v62, -inf  ;;  %v6530_v41 = vadd.f32 %v2941_v8, %v6509_v38  ;;  %v2261_v43 = vsel %vm2245_vm6, %v6525_v10, -inf  ;;  %v2186_v8 = vmul.f32 0.125, %v6463_v46 }
 0x3e6   : > { %2957 = vmax.xlane.f32.xlu0 %v2956_v63  ;;  %v2965_v5 = vsel %vm2245_vm6, %v6520_v40, -inf }
 0x3e7   : > { %v5069_v15 = vpop.f32.mrb[72].mxu1 }
 0x3e8   : > { %v2946_v14 = vmul.f32 0.125, %v5069_v15  ;;  %v2925_v12 = vpop.f32.mrb[73].mxu1  ;;  %v2959_v15 = vsel %vm2245_vm6, %v6530_v41, -inf }
 0x3e9   : > { %2966 = vmax.xlane.f32.xlu1 %v2965_v5  ;;  %v5070_v2 = vpop.f32.mrb[74].mxu1  ;;  %v2944_v63 = vmul.f32 0.125, %v2925_v12  ;;  %v6546_v5 = vadd.f32 %v6509_v38, %v2184_v58 }
 0x3ea   : > { %2262 = vmax.xlane.f32.xlu0 %v2261_v43  ;;  %v2928_v13 = vpop.f32.mrb[75].mxu1  ;;  %v6540_v47 = vadd.f32 %v2946_v14, %v6509_v38  ;;  %v2188_v14 = vmul.f32 0.125, %v6471_v23  ;;  %v2947_v58 = vmul.f32 0.125, %v5070_v2 }
 0x3eb   : > { %v2945_v31 = vmul.f32 0.125, %v2928_v13  ;;  %v6551_v43 = vadd.f32 %v2944_v63, %v6509_v38  ;;  %v2273_v46 = vsel %vm2245_vm6, %v6546_v5, -inf  ;;  %v2190_v63 = vmul.f32 0.125, %v6469_v36 }
 0x3ec   : > { %v2974_v12 = vsel %vm2245_vm6, %v6540_v47, -inf  ;;  %v6573_v2 = vadd.f32 %v2947_v58, %v6509_v38 }
 0x3ed   : > { %2960 = vmax.xlane.f32.xlu1 %v2959_v15  ;;  %v6557_v15 = vadd.f32 %v6509_v38, %v2186_v8  ;;  %v2968_v13 = vsel %vm2245_vm6, %v6551_v43, -inf }
 0x3ee   : > { %2268 = vmax.xlane.f32.xlu0 %v2267_v22  ;;  %v6562_v22 = vadd.f32 %v2945_v31, %v6509_v38  ;;  %v6579_v31 = vadd.f32 %v6509_v38, %v2190_v63 }
 0x3ef   : > { %v2279_v23 = vsel %vm2245_vm6, %v6557_v15, -inf }
 0x3f0   : > { %v2971_v8 = vsel %vm2245_vm6, %v6562_v22, -inf  ;;  %v2291_v58 = vsel %vm2245_vm6, %v6579_v31, -inf }
 0x3f1   : > { %2975 = vmax.xlane.f32.xlu1 %v2974_v12  ;;  %v6568_v12 = vadd.f32 %v6509_v38, %v2188_v14  ;;  %v2977_v14 = vsel %vm2245_vm6, %v6573_v2, -inf }
 0x3f2   : > { %2274 = vmax.xlane.f32.xlu0 %v2273_v46  ;;  %v2192_v46 = vmul.f32 0.125, %v6479_v18  ;;  %v2196_v18 = vmul.f32 0.125, %v6487_v7 }
 0x3f3   : > { %v2285_v36 = vsel %vm2245_vm6, %v6568_v12, -inf }
 0x3f5   : > { %2969 = vmax.xlane.f32.xlu1 %v2968_v13  ;;  %v2194_v13 = vmul.f32 0.125, %v6477_v49 }
 0x3f6   : > { %2280 = vmax.xlane.f32.xlu0 %v2279_v23  ;;  %v6587_v23 = vadd.f32 %v6509_v38, %v2192_v46  ;;  %v2200_v46 = vmul.f32 0.125, %v6495_v3 }
 0x3f8   : > { %v2297_v63 = vsel %vm2245_vm6, %v6587_v23, -inf }
 0x3f9   : > { %2972 = vmax.xlane.f32.xlu1 %v2971_v8  ;;  %v6593_v8 = vadd.f32 %v6509_v38, %v2194_v13  ;;  %v2202_v13 = vmul.f32 0.125, %v6493_v16 }
 0x3fa   : > { %2286 = vmax.xlane.f32.xlu0 %v2285_v36  ;;  %v2198_v36 = vmul.f32 0.125, %v6485_v37 }
 0x3fb   : > { %v2303_v49 = vsel %vm2245_vm6, %v6593_v8, -inf }
 0x3fd   : > { %2978 = vmax.xlane.f32.xlu1 %v2977_v14  ;;  %v6599_v14 = vadd.f32 %v6509_v38, %v2196_v18  ;;  %v2204_v18 = vmul.f32 0.125, %v6507_v9 }
 0x3fe   : > { %2292 = vmax.xlane.f32.xlu0 %v2291_v58  ;;  %v6605_v58 = vadd.f32 %v6509_v38, %v2198_v36  ;;  %v2206_v36 = vmul.f32 0.125, %v6505_v17 }
 0x3ff   : > { %v2309_v7 = vsel %vm2245_vm6, %v6599_v14, -inf }
 0x400   : > { %v2315_v37 = vsel %vm2245_vm6, %v6605_v58, -inf  ;;  %v6628_v9 = vadd.f32 %v6509_v38, %v2206_v36 }
 0x402   : > { %2298 = vmax.xlane.f32.xlu0 %v2297_v63  ;;  %v6611_v63 = vadd.f32 %v6509_v38, %v2200_v46 }
 0x404   : > { %v2321_v3 = vsel %vm2245_vm6, %v6611_v63, -inf }
 0x406   : > { %2304 = vmax.xlane.f32.xlu0 %v2303_v49  ;;  %v6617_v49 = vadd.f32 %v6509_v38, %v2202_v13  ;;  %v2339_v13 = vsel %vm2245_vm6, %v6628_v9, -inf }
 0x408   : > { %v2327_v16 = vsel %vm2245_vm6, %v6617_v49, -inf }
 0x40a   : > { %2310 = vmax.xlane.f32.xlu0 %v2309_v7  ;;  %v6623_v7 = vadd.f32 %v6509_v38, %v2204_v18 }
 0x40c   : > { %v2333_v46 = vsel %vm2245_vm6, %v6623_v7, -inf }
 0x40e   : > { %2316 = vmax.xlane.f32.xlu0 %v2315_v37 }
 0x412   : > { %2322 = vmax.xlane.f32.xlu0 %v2321_v3 }
 0x416   : > { %2328 = vmax.xlane.f32.xlu0 %v2327_v16 }
 0x41a   : > { %2334 = vmax.xlane.f32.xlu0 %v2333_v46 }
 0x41e   : > { %2340 = vmax.xlane.f32.xlu0 %v2339_v13 }
 0x472   : > { %v2964_v37 = vpop.xlane.xlu1 %2963 }
 0x473   : > { %v2982_v17 = vsub.f32 %v6512_v61, %v2964_v37  ;;  %v2958_v3 = vpop.xlane.xlu0 %2957 }
 0x474   : > { %v2980_v42 = vsub.f32 %v6515_v62, %v2958_v3 }
 0x475   : > { %v2992_v18 = vmul.f32 1.442695, %v2982_v17 }
 0x476   : > { %v2988_v45 = vmul.f32 1.442695, %v2980_v42  ;;  %v2967_v16 = vpop.xlane.xlu1 %2966 }
 0x477   : > { %5492 = vpow2.f32 %v2992_v18  ;;  %v2983_v44 = vsub.f32 %v6520_v40, %v2967_v16 }
 0x478   : > { %5494 = vpow2.f32 %v2988_v45 }
 0x479   : > { %v2994_v36 = vmul.f32 1.442695, %v2983_v44 }
 0x47a   : > { %v2961_v32 = vpop.xlane.xlu1 %2960 }
 0x47b   : > { %v2981_v46 = vsub.f32 %v6530_v41, %v2961_v32  ;;  %5496 = vpow2.f32 %v2994_v36 }
 0x47d   : > { %v2990_v27 = vmul.f32 1.442695, %v2981_v46 }
 0x47e   : > { %v2976_v13 = vpop.xlane.xlu1 %2975 }
 0x47f   : > { %v2986_v30 = vsub.f32 %v6540_v47, %v2976_v13  ;;  %5498 = vpow2.f32 %v2990_v27 }
 0x481   : > { %v6637_v61 = vpop.eup %5492  ;;  %v3000_v62 = vmul.f32 1.442695, %v2986_v30 }
 0x482   : > { %v2970_v37 = vpop.xlane.xlu1 %2969  ;;  %v3010_v42 = vsel %vm2245_vm6, %v6637_v61, 0.0  ;;  %v6641_v17 = vpop.eup %5494 }
 0x483   : > { %v2984_v44 = vsub.f32 %v6551_v43, %v2970_v37  ;;  %3011 = vadd.xlane.f32.xlu1 %v3010_v42  ;;  %5500 = vpow2.f32 %v3000_v62  ;;  %v3004_v40 = vsel %vm2245_vm6, %v6641_v17, 0.0  ;;  %v2175_v37 = vmul.f32 0.125, %v6449_v39 }
 0x485   : > { %v2996_v32 = vmul.f32 1.442695, %v2984_v44  ;;  %v6646_v47 = vpop.eup %5496 }
 0x486   : > { %v2973_v45 = vpop.xlane.xlu1 %2972  ;;  %v3013_v3 = vsel %vm2245_vm6, %v6646_v47, 0.0 }
 0x487   : > { %v2985_v27 = vsub.f32 %v6562_v22, %v2973_v45  ;;  %3005 = vadd.xlane.f32.xlu1 %v3004_v40  ;;  %5502 = vpow2.f32 %v2996_v32  ;;  %v2176_v32 = vmul.f32 0.125, %v6453_v6  ;;  %v6675_v40 = vadd.f32 %v6509_v38, %v2175_v37 }
 0x489   : > { %v2998_v30 = vmul.f32 1.442695, %v2985_v27  ;;  %v6651_v18 = vpop.eup %5498  ;;  %v2177_v27 = vmul.f32 0.125, %v6447_v35  ;;  %v2246_v39 = vsel %vm2245_vm6, %v6675_v40, -inf }
 0x48a   : > { %v2979_v41 = vpop.xlane.xlu1 %2978  ;;  %v3007_v36 = vsel %vm2245_vm6, %v6651_v18, 0.0 }
 0x48b   : > { %v2987_v43 = vsub.f32 %v6573_v2, %v2979_v41  ;;  %3014 = vadd.xlane.f32.xlu1 %v3013_v3  ;;  %5504 = vpow2.f32 %v2998_v30  ;;  %v6681_v30 = vadd.f32 %v6509_v38, %v2176_v32  ;;  %v2178_v41 = vmul.f32 0.125, %v6451_v48 }
 0x48c   : > { %v6687_v3 = vadd.f32 %v6509_v38, %v2177_v27 }
 0x48d   : > { %v3002_v16 = vmul.f32 1.442695, %v2987_v43  ;;  %v6656_v46 = vpop.eup %5500  ;;  %v2249_v6 = vsel %vm2245_vm6, %v6681_v30, -inf  ;;  %v2179_v43 = vmul.f32 0.125, %v6457_v53 }
 0x48e   : > { %v3022_v22 = vsel %vm2245_vm6, %v6656_v46, 0.0  ;;  %v2252_v35 = vsel %vm2245_vm6, %v6687_v3, -inf }
 0x48f   : > { %3008 = vadd.xlane.f32.xlu1 %v3007_v36  ;;  %5506 = vpow2.f32 %v3002_v16  ;;  %v6693_v16 = vadd.f32 %v6509_v38, %v2178_v41  ;;  %v2181_v36 = vmul.f32 0.125, %v6455_v50 }
 0x491   : > { %v6660_v13 = vpop.eup %5502  ;;  %v2255_v48 = vsel %vm2245_vm6, %v6693_v16, -inf  ;;  %v6705_v37 = vadd.f32 %v6509_v38, %v2181_v36 }
 0x492   : > { %v3016_v62 = vsel %vm2245_vm6, %v6660_v13, 0.0 }
 0x493   : > { %3023 = vadd.xlane.f32.xlu1 %v3022_v22  ;;  %v6699_v22 = vadd.f32 %v6509_v38, %v2179_v43  ;;  %v2264_v50 = vsel %vm2245_vm6, %v6705_v37, -inf }
 0x495   : > { %v6664_v2 = vpop.eup %5504  ;;  %v2258_v53 = vsel %vm2245_vm6, %v6699_v22, -inf }
 0x496   : > { %v3019_v42 = vsel %vm2245_vm6, %v6664_v2, 0.0 }
 0x497   : > { %3017 = vadd.xlane.f32.xlu1 %v3016_v62  ;;  %v2183_v62 = vmul.f32 0.125, %v6461_v59 }
 0x499   : > { %v6669_v44 = vpop.eup %5506  ;;  %v6711_v32 = vadd.f32 %v6509_v38, %v2183_v62 }
 0x49a   : > { %v3025_v45 = vsel %vm2245_vm6, %v6669_v44, 0.0 }
 0x49b   : > { %3020 = vadd.xlane.f32.xlu1 %v3019_v42  ;;  %v2185_v42 = vmul.f32 0.125, %v6459_v20  ;;  %v2270_v59 = vsel %vm2245_vm6, %v6711_v32, -inf }
 0x49d   : > { %v6717_v27 = vadd.f32 %v6509_v38, %v2185_v42 }
 0x49f   : > { %3026 = vadd.xlane.f32.xlu1 %v3025_v45  ;;  %v2187_v45 = vmul.f32 0.125, %v6467_v33  ;;  %v2276_v20 = vsel %vm2245_vm6, %v6717_v27, -inf }
 0x4a1   : > { %v6723_v41 = vadd.f32 %v6509_v38, %v2187_v45 }
 0x4a3   : > { %2247 = vmax.xlane.f32.xlu1 %v2246_v39  ;;  %v2189_v39 = vmul.f32 0.125, %v6465_v34  ;;  %v2282_v33 = vsel %vm2245_vm6, %v6723_v41, -inf }
 0x4a5   : > { %v6729_v43 = vadd.f32 %v6509_v38, %v2189_v39 }
 0x4a7   : > { %2250 = vmax.xlane.f32.xlu1 %v2249_v6  ;;  %v2191_v6 = vmul.f32 0.125, %v6475_v4  ;;  %v2288_v34 = vsel %vm2245_vm6, %v6729_v43, -inf }
 0x4a9   : > { %v6735_v36 = vadd.f32 %v6509_v38, %v2191_v6 }
 0x4ab   : > { %2253 = vmax.xlane.f32.xlu1 %v2252_v35  ;;  %v2193_v35 = vmul.f32 0.125, %v6473_v28  ;;  %v2294_v4 = vsel %vm2245_vm6, %v6735_v36, -inf }
 0x4ad   : > { %v6741_v62 = vadd.f32 %v6509_v38, %v2193_v35 }
 0x4af   : > { %2256 = vmax.xlane.f32.xlu1 %v2255_v48  ;;  %v2195_v48 = vmul.f32 0.125, %v6483_v57  ;;  %v2300_v28 = vsel %vm2245_vm6, %v6741_v62, -inf }
 0x4b1   : > { %v6747_v42 = vadd.f32 %v6509_v38, %v2195_v48 }
 0x4b3   : > { %2259 = vmax.xlane.f32.xlu1 %v2258_v53  ;;  %v2197_v53 = vmul.f32 0.125, %v6481_v55  ;;  %v2306_v57 = vsel %vm2245_vm6, %v6747_v42, -inf }
 0x4b5   : > { %v6753_v45 = vadd.f32 %v6509_v38, %v2197_v53 }
 0x4b7   : > { %2265 = vmax.xlane.f32.xlu1 %v2264_v50  ;;  %v2199_v50 = vmul.f32 0.125, %v6491_v26  ;;  %v2312_v55 = vsel %vm2245_vm6, %v6753_v45, -inf }
 0x4b9   : > { %v6759_v39 = vadd.f32 %v6509_v38, %v2199_v50  ;;  %v2263_v50 = vpop.xlane.xlu0 %2262 }
 0x4bb   : > { %2271 = vmax.xlane.f32.xlu1 %v2270_v59  ;;  %v2201_v59 = vmul.f32 0.125, %v6489_v56  ;;  %v2318_v26 = vsel %vm2245_vm6, %v6759_v39, -inf }
 0x4bd   : > { %v6765_v6 = vadd.f32 %v6509_v38, %v2201_v59 }
 0x4bf   : > { %2277 = vmax.xlane.f32.xlu1 %v2276_v20  ;;  %v2203_v20 = vmul.f32 0.125, %v6503_v25  ;;  %v2324_v56 = vsel %vm2245_vm6, %v6765_v6, -inf }
 0x4c1   : > { %v6771_v35 = vadd.f32 %v6509_v38, %v2203_v20 }
 0x4c3   : > { %2283 = vmax.xlane.f32.xlu1 %v2282_v33  ;;  %v2205_v33 = vmul.f32 0.125, %v6501_v54 }
 0x4c5   : > { %v6776_v25 = vadd.f32 %v6509_v38, %v2205_v33 }
 0x4c7   : > { %2289 = vmax.xlane.f32.xlu1 %v2288_v34  ;;  %v2330_v34 = vsel %vm2245_vm6, %v6771_v35, -inf  ;;  %v2336_v48 = vsel %vm2245_vm6, %v6776_v25, -inf }
 0x4cb   : > { %2295 = vmax.xlane.f32.xlu1 %v2294_v4 }
 0x4cf   : > { %2301 = vmax.xlane.f32.xlu1 %v2300_v28 }
 0x4d3   : > { %2307 = vmax.xlane.f32.xlu1 %v2306_v57 }
 0x4d7   : > { %2313 = vmax.xlane.f32.xlu1 %v2312_v55  ;;  %v2269_v55 = vpop.xlane.xlu0 %2268 }
 0x4db   : > { %2319 = vmax.xlane.f32.xlu1 %v2318_v26 }
 0x4df   : > { %2325 = vmax.xlane.f32.xlu1 %v2324_v56 }
 0x4e3   : > { %2331 = vmax.xlane.f32.xlu1 %v2330_v34 }
 0x4e7   : > { %2337 = vmax.xlane.f32.xlu1 %v2336_v48 }
 0x510   : > { %v3012_v4 = vpop.xlane.xlu1 %3011 }
 0x514   : > { %v3006_v54 = vpop.xlane.xlu1 %3005 }
 0x518   : > { %v3015_v53 = vpop.xlane.xlu1 %3014 }
 0x519   : > { %5508 = vrcp.f32 %v3015_v53 }
 0x51a   : > { %5510 = vrcp.f32 %v3006_v54  ;;  %v2275_v54 = vpop.xlane.xlu0 %2274 }
 0x51b   : > { %5512 = vrcp.f32 %v3012_v4 }
 0x51c   : > { %v3009_v28 = vpop.xlane.xlu1 %3008 }
 0x51d   : > { %5514 = vrcp.f32 %v3009_v28 }
 0x520   : > { %v3024_v57 = vpop.xlane.xlu1 %3023 }
 0x523   : > { %v5509_v59 = vpop.eup %5508 }
 0x524   : > { %v3018_v20 = vpop.xlane.xlu1 %3017  ;;  %v5511_v38 = vpop.eup %5510  ;;  %v3039_v56 = vmul.f32 %v5509_v59, %v6646_v47 }
 0x525   : > { %v5513_v26 = vpop.eup %5512  ;;  %5516 = vrcp.f32 %v3018_v20  ;;  %v3036_v48 = vmul.f32 %v5511_v38, %v6641_v17  ;;  %v6786_v47 = vpop.xlane.xlu0 %2280 }
 0x526   : > { %v3038_v4 = vmul.f32 %v5513_v26, %v6637_v61 }
 0x527   : > { %v5515_v33 = vpop.eup %5514 }
 0x528   : > { %v3021_v34 = vpop.xlane.xlu1 %3020  ;;  %v3037_v53 = vmul.f32 %v5515_v33, %v6651_v18  ;;  %v3045_v29 = vpack.c.bf16 %v3039_v56, %v3038_v4 }
 0x529   : > { %5518 = vrcp.f32 %v3021_v34 }
 0x52a   : > { %v3044_v28 = vpack.c.bf16 %v3037_v53, %v3036_v48  ;;  %5520 = vrcp.f32 %v3024_v57 }
 0x52c   : > { %5073 = vmatprep.mubr.msk.bf16.mxu1 %vm2245_vm6, %v3044_v28  ;;  %v3027_v1 = vpop.xlane.xlu1 %3026  ;;  %v2347_v28 = vsub.f32 %v6525_v10, %v2263_v50 }
 0x52d   : > { %5522 = vrcp.f32 %v3027_v1  ;;  %5074 = vmatmul.mubr.msk.bf16.vlgmr.msra.gmra.mrb[76].mxu1 %vm2245_vm6, %v3045_v29  ;;  %v6792_v1 = vpop.xlane.xlu0 %2286 }
 0x52f   : > { %v5517_v20 = vpop.eup %5516 }
 0x530   : > { %v2248_v59 = vpop.xlane.xlu1 %2247  ;;  %v3040_v26 = vmul.f32 %v5517_v20, %v6660_v13 }
 0x531   : > { %v2342_v17 = vsub.f32 %v6675_v40, %v2248_v59 }
 0x533   : > { %v5519_v18 = vpop.eup %5518  ;;  %v2374_v38 = vmul.f32 1.442695, %v2342_v17 }
 0x534   : > { %v2251_v61 = vpop.xlane.xlu1 %2250  ;;  %v3041_v33 = vmul.f32 %v5519_v18, %v6664_v2  ;;  %v5521_v57 = vpop.eup %5520 }
 0x535   : > { %5524 = vpow2.f32 %v2374_v38  ;;  %v2343_v56 = vsub.f32 %v6681_v30, %v2251_v61  ;;  %v3042_v40 = vmul.f32 %v5521_v57, %v6656_v46  ;;  %v6799_v30 = vpop.xlane.xlu0 %2292  ;;  %v2384_v46 = vmul.f32 1.442695, %v2347_v28 }
 0x536   : > { %v3046_v29 = vpack.c.bf16 %v3041_v33, %v3040_v26  ;;  %v2351_v33 = vsub.f32 %v6546_v5, %v2275_v54 }
 0x537   : > { %v5523_v34 = vpop.eup %5522  ;;  %v2376_v48 = vmul.f32 1.442695, %v2343_v56 }
 0x538   : > { %5077 = vmatprep.mubr.msk.bf16.mxu1 %vm2245_vm6, %v3046_v29  ;;  %v2254_v53 = vpop.xlane.xlu1 %2253  ;;  %v3043_v4 = vmul.f32 %v5523_v34, %v6669_v44  ;;  %v2349_v44 = vsub.f32 %v6535_v60, %v2269_v55  ;;  %v2353_v34 = vsub.f32 %v6557_v15, %v6786_v47 }
 0x539   : > { %5526 = vpow2.f32 %v2376_v48  ;;  %v2344_v13 = vsub.f32 %v6687_v3, %v2254_v53  ;;  %v6809_v50 = vpop.xlane.xlu0 %2298 }
 0x53a   : > { %v3047_v2 = vpack.c.bf16 %v3043_v4, %v3042_v40 }
 0x53b   : > { %v2378_v59 = vmul.f32 1.442695, %v2344_v13  ;;  %v2355_v13 = vsub.f32 %v6568_v12, %v6792_v1 }
 0x53c   : > { %5078 = vmatmul.mubr.msk.bf16.gmra.mrb[80].mxu1 %vm2245_vm6, %v3047_v2  ;;  %v2257_v20 = vpop.xlane.xlu1 %2256 }
 0x53d   : > { %5528 = vpow2.f32 %v2378_v59  ;;  %v2345_v17 = vsub.f32 %v6693_v16, %v2257_v20  ;;  %v2388_v16 = vmul.f32 1.442695, %v2349_v44  ;;  %v2305_v53 = vpop.xlane.xlu0 %2304 }
 0x53f   : > { %v6803_v18 = vpop.eup %5524  ;;  %v2380_v38 = vmul.f32 1.442695, %v2345_v17  ;;  %v2400_v17 = vmul.f32 1.442695, %v2355_v13 }
 0x540   : > { %v2260_v61 = vpop.xlane.xlu1 %2259  ;;  %v2438_v3 = vsel %vm2245_vm6, %v6803_v18, 0.0 }
 0x541   : > { %5530 = vpow2.f32 %v2380_v38  ;;  %v2346_v10 = vsub.f32 %v6699_v22, %v2260_v61  ;;  %2439 = vadd.xlane.f32.xlu1 %v2438_v3  ;;  %v2392_v22 = vmul.f32 1.442695, %v2351_v33 }
 0x542   : > { %5532 = vpow2.f32 %v2384_v46  ;;  %v2357_v46 = vsub.f32 %v6579_v31, %v6799_v30  ;;  %v2359_v31 = vsub.f32 %v6587_v23, %v6809_v50  ;;  %v2361_v50 = vsub.f32 %v6593_v8, %v2305_v53 }
 0x543   : > { %v6811_v26 = vpop.eup %5526  ;;  %v2382_v57 = vmul.f32 1.442695, %v2346_v10 }
 0x544   : > { %v2266_v56 = vpop.xlane.xlu1 %2265  ;;  %v2441_v60 = vsel %vm2245_vm6, %v6811_v26, 0.0  ;;  %v2404_v10 = vmul.f32 1.442695, %v2357_v46  ;;  %v2408_v23 = vmul.f32 1.442695, %v2359_v31 }
 0x545   : > { %5534 = vpow2.f32 %v2382_v57  ;;  %v2348_v55 = vsub.f32 %v6705_v37, %v2266_v56  ;;  %2442 = vadd.xlane.f32.xlu0 %v2441_v60  ;;  %v2396_v37 = vmul.f32 1.442695, %v2353_v34  ;;  %v2412_v8 = vmul.f32 1.442695, %v2361_v50 }
 0x546   : > { %5536 = vpow2.f32 %v2388_v16 }
 0x547   : > { %v6817_v29 = vpop.eup %5528  ;;  %v2386_v48 = vmul.f32 1.442695, %v2348_v55 }
 0x548   : > { %v2272_v40 = vpop.xlane.xlu1 %2271  ;;  %v2444_v5 = vsel %vm2245_vm6, %v6817_v29, 0.0 }
 0x549   : > { %5538 = vpow2.f32 %v2386_v48  ;;  %v2350_v54 = vsub.f32 %v6711_v32, %v2272_v40  ;;  %2445 = vadd.xlane.f32.xlu1 %v2444_v5  ;;  %v2311_v32 = vpop.xlane.xlu0 %2310 }
 0x54a   : > { %5540 = vpow2.f32 %v2392_v22  ;;  %v2363_v53 = vsub.f32 %v6599_v14, %v2311_v32 }
 0x54b   : > { %v6824_v4 = vpop.eup %5530  ;;  %v2390_v2 = vmul.f32 1.442695, %v2350_v54 }
 0x54c   : > { %v2278_v28 = vpop.xlane.xlu1 %2277  ;;  %v2447_v15 = vsel %vm2245_vm6, %v6824_v4, 0.0  ;;  %v6830_v47 = vpop.eup %5532  ;;  %v2416_v46 = vmul.f32 1.442695, %v2363_v53 }
 0x54d   : > { %5542 = vpow2.f32 %v2390_v2  ;;  %v2352_v59 = vsub.f32 %v6717_v27, %v2278_v28  ;;  %2448 = vadd.xlane.f32.xlu0 %v2447_v15  ;;  %v2453_v44 = vsel %vm2245_vm6, %v6830_v47, 0.0  ;;  %v2317_v16 = vpop.xlane.xlu0 %2316 }
 0x54e   : > { %5544 = vpow2.f32 %v2396_v37  ;;  %v2365_v14 = vsub.f32 %v6605_v58, %v2317_v16 }
 0x54f   : > { %v6833_v20 = vpop.eup %5534  ;;  %v2394_v12 = vmul.f32 1.442695, %v2352_v59 }
 0x550   : > { %v2284_v1 = vpop.xlane.xlu1 %2283  ;;  %v2450_v38 = vsel %vm2245_vm6, %v6833_v20, 0.0  ;;  %v6841_v61 = vpop.eup %5536  ;;  %v2420_v58 = vmul.f32 1.442695, %v2365_v14 }
 0x551   : > { %5546 = vpow2.f32 %v2394_v12  ;;  %v2354_v27 = vsub.f32 %v6723_v41, %v2284_v1  ;;  %2454 = vadd.xlane.f32.xlu0 %v2453_v44  ;;  %2451 = vadd.xlane.f32.xlu1 %v2450_v38  ;;  %v2459_v57 = vsel %vm2245_vm6, %v6841_v61, 0.0  ;;  %v2323_v54 = vpop.xlane.xlu0 %2322 }
 0x552   : > { %5548 = vpow2.f32 %v2400_v17  ;;  %v2367_v31 = vsub.f32 %v6611_v63, %v2323_v54 }
 0x553   : > { %v6844_v3 = vpop.eup %5538  ;;  %v2398_v30 = vmul.f32 1.442695, %v2354_v27 }
 0x554   : > { %v2290_v33 = vpop.xlane.xlu1 %2289  ;;  %v2456_v56 = vsel %vm2245_vm6, %v6844_v3, 0.0  ;;  %v6852_v60 = vpop.eup %5540  ;;  %v2424_v63 = vmul.f32 1.442695, %v2367_v31 }
 0x555   : > { %5550 = vpow2.f32 %v2398_v30  ;;  %v2356_v41 = vsub.f32 %v6729_v43, %v2290_v33  ;;  %2460 = vadd.xlane.f32.xlu0 %v2459_v57  ;;  %2457 = vadd.xlane.f32.xlu1 %v2456_v56  ;;  %v2465_v48 = vsel %vm2245_vm6, %v6852_v60, 0.0  ;;  %v2329_v12 = vpop.xlane.xlu0 %2328 }
 0x556   : > { %5552 = vpow2.f32 %v2404_v10  ;;  %v2369_v50 = vsub.f32 %v6617_v49, %v2329_v12 }
 0x557   : > { %v6855_v55 = vpop.eup %5542  ;;  %v2402_v22 = vmul.f32 1.442695, %v2356_v41 }
 0x558   : > { %v2296_v34 = vpop.xlane.xlu1 %2295  ;;  %v2462_v40 = vsel %vm2245_vm6, %v6855_v55, 0.0  ;;  %v6862_v5 = vpop.eup %5544 }
 0x559   : > { %5554 = vpow2.f32 %v2402_v22  ;;  %v2358_v43 = vsub.f32 %v6735_v36, %v2296_v34  ;;  %2466 = vadd.xlane.f32.xlu0 %v2465_v48  ;;  %2463 = vadd.xlane.f32.xlu1 %v2462_v40  ;;  %v2471_v28 = vsel %vm2245_vm6, %v6862_v5, 0.0  ;;  %v2335_v41 = vpop.xlane.xlu0 %2334 }
 0x55a   : > { %5556 = vpow2.f32 %v2408_v23  ;;  %v2371_v49 = vsub.f32 %v6623_v7, %v2335_v41 }
 0x55b   : > { %v6865_v37 = vpop.eup %5546  ;;  %v2406_v13 = vmul.f32 1.442695, %v2358_v43 }
 0x55c   : > { %v2302_v2 = vpop.xlane.xlu1 %2301  ;;  %v2468_v15 = vsel %vm2245_vm6, %v6865_v37, 0.0  ;;  %v6872_v59 = vpop.eup %5548  ;;  %v2432_v7 = vmul.f32 1.442695, %v2371_v49 }
 0x55d   : > { %5558 = vpow2.f32 %v2406_v13  ;;  %v2360_v36 = vsub.f32 %v6741_v62, %v2302_v2  ;;  %2472 = vadd.xlane.f32.xlu0 %v2471_v28  ;;  %2469 = vadd.xlane.f32.xlu1 %v2468_v15  ;;  %v2477_v44 = vsel %vm2245_vm6, %v6872_v59, 0.0  ;;  %v2341_v13 = vpop.xlane.xlu0 %2340 }
 0x55e   : > { %5560 = vpow2.f32 %v2412_v8  ;;  %v2428_v8 = vmul.f32 1.442695, %v2369_v50  ;;  %v2373_v14 = vsub.f32 %v6628_v9, %v2341_v13 }
 0x55f   : > { %v6875_v17 = vpop.eup %5550  ;;  %v2410_v32 = vmul.f32 1.442695, %v2360_v36 }
 0x560   : > { %v2308_v1 = vpop.xlane.xlu1 %2307  ;;  %v2474_v38 = vsel %vm2245_vm6, %v6875_v17, 0.0  ;;  %v6882_v27 = vpop.eup %5552 }
 0x561   : > { %5562 = vpow2.f32 %v2410_v32  ;;  %v2362_v62 = vsub.f32 %v6747_v42, %v2308_v1  ;;  %2478 = vadd.xlane.f32.xlu0 %v2477_v44  ;;  %2475 = vadd.xlane.f32.xlu1 %v2474_v38  ;;  %v2483_v33 = vsel %vm2245_vm6, %v6882_v27, 0.0 }
 0x562   : > { %5564 = vpow2.f32 %v2416_v46 }
 0x563   : > { %v6885_v10 = vpop.eup %5554  ;;  %v2414_v30 = vmul.f32 1.442695, %v2362_v62 }
 0x564   : > { %v2314_v16 = vpop.xlane.xlu1 %2313  ;;  %v2480_v57 = vsel %vm2245_vm6, %v6885_v10, 0.0  ;;  %v6892_v56 = vpop.eup %5556 }
 0x565   : > { %5566 = vpow2.f32 %v2414_v30  ;;  %v2364_v42 = vsub.f32 %v6753_v45, %v2314_v16  ;;  %2484 = vadd.xlane.f32.xlu0 %v2483_v33  ;;  %2481 = vadd.xlane.f32.xlu1 %v2480_v57  ;;  %v2489_v48 = vsel %vm2245_vm6, %v6892_v56, 0.0 }
 0x566   : > { %5568 = vpow2.f32 %v2420_v58  ;;  %v2436_v58 = vmul.f32 1.442695, %v2373_v14 }
 0x567   : > { %v6895_v23 = vpop.eup %5558  ;;  %v2418_v22 = vmul.f32 1.442695, %v2364_v42 }
 0x568   : > { %v2320_v34 = vpop.xlane.xlu1 %2319  ;;  %v2486_v40 = vsel %vm2245_vm6, %v6895_v23, 0.0  ;;  %v6902_v43 = vpop.eup %5560 }
 0x569   : > { %5570 = vpow2.f32 %v2418_v22  ;;  %v2366_v45 = vsub.f32 %v6759_v39, %v2320_v34  ;;  %2490 = vadd.xlane.f32.xlu0 %v2489_v48  ;;  %2487 = vadd.xlane.f32.xlu1 %v2486_v40  ;;  %v2495_v28 = vsel %vm2245_vm6, %v6902_v43, 0.0 }
 0x56a   : > { %5572 = vpow2.f32 %v2424_v63 }
 0x56b   : > { %v6905_v54 = vpop.eup %5562  ;;  %v2422_v53 = vmul.f32 1.442695, %v2366_v45 }
 0x56c   : > { %v2326_v2 = vpop.xlane.xlu1 %2325  ;;  %v2492_v15 = vsel %vm2245_vm6, %v6905_v54, 0.0  ;;  %v6912_v36 = vpop.eup %5564 }
 0x56d   : > { %5574 = vpow2.f32 %v2422_v53  ;;  %v2368_v39 = vsub.f32 %v6765_v6, %v2326_v2  ;;  %2496 = vadd.xlane.f32.xlu0 %v2495_v28  ;;  %2493 = vadd.xlane.f32.xlu1 %v2492_v15  ;;  %v2501_v1 = vsel %vm2245_vm6, %v6912_v36, 0.0 }
 0x56e   : > { %5576 = vpow2.f32 %v2428_v8 }
 0x56f   : > { %v6915_v46 = vpop.eup %5566  ;;  %v2426_v32 = vmul.f32 1.442695, %v2368_v39 }
 0x570   : > { %v2332_v12 = vpop.xlane.xlu1 %2331  ;;  %v2498_v44 = vsel %vm2245_vm6, %v6915_v46, 0.0  ;;  %v6922_v38 = vpop.eup %5568 }
 0x571   : > { %5578 = vpow2.f32 %v2426_v32  ;;  %v2370_v6 = vsub.f32 %v6771_v35, %v2332_v12  ;;  %2502 = vadd.xlane.f32.xlu0 %v2501_v1  ;;  %2499 = vadd.xlane.f32.xlu1 %v2498_v44  ;;  %v2507_v30 = vsel %vm2245_vm6, %v6922_v38, 0.0 }
 0x572   : > { %5580 = vpow2.f32 %v2432_v7 }
 0x573   : > { %v6925_v62 = vpop.eup %5570  ;;  %v2430_v9 = vmul.f32 1.442695, %v2370_v6 }
 0x574   : > { %v2338_v31 = vpop.xlane.xlu1 %2337  ;;  %v2504_v16 = vsel %vm2245_vm6, %v6925_v62, 0.0  ;;  %v6931_v33 = vpop.eup %5572 }
 0x575   : > { %5582 = vpow2.f32 %v2430_v9  ;;  %v2372_v57 = vsub.f32 %v6776_v25, %v2338_v31  ;;  %2508 = vadd.xlane.f32.xlu0 %v2507_v30  ;;  %2505 = vadd.xlane.f32.xlu1 %v2504_v16  ;;  %v2513_v41 = vsel %vm2245_vm6, %v6931_v33, 0.0 }
 0x576   : > { %5584 = vpow2.f32 %v2436_v58 }
 0x577   : > { %v6934_v35 = vpop.eup %5574  ;;  %v2434_v42 = vmul.f32 1.442695, %v2372_v57 }
 0x578   : > { %v2510_v63 = vsel %vm2245_vm6, %v6934_v35, 0.0  ;;  %v6940_v50 = vpop.eup %5576 }
 0x579   : > { %5586 = vpow2.f32 %v2434_v42  ;;  %2514 = vadd.xlane.f32.xlu0 %v2513_v41  ;;  %2511 = vadd.xlane.f32.xlu1 %v2510_v63  ;;  %v2519_v25 = vsel %vm2245_vm6, %v6940_v50, 0.0 }
 0x57b   : > { %v6942_v22 = vpop.eup %5578 }
 0x57c   : > { %v2516_v34 = vsel %vm2245_vm6, %v6942_v22, 0.0  ;;  %v6948_v48 = vpop.eup %5580 }
 0x57d   : > { %2520 = vadd.xlane.f32.xlu0 %v2519_v25  ;;  %2517 = vadd.xlane.f32.xlu1 %v2516_v34  ;;  %v2525_v45 = vsel %vm2245_vm6, %v6948_v48, 0.0 }
 0x57f   : > { %v6950_v40 = vpop.eup %5582 }
 0x580   : > { %v2522_v8 = vsel %vm2245_vm6, %v6950_v40, 0.0  ;;  %v6956_v49 = vpop.eup %5584 }
 0x581   : > { %2526 = vadd.xlane.f32.xlu0 %v2525_v45  ;;  %2523 = vadd.xlane.f32.xlu1 %v2522_v8  ;;  %v2531_v13 = vsel %vm2245_vm6, %v6956_v49, 0.0 }
 0x583   : > { %v6958_v53 = vpop.eup %5586 }
 0x584   : > { %v2528_v2 = vsel %vm2245_vm6, %v6958_v53, 0.0 }
 0x585   : > { %2532 = vadd.xlane.f32.xlu0 %v2531_v13  ;;  %2529 = vadd.xlane.f32.xlu1 %v2528_v2 }
 0x5ce   : > { %v2440_v28 = vpop.xlane.xlu1 %2439 }
 0x5cf   : > { %5588 = vrcp.f32 %v2440_v28 }
 0x5d2   : > { %v2443_v15 = vpop.xlane.xlu0 %2442 }
 0x5d3   : > { %5590 = vrcp.f32 %v2443_v15 }
 0x5d6   : > { %v2446_v39 = vpop.xlane.xlu1 %2445 }
 0x5d7   : > { %5592 = vrcp.f32 %v2446_v39 }
 0x5d9   : > { %v5589_v14 = vpop.eup %5588 }
 0x5da   : > { %v2449_v7 = vpop.xlane.xlu0 %2448  ;;  %v2566_v44 = vmul.f32 %v5589_v14, %v6803_v18 }
 0x5db   : > { %5594 = vrcp.f32 %v2449_v7 }
 0x5dd   : > { %v5591_v32 = vpop.eup %5590 }
 0x5de   : > { %v2455_v12 = vpop.xlane.xlu0 %2454  ;;  %v2452_v1 = vpop.xlane.xlu1 %2451  ;;  %v2567_v6 = vmul.f32 %v5591_v32, %v6811_v26 }
 0x5df   : > { %5596 = vrcp.f32 %v2455_v12 }
 0x5e0   : > { %5598 = vrcp.f32 %v2452_v1  ;;  %v2598_v58 = vpack.c.bf16 %v2567_v6, %v2566_v44 }
 0x5e1   : > { %v5593_v30 = vpop.eup %5592 }
 0x5e2   : > { %v2461_v9 = vpop.xlane.xlu0 %2460  ;;  %5023 = vmatprep.mubr.msk.bf16.mxu0 %vm2245_vm6, %v2598_v58  ;;  %v2458_v31 = vpop.xlane.xlu1 %2457  ;;  %v2568_v57 = vmul.f32 %v5593_v30, %v6817_v29 }
 0x5e3   : > { %5600 = vrcp.f32 %v2461_v9 }
 0x5e4   : > { %5602 = vrcp.f32 %v2458_v31 }
 0x5e5   : > { %v5595_v16 = vpop.eup %5594 }
 0x5e6   : > { %v2569_v42 = vmul.f32 %v5595_v16, %v6824_v4  ;;  %v2467_v41 = vpop.xlane.xlu0 %2466  ;;  %v2464_v63 = vpop.xlane.xlu1 %2463 }
 0x5e7   : > { %5604 = vrcp.f32 %v2467_v41 }
 0x5e8   : > { %v2599_v18 = vpack.c.bf16 %v2569_v42, %v2568_v57  ;;  %5606 = vrcp.f32 %v2464_v63 }
 0x5e9   : > { %v5597_v26 = vpop.eup %5596 }
 0x5ea   : > { %v5599_v25 = vpop.eup %5598  ;;  %v2473_v34 = vpop.xlane.xlu0 %2472  ;;  %5024 = vmatmul.mubr.msk.bf16.vlgmr.msra.gmra.mrb[40].mxu0 %vm2245_vm6, %v2599_v18  ;;  %v2571_v8 = vmul.f32 %v5597_v26, %v6830_v47 }
 0x5eb   : > { %v2470_v45 = vpop.xlane.xlu1 %2469  ;;  %5608 = vrcp.f32 %v2473_v34  ;;  %v2570_v13 = vmul.f32 %v5599_v25, %v6833_v20 }
 0x5ec   : > { %5610 = vrcp.f32 %v2470_v45 }
 0x5ed   : > { %v5601_v29 = vpop.eup %5600  ;;  %v2600_v2 = vpack.c.bf16 %v2571_v8, %v2570_v13 }
 0x5ee   : > { %v5603_v4 = vpop.eup %5602  ;;  %v2479_v28 = vpop.xlane.xlu0 %2478  ;;  %v2573_v39 = vmul.f32 %v5601_v29, %v6841_v61 }
 0x5ef   : > { %v2476_v15 = vpop.xlane.xlu1 %2475  ;;  %5612 = vrcp.f32 %v2479_v28  ;;  %5027 = vmatprep.mubr.msk.bf16.mxu0 %vm2245_vm6, %v2600_v2  ;;  %v2572_v7 = vmul.f32 %v5603_v4, %v6844_v3 }
 0x5f0   : > { %5614 = vrcp.f32 %v2476_v15 }
 0x5f1   : > { %v5605_v14 = vpop.eup %5604  ;;  %v2601_v32 = vpack.c.bf16 %v2573_v39, %v2572_v7 }
 0x5f2   : > { %v5607_v47 = vpop.eup %5606  ;;  %v2485_v12 = vpop.xlane.xlu0 %2484  ;;  %v2575_v20 = vmul.f32 %v5605_v14, %v6852_v60 }
 0x5f3   : > { %v2482_v1 = vpop.xlane.xlu1 %2481  ;;  %5616 = vrcp.f32 %v2485_v12  ;;  %5028 = vmatmul.mubr.msk.bf16.gmra.mrb[44].mxu0 %vm2245_vm6, %v2601_v32  ;;  %v2574_v44 = vmul.f32 %v5607_v47, %v6855_v55  ;;  %v7925_v12 = vmax.f32 %v6396_v51, 0.0 }
 0x5f4   : > { %5618 = vrcp.f32 %v2482_v1 }
 0x5f5   : > { %v5609_v61 = vpop.eup %5608  ;;  %v2602_v6 = vpack.c.bf16 %v2575_v20, %v2574_v44 }
 0x5f6   : > { %v5611_v58 = vpop.eup %5610  ;;  %v2491_v9 = vpop.xlane.xlu0 %2490  ;;  %v2577_v3 = vmul.f32 %v5609_v61, %v6862_v5 }
 0x5f7   : > { %v2488_v31 = vpop.xlane.xlu1 %2487  ;;  %5620 = vrcp.f32 %v2491_v9  ;;  %5031 = vmatprep.mubr.msk.bf16.mxu0 %vm2245_vm6, %v2602_v6  ;;  %v2576_v30 = vmul.f32 %v5611_v58, %v6865_v37 }
 0x5f8   : > { %5622 = vrcp.f32 %v2488_v31 }
 0x5f9   : > { %v5613_v60 = vpop.eup %5612  ;;  %v2603_v16 = vpack.c.bf16 %v2577_v3, %v2576_v30 }
 0x5fa   : > { %v5615_v57 = vpop.eup %5614  ;;  %v2497_v42 = vpop.xlane.xlu0 %2496  ;;  %v2579_v55 = vmul.f32 %v5613_v60, %v6872_v59 }
 0x5fb   : > { %v2494_v41 = vpop.xlane.xlu1 %2493  ;;  %5624 = vrcp.f32 %v2497_v42  ;;  %5032 = vmatmul.mubr.msk.bf16.gmra.mrb[48].mxu0 %vm2245_vm6, %v2603_v16  ;;  %v2578_v63 = vmul.f32 %v5615_v57, %v6875_v17  ;;  %v7922_v17 = vmax.f32 %v6400_v52, 0.0 }
 0x5fc   : > { %5626 = vrcp.f32 %v2494_v41 }
 0x5fd   : > { %v5617_v5 = vpop.eup %5616  ;;  %v2604_v18 = vpack.c.bf16 %v2579_v55, %v2578_v63 }
 0x5fe   : > { %v5619_v26 = vpop.eup %5618  ;;  %v2503_v25 = vpop.xlane.xlu0 %2502  ;;  %v2581_v37 = vmul.f32 %v5617_v5, %v6882_v27  ;;  %v7923_v27 = vmax.f32 %v6414_v11, 0.0 }
 0x5ff   : > { %v2500_v34 = vpop.xlane.xlu1 %2499  ;;  %5628 = vrcp.f32 %v2503_v25  ;;  %5035 = vmatprep.mubr.msk.bf16.mxu0 %vm2245_vm6, %v2604_v18  ;;  %v2580_v45 = vmul.f32 %v5619_v26, %v6885_v10  ;;  %v7924_v10 = vmax.f32 %v6406_v24, 0.0  ;;  %v7926_v18 = vmax.f32 %v6418_v21, 0.0 }
 0x600   : > { %5630 = vrcp.f32 %v2500_v34  ;;  %v5075_v59 = vpop.f32.mrb[76].mxu1 }
 0x601   : > { %v5621_v8 = vpop.eup %5620  ;;  %v3094_v13 = vpop.f32.mrb[77].mxu1  ;;  %v2605_v29 = vpack.c.bf16 %v2581_v37, %v2580_v45  ;;  %v6994_v7 = vadd.f32 %v5075_v59, %v7923_v27  ;;  %v7928_v59 = vmax.f32 %v6429_v19, 0.0 }
 0x602   : > { %v5623_v2 = vpop.eup %5622  ;;  %v6989_v4 = vadd.f32 %v3094_v13, %v7922_v17  ;;  %v5076_v28 = vpop.f32.mrb[78].mxu1  ;;  %v2583_v39 = vmul.f32 %v5621_v8, %v6892_v56 }
 0x603   : > { %v2509_v15 = vpop.xlane.xlu0 %2508  ;;  %v6998_v14 = vadd.f32 %v5076_v28, %v7924_v10  ;;  %5036 = vmatmul.mubr.msk.bf16.gmra.mrb[52].mxu0 %vm2245_vm6, %v2605_v29  ;;  %v2506_v32 = vpop.xlane.xlu1 %2505  ;;  %v2582_v52 = vmul.f32 %v5623_v2, %v6895_v23  ;;  %v7929_v2 = vld [vmem:[#allocation43_spill] sm:$0xff] }
 0x604   : > { %5632 = vrcp.f32 %v2509_v15  ;;  %v3097_v47 = vpop.f32.mrb[79].mxu1  ;;  %3225 = vxpose.xlu1.b32.start [1/8] (short) (narrow) %v6989_v4, 64  ;;  %v7930_v17 = vmax.f32 %v7929_v2, 0.0  ;;  %v7942_v2 = vld [vmem:[#allocation16_spill] sm:$0xff] }
 0x605   : > { %5634 = vrcp.f32 %v2506_v32  ;;  %v7004_v1 = vadd.f32 %v3097_v47, %v7925_v12  ;;  %v5625_v11 = vpop.eup %5624  ;;  %v3222_v24 = vpack.c.bf16 %v6998_v14, %v6994_v7  ;;  %v2606_v56 = vpack.c.bf16 %v2583_v39, %v2582_v52 }
 0x606   : > { %v5627_v20 = vpop.eup %5626  ;;  %v2585_v6 = vmul.f32 %v5625_v11, %v6902_v43 }
 0x607   : > { %v3221_v44 = vpack.c.bf16 %v7004_v1, %v6989_v4  ;;  %v2515_v61 = vpop.xlane.xlu0 %2514  ;;  %5039 = vmatprep.mubr.msk.bf16.mxu0 %vm2245_vm6, %v2606_v56  ;;  %v2512_v51 = vpop.xlane.xlu1 %2511  ;;  %v2584_v23 = vmul.f32 %v5627_v20, %v6905_v54 }
 0x608   : > { %5636 = vrcp.f32 %v2515_v61  ;;  %3226 = vxpose.xlu1.b32.cont [2/8] (short) (narrow) %v7004_v1, 64 }
 0x609   : > { %5638 = vrcp.f32 %v2512_v51  ;;  %v5629_v58 = vpop.eup %5628  ;;  %v2607_v9 = vpack.c.bf16 %v2585_v6, %v2584_v23  ;;  %v5475_v51 = vld [vmem:[%s7750_s10 + $0x18] sm:$0xff]  }
 0x60a   : > { %v5631_v31 = vpop.eup %5630  ;;  %v2587_v30 = vmul.f32 %v5629_v58, %v6912_v36 }
 0x60b   : > { %v2521_v3 = vpop.xlane.xlu0 %2520  ;;  %5040 = vmatmul.mubr.msk.bf16.gmra.mrb[56].mxu0 %vm2245_vm6, %v2607_v9  ;;  %v2518_v60 = vpop.xlane.xlu1 %2517  ;;  %v2586_v43 = vmul.f32 %v5631_v31, %v6915_v46 }
 0x60c   : > { %5640 = vrcp.f32 %v2521_v3  ;;  %3227 = vxpose.xlu1.b32.cont [3/8] (short) (narrow) %v6994_v7, 64  ;;  %v7936_v7 = vld [vmem:[#allocation13_spill] sm:$0xff] }
 0x60d   : > { %5642 = vrcp.f32 %v2518_v60  ;;  %v2608_v54 = vpack.c.bf16 %v2587_v30, %v2586_v43 }
 0x60e   : > { %v5633_v16 = vpop.eup %5632 }
 0x60f   : > { %v5635_v57 = vpop.eup %5634  ;;  %v2527_v42 = vpop.xlane.xlu0 %2526  ;;  %v2589_v41 = vmul.f32 %v5633_v16, %v6922_v38  ;;  %5043 = vmatprep.mubr.msk.bf16.mxu0 %vm2245_vm6, %v2608_v54  ;;  %v7927_v38 = vmax.f32 %v6435_v0, 0.0 }
 0x610   : > { %5644 = vrcp.f32 %v2527_v42  ;;  %v2524_v55 = vpop.xlane.xlu1 %2523  ;;  %v5079_v36 = vpop.f32.mrb[80].mxu1  ;;  %v2588_v63 = vmul.f32 %v5635_v57, %v6925_v62  ;;  %3228 = vxpose.xlu1.b32.cont [4/8] (short) (narrow) %v6998_v14, 64  ;;  %v7080_v57 = vld [vmem:[%s7752_s12] sm:$0xff]  ;;  %v7085_v42 = vld [vmem:[%s7752_s12 + $0x8] sm:$0xff]  ;;  %v7937_v14 = vmax.f32 %v7936_v7, 0.0 }
 0x611   : > { %5646 = vrcp.f32 %v2524_v55  ;;  %v3110_v5 = vpop.f32.mrb[81].mxu1  ;;  %v7029_v45 = vadd.f32 %v5079_v36, %v7927_v38  ;;  %7932 = vst [vmem:[#allocation43_spill] sm:$0xff] %v7080_v57  ;;  %7933 = vst [vmem:[#allocation44_spill] sm:$0xff] %v7085_v42  ;;  %v3579_v36 = vpack.c.bf16 %v7085_v42, %v7080_v57 }
 0x612   : > { %v5637_v46 = vpop.eup %5636  ;;  %v7025_v26 = vadd.f32 %v3110_v5, %v7926_v18  ;;  %v5080_v25 = vpop.f32.mrb[82].mxu1  ;;  %v2609_v34 = vpack.c.bf16 %v2589_v41, %v2588_v63  ;;  %v7934_v63 = vld [vmem:[#allocation12_spill] sm:$0xff] }
 0x613   : > { %v5639_v37 = vpop.eup %5638  ;;  %v7033_v8 = vadd.f32 %v5080_v25, %v7928_v59  ;;  %v3113_v62 = vpop.f32.mrb[83].mxu1  ;;  %v2591_v29 = vmul.f32 %v5637_v46, %v6931_v33  ;;  %v7935_v5 = vmax.f32 %v7934_v63, 0.0  ;;  %v7962_v63 = vld [vmem:[#allocation23_spill] sm:$0xff] }
 0x614   : > { %v2533_v13 = vpop.xlane.xlu0 %2532  ;;  %v7038_v21 = vadd.f32 %v3113_v62, %v7930_v17  ;;  %5044 = vmatmul.mubr.msk.bf16.gmra.mrb[60].mxu0 %vm2245_vm6, %v2609_v34  ;;  %v2530_v28 = vpop.xlane.xlu1 %2529  ;;  %v2590_v0 = vmul.f32 %v5639_v37, %v6934_v35  ;;  %3229 = vxpose.xlu1.b32.cont [5/8] (short) (narrow) %v7025_v26, 64  ;;  %v7940_v37 = vld [vmem:[#allocation14_spill] sm:$0xff]  ;;  %v7943_v17 = vmax.f32 %v7942_v2, 0.0 }
 0x615   : > { %5648 = vrcp.f32 %v2533_v13  ;;  %v3224_v15 = vpack.c.bf16 %v7033_v8, %v7029_v45  ;;  %v7941_v38 = vmax.f32 %v7940_v37, 0.0 }
 0x616   : > { %5650 = vrcp.f32 %v2530_v28  ;;  %v5641_v19 = vpop.eup %5640  ;;  %v3223_v33 = vpack.c.bf16 %v7038_v21, %v7025_v26  ;;  %v2610_v39 = vpack.c.bf16 %v2591_v29, %v2590_v0  ;;  %v7938_v26 = vld [vmem:[#allocation11_spill] sm:$0xff]  ;;  %v7944_v28 = vld [vmem:[#allocation17_spill] sm:$0xff] }
 0x617   : > { %v5643_v27 = vpop.eup %5642  ;;  %v2593_v10 = vmul.f32 %v5641_v19, %v6940_v50  ;;  %v7939_v25 = vmax.f32 %v7938_v26, 0.0  ;;  %v7945_v0 = vmax.f32 %v7944_v28, 0.0 }
 0x618   : > { %5047 = vmatprep.mubr.msk.bf16.mxu0 %vm2245_vm6, %v2610_v39  ;;  %v2592_v32 = vmul.f32 %v5643_v27, %v6942_v22  ;;  %3230 = vxpose.xlu1.b32.cont [6/8] (short) (narrow) %v7038_v21, 64 }
 0x61a   : > { %v5645_v35 = vpop.eup %5644  ;;  %v2611_v47 = vpack.c.bf16 %v2593_v10, %v2592_v32  ;;  %v7948_v10 = vld [vmem:[#allocation18_spill] sm:$0xff] }
 0x61b   : > { %v5647_v52 = vpop.eup %5646  ;;  %v2595_v12 = vmul.f32 %v5645_v35, %v6948_v48  ;;  %v7931_v48 = vmov 0.0   ;;  %v7949_v32 = vmax.f32 %v7948_v10, 0.0 }
 0x61c   : > { %5048 = vmatmul.mubr.msk.bf16.gmra.mrb[64].mxu0 %vm2245_vm6, %v2611_v47  ;;  %v2594_v11 = vmul.f32 %v5647_v52, %v6950_v40  ;;  %3231 = vxpose.xlu1.b32.cont [7/8] (short) (narrow) %v7029_v45, 64  ;;  %v5472_v40 = vld [vmem:[%s7750_s10] sm:$0xff]  }
 0x61d   : > { %5081 = vmatprep.subr.bf16.mxu1 %v5472_v40 }
 0x61e   : > { %v2612_v20 = vpack.c.bf16 %v2595_v12, %v2594_v11  ;;  %5082 = vmatpush3.bf16.msra.mxu1 %v5472_v40 }
 0x61f   : > { %v5649_v56 = vpop.eup %5648 }
 0x620   : > { %v5651_v50 = vpop.eup %5650  ;;  %v2597_v61 = vmul.f32 %v5649_v56, %v6956_v49  ;;  %5051 = vmatprep.mubr.msk.bf16.mxu0 %vm2245_vm6, %v2612_v20  ;;  %3232 = vxpose.xlu1.b32.end [8/8] (short) (narrow) %v7033_v8, 64  ;;  %v5473_v49 = vld [vmem:[%s7750_s10 + $0x8] sm:$0xff]  }
 0x621   : > { %v2596_v22 = vmul.f32 %v5651_v50, %v6958_v53  ;;  %5083 = vmatprep.subr.bf16.mxu1 %v5473_v49  ;;  %v5474_v53 = vld [vmem:[%s7750_s10 + $0x10] sm:$0xff]   ;;  %v7950_v20 = vld [vmem:[#allocation20_spill] sm:$0xff] }
 0x622   : > { %5084 = vmatpush3.bf16.msra.mxu1 %v5473_v49  ;;  %v7951_v50 = vmax.f32 %v7950_v20, 0.0 }
 0x623   : > { %v2613_v6 = vpack.c.bf16 %v2597_v61, %v2596_v22  ;;  %5085 = vmatprep.subr.bf16.mxu1 %v5474_v53  ;;  %v7952_v22 = vld [vmem:[#allocation21_spill] sm:$0xff] }
 0x625   : > { %5052 = vmatmul.mubr.msk.bf16.gmra.mrb[68].mxu0 %vm2245_vm6, %v2613_v6  ;;  %v7953_v6 = vmax.f32 %v7952_v22, 0.0 }
 0x626   : > { %5129 = vmatprep.mubr.msk.bf16.mxu0 %vm5745_vm2, %v7931_v48  ;;  %5086 = vmatpush3.bf16.msra.mxu1 %v5474_v53  ;;  %v7954_v53 = vld [vmem:[#allocation19_spill] sm:$0xff] }
 0x627   : > { %5087 = vmatprep.subr.bf16.mxu1 %v5475_v51 }
 0x62a   : > { %5088 = vmatpush3.bf16.msra.mxu1 %v5475_v51  ;;  %v7955_v51 = vmax.f32 %v7954_v53, 0.0 }
 0x684   : > { %v3241_v23 = vpop.trf.xlu1 }
 0x688   : > { %v3242_v58 = vpop.trf.xlu1 }
 0x689   : > { %v3257_v9 = vpack.c.bf16 %v3242_v58, %v3241_v23  ;;  %v7956_v58 = vld [vmem:[#allocation22_spill] sm:$0xff] }
 0x68b   : > { %5122 = vmatpush3.bf16.msra.mxu0 %v3257_v9  ;;  %v7957_v9 = vmax.f32 %v7956_v58, 0.0  ;;  %v7974_v58 = vld [vmem:[#allocation32_spill] sm:$0xff] }
 0x68c   : > { %v3243_v31 = vpop.trf.xlu1  ;;  %5123 = vmatprep.subr.bf16.mxu0 %v7931_v48 }
 0x690   : > { %v3244_v3 = vpop.trf.xlu1 }
 0x691   : > { %v3258_v30 = vpack.c.bf16 %v3244_v3, %v3243_v31 }
 0x693   : > { %5124 = vmatpush3.bf16.msra.mxu0 %v3258_v30 }
 0x694   : > { %v3245_v60 = vpop.trf.xlu1  ;;  %5125 = vmatprep.subr.bf16.mxu0 %v7931_v48 }
 0x698   : > { %v3246_v43 = vpop.trf.xlu1 }
 0x699   : > { %v3259_v16 = vpack.c.bf16 %v3246_v43, %v3245_v60 }
 0x69b   : > { %5126 = vmatpush3.bf16.msra.mxu0 %v3259_v16 }
 0x69c   : > { %v3247_v54 = vpop.trf.xlu1  ;;  %5127 = vmatprep.subr.bf16.mxu0 %v7931_v48 }
 0x6a0   : > { %v3248_v41 = vpop.trf.xlu1 }
 0x6a1   : > { %v3260_v55 = vpack.c.bf16 %v3248_v41, %v3247_v54  ;;  %v7958_v54 = vld [vmem:[#allocation24_spill] sm:$0xff] }
 0x6a2   : > { %v7959_v41 = vmax.f32 %v7958_v54, 0.0 }
 0x6a3   : > { %5128 = vmatpush3.bf16.msra.mxu0 %v3260_v55 }
 0x6a4   : > { %5133 = vmatprep.subr.bf16.mxu0 %v7931_v48 }
 0x6a6   : > { %5130 = vmatmul.mubr.msk.bf16.vlgmr.msra.gmra.mrb[72].mxu0 %vm1140_vm1, %v3579_v36  ;;  %v7960_v36 = vld [vmem:[#allocation25_spill] sm:$0xff] }
 0x6a7   : > { %5134 = vmatpush3.bf16.msra.mxu0 %v3221_v44  ;;  %5141 = vmatprep.mubr.msk.bf16.mxu0 %vm5745_vm2, %v7931_v48 }
 0x6a8   : > { %5135 = vmatprep.subr.bf16.mxu0 %v7931_v48 }
 0x6ab   : > { %5136 = vmatpush3.bf16.msra.mxu0 %v3222_v24 }
 0x6ac   : > { %5137 = vmatprep.subr.bf16.mxu0 %v7931_v48 }
 0x6af   : > { %5138 = vmatpush3.bf16.msra.mxu0 %v3223_v33  ;;  %v7946_v33 = vld [vmem:[#allocation15_spill] sm:$0xff] }
 0x6b0   : > { %5139 = vmatprep.subr.bf16.mxu0 %v7931_v48  ;;  %v7947_v39 = vmax.f32 %v7946_v33, 0.0 }
 0x6b3   : > { %5140 = vmatpush3.bf16.msra.mxu0 %v3224_v15 }
 0x6bd   : > { %v5025_v4 = vpop.f32.mrb[40].mxu0 }
 0x6be   : > { %v2700_v1 = vpop.f32.mrb[41].mxu0  ;;  %v7110_v46 = vadd.f32 %v5025_v4, %v7935_v5  ;;  %v7961_v4 = vmax.f32 %v7960_v36, 0.0  ;;  %v7963_v5 = vmax.f32 %v7962_v63, 0.0 }
 0x6bf   : > { %v5026_v44 = vpop.f32.mrb[42].mxu0  ;;  %v7118_v34 = vadd.f32 %v2700_v1, %v7939_v25 }
 0x6c0   : > { %v7114_v24 = vadd.f32 %v5026_v44, %v7937_v14  ;;  %v2703_v18 = vpop.f32.mrb[43].mxu0  ;;  %v7964_v14 = vld [vmem:[#allocation26_spill] sm:$0xff] }
 0x6c1   : > { %v7122_v45 = vadd.f32 %v2703_v18, %v7941_v38  ;;  %v7965_v18 = vmax.f32 %v7964_v14, 0.0 }
 0x6c2   : > { %v7126_v59 = vpack.c.bf16 %v7114_v24, %v7110_v46 }
 0x6c3   : > { %v3133_v8 = vpack.c.bf16 %v7122_v45, %v7118_v34 }
 0x6c5   : > { %5089 = vmatprep.mubr.msk.bf16.mxu1 %vm1140_vm1, %v3133_v8 }
 0x6c6   : > { %v5029_v62 = vpop.f32.mrb[44].mxu0  ;;  %5090 = vmatmul.mubr.msk.bf16.vlgmr.msra.gmra.mrb[84].mxu1 %vm1140_vm1, %v7126_v59 }
 0x6c7   : > { %v2716_v13 = vpop.f32.mrb[45].mxu0  ;;  %v7135_v21 = vadd.f32 %v5029_v62, %v7943_v17  ;;  %v7966_v62 = vld [vmem:[#allocation28_spill] sm:$0xff]  ;;  %v7968_v17 = vld [vmem:[#allocation27_spill] sm:$0xff] }
 0x6c8   : > { %v5030_v29 = vpop.f32.mrb[46].mxu0  ;;  %v7143_v27 = vadd.f32 %v2716_v13, %v7947_v39  ;;  %v7967_v13 = vmax.f32 %v7966_v62, 0.0  ;;  %v7969_v28 = vmax.f32 %v7968_v17, 0.0  ;;  %v7970_v39 = vld [vmem:[#allocation29_spill] sm:$0xff] }
 0x6c9   : > { %v7139_v15 = vadd.f32 %v5030_v29, %v7945_v0  ;;  %v2719_v19 = vpop.f32.mrb[47].mxu0  ;;  %v7971_v10 = vmax.f32 %v7970_v39, 0.0  ;;  %v7982_v39 = vld [vmem:[#allocation36_spill] sm:$0xff] }
 0x6ca   : > { %v7147_v35 = vadd.f32 %v2719_v19, %v7949_v32 }
 0x6cb   : > { %v7151_v47 = vpack.c.bf16 %v7139_v15, %v7135_v21 }
 0x6cc   : > { %v7155_v52 = vpack.c.bf16 %v7147_v35, %v7143_v27 }
 0x6ce   : > { %v5033_v12 = vpop.f32.mrb[48].mxu0  ;;  %5093 = vmatprep.mubr.msk.bf16.mxu1 %vm1140_vm1, %v7155_v52 }
 0x6cf   : > { %v2732_v11 = vpop.f32.mrb[49].mxu0  ;;  %5094 = vmatmul.mubr.msk.bf16.gmra.mrb[88].mxu1 %vm1140_vm1, %v7151_v47  ;;  %v7163_v61 = vadd.f32 %v5033_v12, %v7951_v50 }
 0x6d0   : > { %v5034_v56 = vpop.f32.mrb[50].mxu0  ;;  %v7171_v23 = vadd.f32 %v2732_v11, %v7955_v51 }
 0x6d1   : > { %v7167_v40 = vadd.f32 %v5034_v56, %v7953_v6  ;;  %v2735_v49 = vpop.f32.mrb[51].mxu0  ;;  %v7972_v56 = vld [vmem:[#allocation30_spill] sm:$0xff] }
 0x6d2   : > { %v7175_v31 = vadd.f32 %v2735_v49, %v7957_v9  ;;  %v7973_v20 = vmax.f32 %v7972_v56, 0.0  ;;  %v7975_v9 = vmax.f32 %v7974_v58, 0.0  ;;  %v7986_v58 = vld [vmem:[#allocation37_spill] sm:$0xff] }
 0x6d3   : > { %v7179_v3 = vpack.c.bf16 %v7167_v40, %v7163_v61 }
 0x6d4   : > { %v7183_v30 = vpack.c.bf16 %v7175_v31, %v7171_v23 }
 0x6d6   : > { %v5037_v60 = vpop.f32.mrb[52].mxu0  ;;  %5097 = vmatprep.mubr.msk.bf16.mxu1 %vm1140_vm1, %v7183_v30 }
 0x6d7   : > { %v2748_v43 = vpop.f32.mrb[53].mxu0  ;;  %5098 = vmatmul.mubr.msk.bf16.gmra.mrb[92].mxu1 %vm1140_vm1, %v7179_v3  ;;  %v7191_v55 = vadd.f32 %v5037_v60, %v7959_v41 }
 0x6d8   : > { %v5038_v16 = vpop.f32.mrb[54].mxu0  ;;  %v7199_v7 = vadd.f32 %v2748_v43, %v7963_v5 }
 0x6d9   : > { %v7195_v1 = vadd.f32 %v5038_v16, %v7961_v4  ;;  %v2751_v44 = vpop.f32.mrb[55].mxu0  ;;  %v7976_v16 = vld [vmem:[#allocation31_spill] sm:$0xff] }
 0x6da   : > { %v7203_v26 = vadd.f32 %v2751_v44, %v7965_v18  ;;  %v7977_v54 = vmax.f32 %v7976_v16, 0.0  ;;  %v7978_v44 = vld [vmem:[#allocation33_spill] sm:$0xff] }
 0x6db   : > { %v7207_v25 = vpack.c.bf16 %v7195_v1, %v7191_v55  ;;  %v7979_v63 = vmax.f32 %v7978_v44, 0.0 }
 0x6dc   : > { %v7211_v37 = vpack.c.bf16 %v7203_v26, %v7199_v7 }
 0x6de   : > { %v5041_v38 = vpop.f32.mrb[56].mxu0  ;;  %5101 = vmatprep.mubr.msk.bf16.mxu1 %vm1140_vm1, %v7211_v37 }
 0x6df   : > { %v7217_v29 = vadd.f32 %v5041_v38, %v7967_v13  ;;  %v2764_v2 = vpop.f32.mrb[57].mxu0  ;;  %5102 = vmatmul.mubr.msk.bf16.gmra.mrb[96].mxu1 %vm1140_vm1, %v7207_v25  ;;  %v7980_v38 = vld [vmem:[#allocation34_spill] sm:$0xff] }
 0x6e0   : > { %v7223_v0 = vadd.f32 %v2764_v2, %v7969_v28  ;;  %v5042_v19 = vpop.f32.mrb[58].mxu0  ;;  %v7981_v62 = vmax.f32 %v7980_v38, 0.0 }
 0x6e1   : > { %v7229_v32 = vadd.f32 %v5042_v19, %v7971_v10  ;;  %v2767_v12 = vpop.f32.mrb[59].mxu0  ;;  %v7983_v10 = vmax.f32 %v7982_v39, 0.0 }
 0x6e2   : > { %v7235_v50 = vadd.f32 %v2767_v12, %v7973_v20  ;;  %v7984_v20 = vld [vmem:[#allocation35_spill] sm:$0xff] }
 0x6e3   : > { %v3142_v6 = vpack.c.bf16 %v7229_v32, %v7217_v29 }
 0x6e4   : > { %v3141_v53 = vpack.c.bf16 %v7235_v50, %v7223_v0 }
 0x6e6   : > { %5105 = vmatprep.mubr.msk.bf16.mxu1 %vm1140_vm1, %v3141_v53  ;;  %4772 = vmatprep.subr.bf16.mxu1 %v3141_v53 }
 0x6e7   : > { %v5045_v51 = vpop.f32.mrb[60].mxu0  ;;  %5106 = vmatmul.mubr.msk.bf16.gmra.mrb[100].mxu1 %vm1140_vm1, %v3142_v6 }
 0x6e8   : > { %v7248_v60 = vadd.f32 %v5045_v51, %v7975_v9  ;;  %v2780_v43 = vpop.f32.mrb[61].mxu0  ;;  %4773 = vmatpush3.bf16.msra.mxu1 %v3133_v8  ;;  %v7987_v9 = vmax.f32 %v7986_v58, 0.0  ;;  %v7994_v58 = vld [vmem:[#allocation41_spill] sm:$0xff] }
 0x6e9   : > { %v7253_v41 = vadd.f32 %v2780_v43, %v7977_v54  ;;  %v5046_v36 = vpop.f32.mrb[62].mxu0  ;;  %4774 = vmatprep.subr.bf16.mxu1 %v3142_v6  ;;  %v7985_v6 = vmax.f32 %v7984_v20, 0.0 }
 0x6ea   : > { %v7259_v5 = vadd.f32 %v5046_v36, %v7979_v63  ;;  %v2783_v14 = vpop.f32.mrb[63].mxu0  ;;  %v7988_v36 = vld [vmem:[#allocation38_spill] sm:$0xff] }
 0x6eb   : > { %v7265_v13 = vadd.f32 %v2783_v14, %v7981_v62  ;;  %v7989_v44 = vmax.f32 %v7988_v36, 0.0 }
 0x6ec   : > { %v3144_v2 = vpack.c.bf16 %v7259_v5, %v7248_v60  ;;  %4775 = vmatpush3.bf16.msra.mxu1 %v7126_v59 }
 0x6ed   : > { %v3143_v28 = vpack.c.bf16 %v7265_v13, %v7253_v41 }
 0x6ef   : > { %v5049_v19 = vpop.f32.mrb[64].mxu0  ;;  %5109 = vmatprep.mubr.msk.bf16.mxu1 %vm1140_vm1, %v3143_v28  ;;  %4776 = vmatprep.subr.bf16.mxu1 %v3143_v28  ;;  %v7990_v28 = vld [vmem:[#allocation40_spill] sm:$0xff] }
 0x6f0   : > { %v7279_v12 = vadd.f32 %v5049_v19, %v7983_v10  ;;  %v2796_v56 = vpop.f32.mrb[65].mxu0  ;;  %5110 = vmatmul.mubr.msk.bf16.gmra.mrb[104].mxu1 %vm1140_vm1, %v3144_v2  ;;  %v7991_v19 = vmax.f32 %v7990_v28, 0.0 }
 0x6f1   : > { %v7284_v53 = vadd.f32 %v2796_v56, %v7985_v6  ;;  %4777 = vmatpush3.bf16.msra.mxu1 %v7155_v52  ;;  %v5050_v51 = vpop.f32.mrb[66].mxu0  ;;  %v7992_v56 = vld [vmem:[#allocation39_spill] sm:$0xff] }
 0x6f2   : > { %v7291_v43 = vadd.f32 %v5050_v51, %v7987_v9  ;;  %4778 = vmatprep.subr.bf16.mxu1 %v3144_v2  ;;  %v2799_v16 = vpop.f32.mrb[67].mxu0  ;;  %v7993_v20 = vmax.f32 %v7992_v56, 0.0  ;;  %v7995_v9 = vmax.f32 %v7994_v58, 0.0 }
 0x6f3   : > { %v7297_v63 = vadd.f32 %v2799_v16, %v7989_v44 }
 0x6f4   : > { %v3146_v14 = vpack.c.bf16 %v7291_v43, %v7279_v12 }
 0x6f5   : > { %v3145_v62 = vpack.c.bf16 %v7297_v63, %v7284_v53  ;;  %4779 = vmatpush3.bf16.msra.mxu1 %v7151_v47 }
 0x6f7   : > { %5113 = vmatprep.mubr.msk.bf16.mxu1 %vm1140_vm1, %v3145_v62  ;;  %4780 = vmatprep.subr.bf16.mxu1 %v3145_v62  ;;  %v7996_v62 = vld [vmem:[#allocation42_spill] sm:$0xff] }
 0x6f8   : > { %v5053_v2 = vpop.f32.mrb[68].mxu0  ;;  %5114 = vmatmul.mubr.msk.bf16.gmra.mrb[108].mxu1 %vm1140_vm1, %v3146_v14 }
 0x6f9   : > { %v7311_v39 = vadd.f32 %v5053_v2, %v7991_v19  ;;  %v2812_v10 = vpop.f32.mrb[69].mxu0  ;;  %4781 = vmatpush3.bf16.msra.mxu1 %v7183_v30  ;;  %v7997_v2 = vmax.f32 %v7996_v62, 0.0 }
 0x6fa   : > { %v7316_v6 = vadd.f32 %v2812_v10, %v7993_v20  ;;  %v5054_v51 = vpop.f32.mrb[70].mxu0  ;;  %4782 = vmatprep.subr.bf16.mxu1 %v3146_v14 }
 0x6fb   : > { %v7323_v16 = vadd.f32 %v5054_v51, %v7995_v9  ;;  %v2815_v36 = vpop.f32.mrb[71].mxu0 }
 0x6fc   : > { %v7329_v28 = vadd.f32 %v2815_v36, %v7997_v2 }
 0x6fd   : > { %v3148_v19 = vpack.c.bf16 %v7323_v16, %v7311_v39  ;;  %4783 = vmatpush3.bf16.msra.mxu1 %v7179_v3 }
 0x6fe   : > { %v3147_v14 = vpack.c.bf16 %v7329_v28, %v7316_v6 }
 0x700   : > { %5117 = vmatprep.mubr.msk.bf16.mxu1 %vm1140_vm1, %v3147_v14  ;;  %4784 = vmatprep.subr.bf16.mxu1 %v3147_v14 }
 0x701   : > { %5118 = vmatmul.mubr.msk.bf16.gmra.mrb[112].mxu1 %vm1140_vm1, %v3148_v19 }
 0x702   : > { %4785 = vmatpush3.bf16.msra.mxu1 %v7211_v37 }
 0x703   : > { %4786 = vmatprep.subr.bf16.mxu1 %v3148_v19 }
 0x706   : > { %4787 = vmatpush3.bf16.msra.mxu1 %v7207_v25 }
 0x779   : > { %v3617_v56 = vpop.f32.mrb[72].mxu0 }
 0x77a   : > { %v7344_v20 = vmul.f32 0.125, %v3617_v56  ;;  %v5131_v51 = vpop.f32.mrb[73].mxu0 }
 0x77b   : > { %v3620_v58 = vpop.f32.mrb[74].mxu0 }
 0x77c   : > { %v3626_v9 = vsel %vm1140_vm1, %v7344_v20, -inf  ;;  %v7348_v36 = vmul.f32 0.125, %v3620_v58  ;;  %v5132_v3 = vpop.f32.mrb[75].mxu0 }
 0x77d   : > { %3627 = vmax.xlane.f32.xlu0 %v3626_v9 }
 0x77e   : > { %v3629_v62 = vsel %vm1140_vm1, %v7348_v36, -inf }
 0x781   : > { %3630 = vmax.xlane.f32.xlu0 %v3629_v62  ;;  %v4558_v62 = vld [vmem:[%s7751_s11] ss:$0 sm:$0xff] }
 0x799   : > { %v5091_v37 = vpop.f32.mrb[84].mxu1 }
 0x79a   : > { %v3382_v2 = vpop.f32.mrb[85].mxu1  ;;  %v7355_v54 = vadd.f32 %v5091_v37, %v4558_v62 }
 0x79b   : > { %v5092_v19 = vpop.f32.mrb[86].mxu1  ;;  %v7359_v17 = vadd.f32 %v4558_v62, %v3382_v2 }
 0x79c   : > { %v3385_v25 = vpop.f32.mrb[87].mxu1  ;;  %7998 = vst [vmem:[#allocation12_spill] sm:$0xff] %v7355_v54  ;;  %v7363_v33 = vadd.f32 %v5092_v19, %v4558_v62 }
 0x79d   : > { %v7369_v57 = vadd.f32 %v4558_v62, %v3385_v25 }
 0x79e   : > { %8000 = vst [vmem:[#allocation11_spill] sm:$0xff] %v7363_v33 }
 0x7a2   : > { %v5095_v14 = vpop.f32.mrb[88].mxu1 }
 0x7a3   : > { %v3398_v56 = vpop.f32.mrb[89].mxu1  ;;  %v7379_v48 = vadd.f32 %v5095_v14, %v4558_v62 }
 0x7a4   : > { %v5096_v30 = vpop.f32.mrb[90].mxu1 }
 0x7a5   : > { %v3401_v51 = vpop.f32.mrb[91].mxu1  ;;  %8002 = vst [vmem:[#allocation16_spill] sm:$0xff] %v7379_v48 }
 0x7a6   : > { %v7393_v2 = vadd.f32 %v4558_v62, %v3401_v51 }
 0x7aa   : > { %v5099_v47 = vpop.f32.mrb[92].mxu1 }
 0x7ab   : > { %v3414_v10 = vpop.f32.mrb[93].mxu1  ;;  %v7403_v33 = vadd.f32 %v5099_v47, %v4558_v62 }
 0x7ac   : > { %v5100_v44 = vpop.f32.mrb[94].mxu1 }
 0x7ad   : > { %v3417_v52 = vpop.f32.mrb[95].mxu1  ;;  %8006 = vst [vmem:[#allocation20_spill] sm:$0xff] %v7403_v33  ;;  %v7411_v14 = vadd.f32 %v5100_v44, %v4558_v62 }
 0x7af   : > { %8008 = vst [vmem:[#allocation19_spill] sm:$0xff] %v7411_v14 }
 0x7b2   : > { %v5103_v58 = vpop.f32.mrb[96].mxu1 }
 0x7b3   : > { %v3430_v59 = vpop.f32.mrb[97].mxu1 }
 0x7b4   : > { %v5104_v3 = vpop.f32.mrb[98].mxu1 }
 0x7b5   : > { %v3433_v9 = vpop.f32.mrb[99].mxu1  ;;  %v7435_v47 = vadd.f32 %v5104_v3, %v4558_v62  ;;  %v8012_v3 = vpack.i.bf16 %v7118_v34, %v7223_v0  ;;  %v8017_v34 = vpack.i.bf16 %v7147_v35, %v7265_v13  ;;  %v8022_v35 = vpack.i.bf16 %v7163_v61, %v7279_v12 }
 0x7b6   : > { %v7441_v44 = vadd.f32 %v4558_v62, %v3433_v9  ;;  %v8027_v61 = vpack.i.bf16 %v7195_v1, %v7323_v16 }
 0x7ba   : > { %v5107_v38 = vpop.f32.mrb[100].mxu1 }
 0x7bb   : > { %v7357_v8 = vadd.f32 %v5107_v38, %v4558_v62  ;;  %v3446_v4 = vpop.f32.mrb[101].mxu1  ;;  %v7387_v38 = vadd.f32 %v5096_v30, %v4558_v62  ;;  %v7417_v30 = vadd.f32 %v4558_v62, %v3417_v52 }
 0x7bc   : > { %v7361_v18 = vadd.f32 %v4558_v62, %v3446_v4  ;;  %v5108_v22 = vpop.f32.mrb[102].mxu1 }
 0x7bd   : > { %7999 = vst [vmem:[#allocation13_spill] sm:$0xff] %v7357_v8  ;;  %v7367_v11 = vadd.f32 %v5108_v22, %v4558_v62  ;;  %v3449_v42 = vpop.f32.mrb[103].mxu1  ;;  %v7383_v8 = vadd.f32 %v4558_v62, %v3398_v56  ;;  %8004 = vst [vmem:[#allocation15_spill] sm:$0xff] %v7387_v38  ;;  %v7427_v38 = vadd.f32 %v5103_v58, %v4558_v62 }
 0x7be   : > { %v7373_v37 = vadd.f32 %v4558_v62, %v3449_v42 }
 0x7bf   : > { %8001 = vst [vmem:[#allocation14_spill] sm:$0xff] %v7367_v11  ;;  %8010 = vst [vmem:[#allocation24_spill] sm:$0xff] %v7427_v38 }
 0x7c3   : > { %v5111_v19 = vpop.f32.mrb[104].mxu1 }
 0x7c4   : > { %v7381_v49 = vadd.f32 %v5111_v19, %v4558_v62  ;;  %v3462_v22 = vpop.f32.mrb[105].mxu1 }
 0x7c5   : > { %v7385_v25 = vadd.f32 %v4558_v62, %v3462_v22  ;;  %v5112_v54 = vpop.f32.mrb[106].mxu1 }
 0x7c6   : > { %8003 = vst [vmem:[#allocation17_spill] sm:$0xff] %v7381_v49  ;;  %v7391_v4 = vadd.f32 %v5112_v54, %v4558_v62  ;;  %v3465_v11 = vpop.f32.mrb[107].mxu1  ;;  %v7407_v49 = vadd.f32 %v4558_v62, %v3414_v10 }
 0x7c7   : > { %v7397_v19 = vadd.f32 %v4558_v62, %v3465_v11 }
 0x7c8   : > { %8005 = vst [vmem:[#allocation18_spill] sm:$0xff] %v7391_v4 }
 0x7cb   : > { %v5115_v22 = vpop.f32.mrb[108].mxu1 }
 0x7cc   : > { %v7405_v42 = vadd.f32 %v5115_v22, %v4558_v62  ;;  %v3478_v54 = vpop.f32.mrb[109].mxu1 }
 0x7cd   : > { %v7409_v51 = vadd.f32 %v4558_v62, %v3478_v54  ;;  %v5116_v48 = vpop.f32.mrb[110].mxu1 }
 0x7ce   : > { %8007 = vst [vmem:[#allocation21_spill] sm:$0xff] %v7405_v42  ;;  %v7415_v56 = vadd.f32 %v5116_v48, %v4558_v62  ;;  %v3481_v4 = vpop.f32.mrb[111].mxu1  ;;  %v7431_v42 = vadd.f32 %v4558_v62, %v3430_v59 }
 0x7cf   : > { %v7421_v22 = vadd.f32 %v4558_v62, %v3481_v4 }
 0x7d0   : > { %8009 = vst [vmem:[#allocation22_spill] sm:$0xff] %v7415_v56 }
 0x7d4   : > { %v5119_v54 = vpop.f32.mrb[112].mxu1 }
 0x7d5   : > { %v7429_v11 = vadd.f32 %v5119_v54, %v4558_v62  ;;  %v3494_v48 = vpop.f32.mrb[113].mxu1 }
 0x7d6   : > { %v7433_v52 = vadd.f32 %v4558_v62, %v3494_v48  ;;  %v5120_v33 = vpop.f32.mrb[114].mxu1 }
 0x7d7   : > { %8011 = vst [vmem:[#allocation25_spill] sm:$0xff] %v7429_v11  ;;  %v7439_v10 = vadd.f32 %v5120_v33, %v4558_v62  ;;  %v3497_v56 = vpop.f32.mrb[115].mxu1 }
 0x7d8   : > { %v5399_v58 = vpack.i.bf16 %v7431_v42, %v7433_v52  ;;  %v7445_v54 = vadd.f32 %v4558_v62, %v3497_v56 }
 0x80a   : > { %v3628_v48 = vpop.xlane.xlu0 %3627 }
 0x80b   : > { %v3632_v14 = vsub.f32 %v7344_v20, %v3628_v48  ;;  %v8013_v20 = vpack.i.bf16 %v7122_v45, %v7235_v50  ;;  %v8018_v45 = vpack.i.bf16 %v7135_v21, %v7248_v60  ;;  %v8023_v21 = vpack.i.bf16 %v7167_v40, %v7291_v43 }
 0x80d   : > { %v3634_v4 = vmul.f32 1.442695, %v3632_v14  ;;  %v8015_v14 = vpack.i.bf16 %v7114_v24, %v7229_v32  ;;  %v8020_v24 = vpack.i.bf16 %v7171_v23, %v7284_v53  ;;  %v8025_v23 = vpack.i.bf16 %v7203_v26, %v7329_v28 }
 0x80e   : > { %v3631_v33 = vpop.xlane.xlu0 %3630 }
 0x80f   : > { %5652 = vpow2.f32 %v3634_v4  ;;  %v3633_v9 = vsub.f32 %v7348_v36, %v3631_v33  ;;  %v8014_v36 = vpack.i.bf16 %v7110_v46, %v7217_v29  ;;  %v8019_v46 = vpack.i.bf16 %v7139_v15, %v7259_v5 }
 0x810   : > { %v8024_v15 = vpack.i.bf16 %v7199_v7, %v7316_v6 }
 0x811   : > { %v3636_v11 = vmul.f32 1.442695, %v3633_v9 }
 0x813   : > { %5654 = vpow2.f32 %v3636_v11  ;;  %v8016_v11 = vpack.i.bf16 %v7143_v27, %v7253_v41  ;;  %v8021_v27 = vpack.i.bf16 %v7175_v31, %v7297_v63  ;;  %v8026_v31 = vpack.i.bf16 %v7191_v55, %v7311_v39 }
 0x819   : > { %v5653_v38 = vpop.eup %5652 }
 0x81a   : > { %v3638_v62 = vsel %vm1140_vm1, %v5653_v38, 0.0 }
 0x81b   : > { %3639 = vadd.xlane.f32.xlu0 %v3638_v62 }
 0x81d   : > { %v5655_v56 = vpop.eup %5654 }
 0x81e   : > { %v3641_v59 = vsel %vm1140_vm1, %v5655_v56, 0.0 }
 0x81f   : > { %3642 = vadd.xlane.f32.xlu0 %v3641_v59 }
 0x84c   : > { %5304 = vxpose.xlu0.b32.start [1/16] (narrow) %v8012_v3, 64 }
 0x850   : > { %5306 = vxpose.xlu0.b32.cont [2/16] (narrow) %v8013_v20, 64 }
 0x854   : > { %5308 = vxpose.xlu0.b32.cont [3/16] (narrow) %v8014_v36, 64 }
 0x858   : > { %5310 = vxpose.xlu0.b32.cont [4/16] (narrow) %v8015_v14, 64 }
 0x85c   : > { %5312 = vxpose.xlu0.b32.cont [5/16] (narrow) %v8016_v11, 64 }
 0x860   : > { %5314 = vxpose.xlu0.b32.cont [6/16] (narrow) %v8017_v34, 64 }
 0x864   : > { %5316 = vxpose.xlu0.b32.cont [7/16] (narrow) %v8018_v45, 64 }
 0x868   : > { %5318 = vxpose.xlu0.b32.cont [8/16] (narrow) %v8019_v46, 64 }
 0x86c   : > { %5320 = vxpose.xlu0.b32.cont [9/16] (narrow) %v8020_v24, 64 }
 0x870   : > { %5322 = vxpose.xlu0.b32.cont [10/16] (narrow) %v8021_v27, 64 }
 0x874   : > { %5324 = vxpose.xlu0.b32.cont [11/16] (narrow) %v8022_v35, 64  ;;  %v8028_v35 = vmov 0.0  }
 0x878   : > { %5326 = vxpose.xlu0.b32.cont [12/16] (narrow) %v8023_v21, 64  ;;  %v5747_v21 = vmov 0  }
 0x87c   : > { %5328 = vxpose.xlu0.b32.cont [13/16] (narrow) %v8024_v15, 64 }
 0x880   : > { %5330 = vxpose.xlu0.b32.cont [14/16] (narrow) %v8025_v23, 64 }
 0x884   : > { %5332 = vxpose.xlu0.b32.cont [15/16] (narrow) %v8026_v31, 64 }
 0x888   : > { %5334 = vxpose.xlu0.b32.end [16/16] (narrow) %v8027_v61, 64  ;;  %v8029_v61 = vld [vmem:[#allocation43_spill] sm:$0xff] }
 0x8a8   : > { %v3640_v29 = vpop.xlane.xlu0 %3639 }
 0x8a9   : > { %5656 = vrcp.f32 %v3640_v29 }
 0x8ac   : > { %v3643_v40 = vpop.xlane.xlu0 %3642 }
 0x8ad   : > { %5658 = vrcp.f32 %v3643_v40  ;;  %v8030_v40 = vld [vmem:[#allocation44_spill] sm:$0xff] }
 0x8b3   : > { %v5657_v0 = vpop.eup %5656 }
 0x8b4   : > { %v3646_v7 = vmul.f32 %v5657_v0, %v5653_v38 }
 0x8b7   : > { %v5659_v32 = vpop.eup %5658 }
 0x8b8   : > { %v3647_v50 = vmul.f32 %v5659_v32, %v5655_v56 }
 0x8ba   : > { %v3648_v60 = vpack.c.bf16 %v3647_v50, %v3646_v7 }
 0x8bc   : > { %5142 = vmatmul.mubr.msk.bf16.vlgmr.msra.gmra.mrb[76].mxu0 %vm1140_vm1, %v3648_v60 }
 0x8bd   : > { %3731 = vmatprep.mubr.bf16.mxu0 %v5747_v21 }
 0x8cc   : > { %v5335_v26 = vpop.trf.xlu0 }
 0x8cd   : > { %v5339_v41 = vunpack.i.h.bf16 %v5335_v26  ;;  %v5336_v5 = vunpack.i.l.bf16 %v5335_v26 }
 0x8d0   : > { %v5340_v55 = vpop.trf.xlu0 }
 0x8d1   : > { %v5344_v13 = vunpack.i.h.bf16 %v5340_v55  ;;  %v5341_v12 = vunpack.i.l.bf16 %v5340_v55 }
 0x8d3   : > { %v3214_v53 = vpack.c.bf16 %v5341_v12, %v5336_v5  ;;  %v3213_v1 = vpack.c.bf16 %v5344_v13, %v5339_v41 }
 0x8d4   : > { %v5345_v43 = vpop.trf.xlu0 }
 0x8d5   : > { %3699 = vmatprep.subr.bf16.mxu0 %v3214_v53  ;;  %v5349_v63 = vunpack.i.h.bf16 %v5345_v43  ;;  %v5346_v39 = vunpack.i.l.bf16 %v5345_v43 }
 0x8d6   : > { %3700 = vmatpush1.bf16.msra.mxu0 %v3213_v1 }
 0x8d8   : > { %v5350_v6 = vpop.trf.xlu0 }
 0x8d9   : > { %v5354_v16 = vunpack.i.h.bf16 %v5350_v6  ;;  %v5351_v28 = vunpack.i.l.bf16 %v5350_v6 }
 0x8db   : > { %v3216_v38 = vpack.c.bf16 %v5351_v28, %v5346_v39  ;;  %v3215_v4 = vpack.c.bf16 %v5354_v16, %v5349_v63 }
 0x8dc   : > { %v5355_v59 = vpop.trf.xlu0 }
 0x8dd   : > { %3701 = vmatprep.subr.bf16.mxu0 %v3216_v38  ;;  %v5356_v3 = vunpack.i.l.bf16 %v5355_v59  ;;  %v5359_v20 = vunpack.i.h.bf16 %v5355_v59 }
 0x8de   : > { %3702 = vmatpush1.bf16.msra.mxu0 %v3215_v4 }
 0x8e0   : > { %v5360_v48 = vpop.trf.xlu0 }
 0x8e1   : > { %v5361_v33 = vunpack.i.l.bf16 %v5360_v48  ;;  %v5364_v36 = vunpack.i.h.bf16 %v5360_v48 }
 0x8e3   : > { %v3218_v9 = vpack.c.bf16 %v5361_v33, %v5356_v3  ;;  %v3217_v14 = vpack.c.bf16 %v5364_v36, %v5359_v20  ;;  %v5476_v36 = vld [vmem:[%s7753_s13] sm:$0xff]  }
 0x8e4   : > { %v5365_v62 = vpop.trf.xlu0 }
 0x8e5   : > { %3703 = vmatprep.subr.bf16.mxu0 %v3218_v9  ;;  %v5366_v11 = vunpack.i.l.bf16 %v5365_v62  ;;  %v5369_v45 = vunpack.i.h.bf16 %v5365_v62 }
 0x8e6   : > { %3704 = vmatpush1.bf16.msra.mxu0 %v3217_v14  ;;  %v5477_v14 = vld [vmem:[%s7753_s13 + $0x8] sm:$0xff]  }
 0x8e8   : > { %v5370_v56 = vpop.trf.xlu0 }
 0x8e9   : > { %v5371_v34 = vunpack.i.l.bf16 %v5370_v56  ;;  %v5374_v46 = vunpack.i.h.bf16 %v5370_v56 }
 0x8eb   : > { %v3220_v24 = vpack.c.bf16 %v5371_v34, %v5366_v11  ;;  %v3219_v27 = vpack.c.bf16 %v5374_v46, %v5369_v45 }
 0x8ed   : > { %3705 = vmatprep.subr.bf16.mxu0 %v3220_v24 }
 0x8ee   : > { %3706 = vmatpush1.bf16.msra.mxu0 %v3219_v27 }
 0x8ef   : > { %5145 = vmatprep.subr.bf16.mxu0 %v8028_v35 }
 0x98f   : > { %v3686_v15 = vpop.f32.mrb[76].mxu0 }
 0x990   : > { %v5143_v23 = vpop.f32.mrb[77].mxu0  ;;  %v7507_v29 = vadd.f32 %v3686_v15, %v8029_v61 }
 0x991   : > { %v3689_v31 = vpop.f32.mrb[78].mxu0 }
 0x992   : > { %v7510_v0 = vadd.f32 %v3689_v31, %v8030_v40  ;;  %v5144_v32 = vpop.f32.mrb[79].mxu0  ;;  %v5478_v40 = vld [vmem:[%s7753_s13 + $0x10] sm:$0xff]  }
 0x993   : > { %v5479_v32 = vld [vmem:[%s7753_s13 + $0x18] sm:$0xff]  }
 0x994   : > { %v3695_v7 = vpack.c.bf16 %v7510_v0, %v7507_v29 }
 0x996   : > { %4581 = vmatmul.mubr.msk.bf16.vlgmr.msra.gmra.mrb[80].mxu0 %vm1140_vm1, %v3695_v7 }
 0x997   : > { %5153 = vmatprep.mubr.msk.bf16.mxu0 %vm5745_vm2, %v8028_v35  ;;  %5146 = vmatpush3.bf16.msra.mxu0 %v5476_v36 }
 0x998   : > { %5147 = vmatprep.subr.bf16.mxu0 %v8028_v35 }
 0x99b   : > { %5148 = vmatpush3.bf16.msra.mxu0 %v5477_v14 }
 0x99c   : > { %5149 = vmatprep.subr.bf16.mxu0 %v8028_v35 }
 0x99f   : > { %5150 = vmatpush3.bf16.msra.mxu0 %v5478_v40 }
 0x9a0   : > { %5151 = vmatprep.subr.bf16.mxu0 %v8028_v35 }
 0x9a3   : > { %5152 = vmatpush3.bf16.msra.mxu0 %v5479_v32  ;;  %v4055_v32 = vld [vmem:[%s7759_s19 + $0x10] sm:$0xff] }
 0x9a4   : > { %5157 = vmatprep.subr.bf16.mxu0 %v8028_v35 }
 0xa69   : > { %v3733_v50 = vpop.f32.mrb[80].mxu0 }
 0xa6a   : > { %v3742_v60 = vmul.f32 0.125, %v3733_v50  ;;  %v3735_v26 = vpop.f32.mrb[81].mxu0 }
 0xa6b   : > { %v3743_v41 = vmul.f32 0.125, %v3735_v26  ;;  %v3737_v5 = vpop.f32.mrb[82].mxu0 }
 0xa6c   : > { %v3739_v55 = vpop.f32.mrb[83].mxu0  ;;  %v3744_v12 = vmul.f32 0.125, %v3737_v5 }
 0xa6d   : > { %v3746_v13 = vmax.f32 %v3742_v60, %v3743_v41  ;;  %v3745_v53 = vmul.f32 0.125, %v3739_v55 }
 0xa6f   : > { %3747 = vmax.xlane.f32.xlu1 %v3746_v13  ;;  %v3749_v1 = vmax.f32 %v3744_v12, %v3745_v53 }
 0xa73   : > { %3750 = vmax.xlane.f32.xlu1 %v3749_v1  ;;  %v5481_v1 = vld [vmem:[%s7755_s15 + $0x8] sm:$0xff]  }
 0xafc   : > { %v3748_v43 = vpop.xlane.xlu1 %3747 }
 0xafd   : > { %v3752_v63 = vsub.f32 %v3742_v60, %v3748_v43  ;;  %v3753_v39 = vsub.f32 %v3743_v41, %v3748_v43  ;;  %v5484_v43 = vld [vmem:[%s7755_s15 + $0x20] sm:$0xff]  }
 0xaff   : > { %v3756_v6 = vmul.f32 1.442695, %v3752_v63  ;;  %v3758_v16 = vmul.f32 1.442695, %v3753_v39  ;;  %v5485_v63 = vld [vmem:[%s7755_s15 + $0x28] sm:$0xff]   ;;  %v5486_v39 = vld [vmem:[%s7755_s15 + $0x30] sm:$0xff]  }
 0xb00   : > { %v3751_v28 = vpop.xlane.xlu1 %3750 }
 0xb01   : > { %5660 = vpow2.f32 %v3756_v6  ;;  %v3754_v38 = vsub.f32 %v3744_v12, %v3751_v28  ;;  %v3755_v4 = vsub.f32 %v3745_v53, %v3751_v28  ;;  %v5480_v12 = vld [vmem:[%s7755_s15] sm:$0xff]   ;;  %v5487_v6 = vld [vmem:[%s7755_s15 + $0x38] sm:$0xff]  }
 0xb02   : > { %5662 = vpow2.f32 %v3758_v16  ;;  %v4582_v16 = vld [vmem:[%s7754_s14] ss:$0 sm:$0xff] }
 0xb03   : > { %v3760_v59 = vmul.f32 1.442695, %v3754_v38  ;;  %v3762_v3 = vmul.f32 1.442695, %v3755_v4 }
 0xb05   : > { %5664 = vpow2.f32 %v3760_v59 }
 0xb06   : > { %5666 = vpow2.f32 %v3762_v3 }
 0xb0b   : > { %v5661_v48 = vpop.eup %5660 }
 0xb0c   : > { %v5663_v33 = vpop.eup %5662 }
 0xb0d   : > { %v3764_v9 = vadd.f32 %v5663_v33, %v5661_v48 }
 0xb0f   : > { %v5665_v62 = vpop.eup %5664  ;;  %3765 = vadd.xlane.f32.xlu0 %v3764_v9 }
 0xb10   : > { %v5667_v56 = vpop.eup %5666 }
 0xb11   : > { %v3767_v20 = vadd.f32 %v5667_v56, %v5665_v62 }
 0xb13   : > { %3768 = vadd.xlane.f32.xlu1 %v3767_v20  ;;  %v4596_v20 = vld [vmem:[%s7756_s16] ss:$0 sm:$0xff] }
 0xb9c   : > { %v3766_v11 = vpop.xlane.xlu0 %3765 }
 0xb9d   : > { %5668 = vrcp.f32 %v3766_v11 }
 0xba0   : > { %v3769_v34 = vpop.xlane.xlu1 %3768 }
 0xba1   : > { %5670 = vrcp.f32 %v3769_v34 }
 0xba7   : > { %v5669_v45 = vpop.eup %5668 }
 0xba8   : > { %v3772_v24 = vmul.f32 %v5669_v45, %v5661_v48  ;;  %v3773_v15 = vmul.f32 %v5669_v45, %v5663_v33 }
 0xbab   : > { %v5671_v46 = vpop.eup %5670 }
 0xbac   : > { %v3774_v27 = vmul.f32 %v5671_v46, %v5665_v62  ;;  %v3775_v23 = vmul.f32 %v5671_v46, %v5667_v56 }
 0xbae   : > { %v3777_v31 = vpack.c.bf16 %v3775_v23, %v3773_v15  ;;  %v3776_v61 = vpack.c.bf16 %v3774_v27, %v3772_v24 }
 0xbb0   : > { %3810 = vmatprep.mubr.bf16.mxu1 %v3777_v31  ;;  %v4053_v31 = vld [vmem:[%s7759_s19] sm:$0xff] }
 0xbb1   : > { %3811 = vmatmul.mubr.bf16.vlgmr.msra.gmra.mrb[116].mxu1 %v3776_v61  ;;  %v4054_v61 = vld [vmem:[%s7759_s19 + $0x8] sm:$0xff] }
 0xbb2   : > { %v5208_v40 = vpack.c.bf16 %v4054_v61, %v4053_v31  ;;  %v5490_v31 = vld [vmem:[%s7757_s17 + $0x10] sm:$0xff]   ;;  %v5491_v61 = vld [vmem:[%s7757_s17 + $0x18] sm:$0xff]  }
 0xbb4   : > { %5209 = vmatprep.subr.bf16.mxu1 %v5208_v40 }
 0xbb5   : > { %5211 = vmatpush3.bf16.msra.mxu1 %v5208_v40 }
 0xc84   : > { %v4788_v7 = vpop.f32.mrb[116].mxu1 }
 0xc85   : > { %v4789_v50 = vpop.f32.mrb[117].mxu1 }
 0xc86   : > { %v4790_v60 = vadd.f32 %v4789_v50, %v4788_v7  ;;  %v4791_v26 = vpop.f32.mrb[118].mxu1  ;;  %v4056_v7 = vld [vmem:[%s7759_s19 + $0x18] sm:$0xff] }
 0xc87   : > { %v4792_v41 = vpop.f32.mrb[119].mxu1  ;;  %v5212_v50 = vpack.c.bf16 %v4056_v7, %v4055_v32 }
 0xc88   : > { %v4793_v5 = vadd.f32 %v4792_v41, %v4791_v26  ;;  %v3819_v55 = vadd.f32 %v4790_v60, %v7507_v29  ;;  %v5482_v29 = vld [vmem:[%s7755_s15 + $0x10] sm:$0xff]   ;;  %v4057_v60 = vld [vmem:[%s7759_s19 + $0x20] sm:$0xff]  ;;  %v4058_v26 = vld [vmem:[%s7759_s19 + $0x28] sm:$0xff] }
 0xc89   : > { %v4059_v41 = vld [vmem:[%s7759_s19 + $0x30] sm:$0xff]  ;;  %5213 = vmatprep.subr.bf16.mxu1 %v5212_v50 }
 0xc8a   : > { %v3820_v13 = vadd.f32 %v4793_v5, %v7510_v0  ;;  %v5483_v0 = vld [vmem:[%s7755_s15 + $0x18] sm:$0xff]   ;;  %v5216_v5 = vpack.c.bf16 %v4058_v26, %v4057_v60  ;;  %5215 = vmatpush3.bf16.msra.mxu1 %v5212_v50 }
 0xc8c   : > { %v3821_v53 = vpack.c.bf16 %v3820_v13, %v3819_v55  ;;  %5217 = vmatprep.subr.bf16.mxu1 %v5216_v5 }
 0xc8e   : > { %5154 = vmatmul.mubr.msk.bf16.vlgmr.msra.gmra.mrb[84].mxu0 %vm1140_vm1, %v3821_v53  ;;  %5219 = vmatpush3.bf16.msra.mxu1 %v5216_v5  ;;  %v8032_v53 = vpack.i.bf16 %v7369_v57, %v7373_v37  ;;  %v8044_v37 = vld [vmem:[#allocation15_spill] sm:$0xff] }
 0xc8f   : > { %5158 = vmatpush3.bf16.msra.mxu0 %v5480_v12  ;;  %5173 = vmatprep.mubr.msk.bf16.mxu0 %vm5745_vm2, %v8028_v35  ;;  %v8031_v12 = vpack.i.bf16 %v7359_v17, %v7361_v18  ;;  %v8040_v18 = vpack.i.bf16 %v7393_v2, %v7397_v19  ;;  %v8041_v17 = vld [vmem:[#allocation16_spill] sm:$0xff]  ;;  %v8052_v19 = vld [vmem:[#allocation19_spill] sm:$0xff] }
 0xc90   : > { %5159 = vmatprep.subr.bf16.mxu0 %v8028_v35 }
 0xc93   : > { %5160 = vmatpush3.bf16.msra.mxu0 %v5481_v1  ;;  %v8033_v1 = vld [vmem:[#allocation12_spill] sm:$0xff] }
 0xc94   : > { %5161 = vmatprep.subr.bf16.mxu0 %v8028_v35 }
 0xc97   : > { %5162 = vmatpush3.bf16.msra.mxu0 %v5482_v29  ;;  %v8034_v29 = vld [vmem:[#allocation13_spill] sm:$0xff] }
 0xc98   : > { %5163 = vmatprep.subr.bf16.mxu0 %v8028_v35 }
 0xc9b   : > { %5164 = vmatpush3.bf16.msra.mxu0 %v5483_v0  ;;  %v8035_v0 = vpack.i.bf16 %v8033_v1, %v8034_v29 }
 0xc9c   : > { %5165 = vmatprep.subr.bf16.mxu0 %v8028_v35 }
 0xc9f   : > { %5166 = vmatpush3.bf16.msra.mxu0 %v5484_v43  ;;  %v8036_v43 = vld [vmem:[#allocation11_spill] sm:$0xff] }
 0xca0   : > { %5167 = vmatprep.subr.bf16.mxu0 %v8028_v35 }
 0xca3   : > { %5168 = vmatpush3.bf16.msra.mxu0 %v5485_v63  ;;  %v8037_v63 = vld [vmem:[#allocation14_spill] sm:$0xff] }
 0xca4   : > { %5169 = vmatprep.subr.bf16.mxu0 %v8028_v35 }
 0xca7   : > { %5170 = vmatpush3.bf16.msra.mxu0 %v5486_v39  ;;  %v8038_v39 = vpack.i.bf16 %v8036_v43, %v8037_v63 }
 0xca8   : > { %5171 = vmatprep.subr.bf16.mxu0 %v8028_v35 }
 0xcab   : > { %5172 = vmatpush3.bf16.msra.mxu0 %v5487_v6  ;;  %v8039_v6 = vpack.i.bf16 %v7383_v8, %v7385_v25  ;;  %v8048_v8 = vpack.i.bf16 %v7417_v30, %v7421_v22  ;;  %v8049_v25 = vld [vmem:[#allocation20_spill] sm:$0xff]  ;;  %v8059_v22 = vpack.i.bf16 %v7435_v47, %v7439_v10 }
 0xd61   : > { %v3898_v28 = vpop.f32.mrb[84].mxu0 }
 0xd62   : > { %v3899_v38 = vadd.f32 %v4582_v16, %v3898_v28  ;;  %v5155_v4 = vpop.f32.mrb[85].mxu0  ;;  %v8045_v28 = vld [vmem:[#allocation18_spill] sm:$0xff] }
 0xd63   : > { %v3901_v59 = vpop.f32.mrb[86].mxu0  ;;  %v8047_v4 = vpack.i.bf16 %v7407_v49, %v7409_v51  ;;  %v8055_v49 = vpack.i.bf16 %v7441_v44, %v7445_v54  ;;  %v8056_v51 = vld [vmem:[#allocation24_spill] sm:$0xff] }
 0xd64   : > { %v3902_v3 = vadd.f32 %v4582_v16, %v3901_v59  ;;  %v5156_v48 = vpop.f32.mrb[87].mxu0  ;;  %v3905_v33 = vmax.f32 %v3899_v38, 0.0  ;;  %v8042_v16 = vld [vmem:[#allocation17_spill] sm:$0xff]  ;;  %v8046_v38 = vpack.i.bf16 %v8044_v37, %v8045_v28 }
 0xd65   : > { %v8043_v57 = vpack.i.bf16 %v8041_v17, %v8042_v16  ;;  %v8050_v59 = vld [vmem:[#allocation21_spill] sm:$0xff] }
 0xd66   : > { %v3906_v9 = vmax.f32 %v3902_v3, 0.0  ;;  %v8051_v2 = vpack.i.bf16 %v8049_v25, %v8050_v59  ;;  %v8053_v3 = vld [vmem:[#allocation22_spill] sm:$0xff] }
 0xd67   : > { %v8054_v48 = vpack.i.bf16 %v8052_v19, %v8053_v3 }
 0xd68   : > { %v3907_v62 = vpack.c.bf16 %v3906_v9, %v3905_v33  ;;  %v8057_v33 = vld [vmem:[#allocation25_spill] sm:$0xff] }
 0xd69   : > { %v8058_v30 = vpack.i.bf16 %v8056_v51, %v8057_v33 }
 0xd6a   : > { %5174 = vmatmul.mubr.bf16.vlgmr.msra.gmra.mrb[88].mxu0 %v3907_v62 }
 0xd6b   : > { %4266 = vmatprep.mubr.bf16.mxu0 %v5747_v21 }
 0xe3d   : > { %v4006_v56 = vpop.f32.mrb[88].mxu0 }
 0xe3e   : > { %v4013_v36 = vadd.f32 %v4006_v56, %v3819_v55  ;;  %v5175_v14 = vpop.f32.mrb[89].mxu0  ;;  %v4060_v55 = vld [vmem:[%s7759_s19 + $0x38] sm:$0xff] }
 0xe3f   : > { %v4009_v11 = vpop.f32.mrb[90].mxu0 }
 0xe40   : > { %v7576_v34 = vadd.f32 %v4596_v20, %v4013_v36  ;;  %v4014_v45 = vadd.f32 %v4009_v11, %v3820_v13  ;;  %v5176_v46 = vpop.f32.mrb[91].mxu0  ;;  %v5220_v13 = vpack.c.bf16 %v4060_v55, %v4059_v41 }
 0xe42   : > { %v7578_v24 = vadd.f32 %v4596_v20, %v4014_v45  ;;  %v4025_v27 = vmul.f32 %v7576_v34, %v7576_v34  ;;  %5221 = vmatprep.subr.bf16.mxu1 %v5220_v13 }
 0xe43   : > { %5223 = vmatpush3.bf16.msra.mxu1 %v5220_v13 }
 0xe44   : > { %v4027_v15 = vsel %vm1140_vm1, %v4025_v27, 0.0  ;;  %v4026_v21 = vmul.f32 %v7578_v24, %v7578_v24  ;;  %5196 = vmatprep.subr.bf16.mxu1 %v8028_v35  ;;  %v4024_v40 = vpack.c.bf16 %v7578_v24, %v7576_v34 }
 0xe45   : > { %4028 = vadd.xlane.f32.xlu1 %v4027_v15  ;;  %v5488_v15 = vld [vmem:[%s7757_s17] sm:$0xff]  }
 0xe46   : > { %v4030_v23 = vsel %vm1140_vm1, %v4026_v21, 0.0 }
 0xe49   : > { %4031 = vadd.xlane.f32.xlu1 %v4030_v23  ;;  %v5489_v23 = vld [vmem:[%s7757_s17 + $0x8] sm:$0xff]  }
 0xe7c   : > { %5376 = vxpose.xlu1.b32.start [1/16] (narrow) %v8031_v12, 32 }
 0xe80   : > { %5378 = vxpose.xlu1.b32.cont [2/16] (narrow) %v8032_v53, 32 }
 0xe84   : > { %5380 = vxpose.xlu1.b32.cont [3/16] (narrow) %v8035_v0, 32 }
 0xe88   : > { %5382 = vxpose.xlu1.b32.cont [4/16] (narrow) %v8038_v39, 32 }
 0xe8c   : > { %5384 = vxpose.xlu1.b32.cont [5/16] (narrow) %v8039_v6, 32  ;;  %v4599_v6 = vld [vmem:[%s7758_s18] ss:$0 sm:$0xff] }
 0xe90   : > { %5386 = vxpose.xlu1.b32.cont [6/16] (narrow) %v8040_v18, 32 }
 0xe94   : > { %5388 = vxpose.xlu1.b32.cont [7/16] (narrow) %v8043_v57, 32 }
 0xe98   : > { %5390 = vxpose.xlu1.b32.cont [8/16] (narrow) %v8046_v38, 32 }
 0xe9c   : > { %5392 = vxpose.xlu1.b32.cont [9/16] (narrow) %v8047_v4, 32 }
 0xea0   : > { %5394 = vxpose.xlu1.b32.cont [10/16] (narrow) %v8048_v8, 32 }
 0xea4   : > { %5396 = vxpose.xlu1.b32.cont [11/16] (narrow) %v8051_v2, 32 }
 0xea8   : > { %5398 = vxpose.xlu1.b32.cont [12/16] (narrow) %v8054_v48, 32 }
 0xeac   : > { %5400 = vxpose.xlu1.b32.cont [13/16] (narrow) %v5399_v58, 32 }
 0xeb0   : > { %5402 = vxpose.xlu1.b32.cont [14/16] (narrow) %v8055_v49, 32 }
 0xeb4   : > { %5404 = vxpose.xlu1.b32.cont [15/16] (narrow) %v8058_v30, 32 }
 0xeb8   : > { %5406 = vxpose.xlu1.b32.end [16/16] (narrow) %v8059_v22, 32 }
 0xed2   : > { %v4029_v9 = vpop.xlane.xlu1 %4028 }
 0xed3   : > { %5672 = vrsqrt.f32 %v4029_v9  ;;  %vm4035_vm7 = vcmp.eq.f32.partialorder %v4029_v9, inf  ;;  %v4038_v42 = vand.u32 2147483648, %v4029_v9  ;;  %vm4037_vm8 = vcmp.eq.f32.partialorder %v4029_v9, 0.0 }
 0xed6   : > { %v4032_v62 = vpop.xlane.xlu1 %4031 }
 0xed7   : > { %5674 = vrsqrt.f32 %v4032_v62  ;;  %vm4042_vm9 = vcmp.eq.f32.partialorder %v4032_v62, inf  ;;  %v4045_v14 = vand.u32 2147483648, %v4032_v62  ;;  %vm4044_vm10 = vcmp.eq.f32.partialorder %v4032_v62, 0.0 }
 0xedd   : > { %v5673_v56 = vpop.eup %5672 }
 0xede   : > { %v4034_v20 = vmul.f32 %v5673_v56, %v4029_v9 }
 0xee0   : > { %v4036_v52 = vsel %vm4035_vm7, %v4029_v9, %v4034_v20 }
 0xee1   : > { %v5675_v44 = vpop.eup %5674  ;;  %v4039_v58 = vsel %vm4037_vm8, %v4038_v42, %v4036_v52 }
 0xee2   : > { %v4047_v54 = vadd.f32 1e-06, %v4039_v58  ;;  %v4041_v36 = vmul.f32 %v5675_v44, %v4032_v62 }
 0xee4   : > { %5676 = vrcp.f32 %v4047_v54  ;;  %v4043_v11 = vsel %vm4042_vm9, %v4032_v62, %v4041_v36 }
 0xee5   : > { %v4046_v47 = vsel %vm4044_vm10, %v4045_v14, %v4043_v11 }
 0xee6   : > { %v4048_v10 = vadd.f32 1e-06, %v4046_v47 }
 0xee8   : > { %5678 = vrcp.f32 %v4048_v10 }
 0xeee   : > { %v5677_v45 = vpop.eup %5676 }
 0xeef   : > { %v4050_v46 = vmul.f32 %v5677_v45, %v7576_v34 }
 0xef1   : > { %5193 = vmatprep.mubr.msk.f32.mxu1 %vm1140_vm1, %v4050_v46 }
 0xef2   : > { %v5679_v27 = vpop.eup %5678 }
 0xef3   : > { %v4052_v21 = vmul.f32 %v5679_v27, %v7578_v24 }
 0xef5   : > { %5194 = vmatmul.mubr.msk.f32.vlgmr.msra.gmra.mrb[120].mxu1 %vm1140_vm1, %v4052_v21 }
 0xef6   : > { %5197 = vmatpush3.bf16.msra.mxu1 %v5488_v15  ;;  %5204 = vmatprep.mubr.msk.bf16.mxu1 %vm5745_vm2, %v8028_v35 }
 0xef7   : > { %5198 = vmatprep.subr.bf16.mxu1 %v8028_v35 }
 0xefa   : > { %5199 = vmatpush3.bf16.msra.mxu1 %v5489_v23 }
 0xefb   : > { %5200 = vmatprep.subr.bf16.mxu1 %v8028_v35 }
 0xefc   : > { %v5407_v32 = vpop.trf.xlu1 }
 0xefd   : > { %v5408_v50 = vunpack.i.l.bf16 %v5407_v32  ;;  %v5411_v26 = vunpack.i.h.bf16 %v5407_v32 }
 0xefe   : > { %5201 = vmatpush3.bf16.msra.mxu1 %v5490_v31 }
 0xeff   : > { %5202 = vmatprep.subr.bf16.mxu1 %v8028_v35 }
 0xf00   : > { %v5412_v7 = vpop.trf.xlu1 }
 0xf01   : > { %v5413_v60 = vunpack.i.l.bf16 %v5412_v7  ;;  %v5416_v41 = vunpack.i.h.bf16 %v5412_v7 }
 0xf02   : > { %5203 = vmatpush3.bf16.msra.mxu1 %v5491_v61 }
 0xf03   : > { %v3574_v5 = vpack.c.bf16 %v5413_v60, %v5408_v50  ;;  %v3573_v13 = vpack.c.bf16 %v5416_v41, %v5411_v26 }
 0xf04   : > { %v5417_v55 = vpop.trf.xlu1 }
 0xf05   : > { %5205 = vmatmul.mubr.msk.bf16.vlgmr.msra.gmra.mrb[124].mxu1 %vm1140_vm1, %v4024_v40  ;;  %4234 = vmatprep.subr.bf16.mxu0 %v3574_v5  ;;  %v5421_v12 = vunpack.i.h.bf16 %v5417_v55  ;;  %v5418_v35 = vunpack.i.l.bf16 %v5417_v55 }
 0xf06   : > { %4235 = vmatpush1.bf16.msra.mxu0 %v3573_v13 }
 0xf08   : > { %v5422_v53 = vpop.trf.xlu1 }
 0xf09   : > { %v5426_v1 = vunpack.i.h.bf16 %v5422_v53  ;;  %v5423_v29 = vunpack.i.l.bf16 %v5422_v53 }
 0xf0b   : > { %v3575_v34 = vpack.c.bf16 %v5426_v1, %v5421_v12  ;;  %v3576_v24 = vpack.c.bf16 %v5423_v29, %v5418_v35 }
 0xf0d   : > { %4236 = vmatprep.subr.bf16.mxu0 %v3576_v24 }
 0xf0e   : > { %4237 = vmatpush1.bf16.msra.mxu0 %v3575_v34 }
 0xfc8   : > { %v5195_v0 = vpop.f32.mrb[120].mxu1 }
 0xfc9   : > { %v4143_v43 = vmul.f32 14.285714, %v5195_v0  ;;  %v4133_v63 = vpop.f32.mrb[121].mxu1 }
 0xfca   : > { %v4142_v39 = vmul.f32 14.285714, %v4133_v63 }
 0xfcb   : > { %4145 = vst [vmem:[%s674_s21 + $0x8] sm:$0xff] %v4143_v43 }
 0xfcc   : > { %4144 = vst [vmem:[%s674_s21] sm:$0xff] %v4142_v39  ;;  %s5684_s21 = sshll.u32 %s5748_s26, 4  ;;  %s5685_s21 = int_to_ptr.vmem [resolvable:$false] %s5684_s21 }
 0xfcd   : > { %s5686_s6 = scalar_lea.vmem %s5685_s21, 512  ;;  %p5687_p0 = scmp.lt.s32.totalorder %s7687_s27, %s5685_s21 }
 0xfce   : > { %p5688_p1 = scmp.lt.s32.totalorder %s5686_s6, %s5680_s2 }
 0xfd0   : > { %p5689_p2 = por %p5688_p1, %p5687_p0 }
 0xfd2   : > { %p5690_p3 = pnand %p5689_p2, %p5683_p13 }
 0xfd8   : > { %v4222_v18 = vpop.f32.mrb[124].mxu1 }
 0xfd9   : > { %v5206_v17 = vpop.f32.mrb[125].mxu1  ;;  %v4223_v57 = vadd.f32 %v4599_v6, %v4222_v18 }
 0xfda   : > { %v4225_v16 = vpop.f32.mrb[126].mxu1 }
 0xfdb   : > { %v4226_v37 = vadd.f32 %v4599_v6, %v4225_v16  ;;  %v5207_v28 = vpop.f32.mrb[127].mxu1 }
 0xfdd   : > { %v4229_v38 = vpack.c.bf16 %v4226_v37, %v4223_v57 }
 0xfdf   : > { %4605 = vmatmul.mubr.msk.bf16.vlgmr.msra.gmra.mrb[92].mxu0 %vm4230_vm11, %v4229_v38 }
 0xfe0   : > { %5693 = shalt.err (!%p5690_p3)
}
 0xfe1   : > { %s5694_s3 = scalar_lea.hbm %s7693_s1, 256  ;;  %s5698_s30 = scalar_lea.hbm %s8060_s22, 512 }
 0xfe2   : > { %p5695_p4 = scmp.ne.s32.totalorder %s7693_s1, %s5694_s3  ;;  %p5699_p9 = scmp.lt.u32.totalorder %s7693_s1, %s8060_s22 }
 0xfe3   : > { %p5700_p10 = scmp.lt.u32.totalorder %s5698_s30, %s5694_s3  ;;  %p5702_p12 = scmp.lt.u32.totalorder %s5694_s3, %s7693_s1 }
 0xfe4   : > { %p5696_p7 = pnand %p5695_p4, %p5899_p5 }
 0xfe5   : > { %p5701_p11 = por %p5700_p10, %p5699_p9 }
 0xfe6   : > { %p5697_p8 = pneg %p5696_p7 }
 0xfe7   : > { %p5703_p13 = por %p5702_p12, %p5701_p11 }
 0xfe9   : > { %p5704_p0 = pnand %p5703_p13, %p5697_p8 }
 0xfeb   : > { %5707 = shalt.err (!%p5704_p0)
}
 0xfec   : > { %s5749_s6 = smov 128   ;;  %s5750_s2 = smov 8  }
 0xfed   : > { %5258 = dma.vmem_to_hbm [thread:$0]  (%p5899_p5), %s7687_s27, 256, %s7693_s1, %s7695_s0, %s5749_s6, %s5749_s6, %s5750_s2  }
 0xfee   : > { %s4612_s21 = sshll.u32 %s5917_s4, 5  ;;  %s8061_s20 = sld [smem:[#allocation54_spill]] }
 0xff4   : > { %s698_s26 = scalar_lea.vmem %s8061_s20, %s4612_s21 }
0x10b2   : > { %v4268_v4 = vpop.f32.mrb[92].mxu0 }
0x10b3   : > { %4277 = vst [vmem:[%s698_s26] sm:$0xff] %v4268_v4  ;;  %v4270_v8 = vpop.f32.mrb[93].mxu0 }
0x10b4   : > { %4278 = vst [vmem:[%s698_s26 + $0x8] sm:$0xff] %v4270_v8  ;;  %v4272_v25 = vpop.f32.mrb[94].mxu0 }
0x10b5   : > { %4279 = vst [vmem:[%s698_s26 + $0x10] sm:$0xff] %v4272_v25  ;;  %v4274_v59 = vpop.f32.mrb[95].mxu0 }
0x10b6   : > { %4280 = vst [vmem:[%s698_s26 + $0x18] sm:$0xff] %v4274_v59 }
0x10b7 PF: > { %s8062_s3 = sld [smem:[#allocation7_spill]]  ;;  %s8063_s30 = sld [smem:[#allocation5_spill]] }
0x10bd   : > { %p5264_p1 = scmp.ge.s32.totalorder %s8062_s3, 2  ;;  %s4318_s5 = sand.u32 1, %s8063_s30  }
0x10be   : > { %s4319_s4 = scalar_lea.sflag [#allocation3], %s4318_s5 }
0x10bf   : > { %p5261_p5 = pnand %p5264_p1, %p5903_p6 }
0x10c1   : > { %5725 = dma.done.wait (!%p5261_p5), %s4319_s4, 256  }
0x10c2   : > { %5727 = vsyncadd (!%p5261_p5), %s4319_s4, 4294967040  ;;  %s8065_s27 = sld [smem:[#allocation8_spill]]  ;;  %s8066_s1 = sld [smem:[#allocation6_spill]] }
0x10c3   : > { %s8067_s26 = sld [smem:[#allocation9_spill]]  ;;  %s8068_s2 = smov %s5734_s25 }
0x10c8   : > { %p32_p2 = scmp.ge.s32.totalorder %s8065_s27, 4   ;;  %s8069_s25 = smov %s8066_s1 }
0x10ca   :  { %34 = sbr.rel (!%p32_p2) target bundleno = 14 (0xe), region = 153 }
0x10d1   :  { %4332 = vsyncpa [#allocation3], 1 }
0x10d2   :  { %4334 = vsyncpa [#allocation3 + $0x1], 1 }

</bundles_post_ra>
